<compile_context>
chip_gen: v6e
topology: v6e:2x2x1
jax: 0.10.0
libtpu: 0.0.40
codegen_flags: <defaults>
</compile_context>

<pallas_src>
import functools

import numpy as np
import jax
import jax.numpy as jnp
from jax.experimental import pallas as pl
from jax.experimental.pallas import tpu as pltpu


WEIGHT_DTYPE = jnp.bfloat16   # MXU operand dtype; accumulation stays f32


def pick_act_dtype():
    """bf16 activations on chips with bf16 VPU/EUP (v6e/v7x); f32 otherwise."""
    try:
        kind = jax.devices()[0].device_kind.lower()
    except Exception:  # pragma: no cover
        kind = ""
    if "v6" in kind or "v7" in kind:
        return jnp.bfloat16
    return jnp.float32


# ----------------------------- Pallas kernel ------------------------------- #
def coupling_kernel(x_ref, yc_ref, mask_ref, sf_ref,
                    cw0, cb0, cw1, cb1, cw2, cb2,
                    nw0x, wf, bf0,
                    nw1, nb1, nw2, nb2,
                    nwh, nbh,
                    out_ref, *, act_dtype):
    x = x_ref[...]                       # (bB, x_dim)        f32
    yc = yc_ref[...]                     # (bB, y_dim+task)   f32
    mask = mask_ref[...]                 # (1, x_dim)         f32, broadcasts
    x_dim = x.shape[-1]

    def dense(h, w_ref, b_ref=None):
        # bf16 x bf16 -> f32 accumulation on the MXU; bias add in f32.
        out = jnp.dot(h.astype(WEIGHT_DTYPE), w_ref[...],
                      preferred_element_type=jnp.float32)
        if b_ref is not None:
            out = out + b_ref[...]
        return out

    def act(pre):
        # tanh on bf16 vregs on v6e/v7x (bf16 EUP); f32 on v5e.
        return jnp.tanh(pre.astype(act_dtype))

    # conditioner MLP (MyDense, weight-normed); its last Linear is folded into
    # the main net's first Linear (w_fused / b_fused), so only 3 dots here.
    h = act(dense(yc, cw0, cb0))
    h = act(dense(h, cw1, cb1))
    hc = act(dense(h, cw2, cb2))         # (bB, H)

    masked_x = x * mask
    # main MLP layer 0:  concat([masked_x, cond]) @ nw0 + nb0
    #   == masked_x @ nw0_x + hc @ (cw3 @ nw0_c) + (cb3 @ nw0_c + nb0)
    h = act(dense(masked_x, nw0x) + dense(hc, wf) + bf0[...])
    h = act(dense(h, nw1, nb1))
    h = act(dense(h, nw2, nb2))

    one_minus_mask = 1.0 - mask
    # packed head: one (H, 2*x_dim) matmul, static lane slices for the halves
    head = dense(h, nwh, nbh)            # (bB, 2*x_dim) f32
    shift = head[:, :x_dim] * one_minus_mask
    scale_raw = head[:, x_dim:] * one_minus_mask

    s_fac = sf_ref[0]                    # exp(sf)  (precomputed, SMEM)
    inv_s = sf_ref[1]                    # exp(-sf)
    scale = jnp.tanh(scale_raw * inv_s) * s_fac

    u = masked_x + one_minus_mask * (x * jnp.exp(scale) + shift)
    # single lane-packed output: [u | scale]; split in the wrapper
    out_ref[...] = jnp.concatenate([u, scale], axis=-1)


# ------------------------------ wrapper ------------------------------------ #
PARAM_ORDER = ("cw0", "cb0", "cw1", "cb1", "cw2", "cb2",
               "nw0_x", "w_fused", "b_fused",
               "nw1", "nb1", "nw2", "nb2",
               "nw_head", "nb_head")


def coupling_layer_nvp(x, y_task, scaling_factor, prepared, *,
                       block_b=256, act_dtype=None):
    B, x_dim = x.shape
    yc_dim = y_task.shape[-1]
    assert B % block_b == 0, "batch must be a multiple of block_b"
    grid = (B // block_b,)
    if act_dtype is None:
        act_dtype = pick_act_dtype()

    def batch_spec(d):
        return pl.BlockSpec((block_b, d), lambda i: (i, 0))

    def resident_spec(a):
        # same block every grid step -> stays VMEM-resident, no re-DMA
        return pl.BlockSpec(a.shape, lambda i: (0,) * a.ndim)

    # precompute exp(sf), exp(-sf) once (cheap XLA op, not per grid step)
    sf_pair = jnp.concatenate([jnp.exp(scaling_factor[:1]),
                               jnp.exp(-scaling_factor[:1])])

    weights = [prepared[k] for k in PARAM_ORDER]
    in_specs = (
        [batch_spec(x_dim), batch_spec(yc_dim),
         resident_spec(prepared["mask"]),
         pl.BlockSpec((2,), lambda i: (0,),
                      memory_space=pltpu.MemorySpace.SMEM)]
        + [resident_spec(w) for w in weights])

    out = pl.pallas_call(
        functools.partial(coupling_kernel, act_dtype=act_dtype),
        out_shape=jax.ShapeDtypeStruct((B, 2 * x_dim), jnp.float32),
        grid=grid,
        in_specs=in_specs,
        out_specs=batch_spec(2 * x_dim),
        compiler_params=pltpu.CompilerParams(
            dimension_semantics=("parallel",)),   # v7x: batch blocks over 2 TCs
    )(x, y_task, prepared["mask"], sf_pair, *weights)

    u, ldj = out[:, :x_dim], out[:, x_dim:]
    return u, ldj


# -------------------- one-time parameter preparation ------------------------ #
def prepare_params(mask, cond_params, net_params, x_dim):
    """Hoisted out of the hot path:
       - biases / mask to (1, D) rows
       - split nw0 -> (nw0_x, nw0_c); keep nw3 packed as one (H, 2*x_dim) head
       - fold cond_net's last Linear into net layer 0
       - cast weight matrices to bf16 (biases stay f32)."""
    (cw0, cb0), (cw1, cb1), (cw2, cb2), (cw3, cb3) = cond_params
    (nw0, nb0), (nw1, nb1), (nw2, nb2), (nw3, nb3) = net_params

    nw0_x, nw0_c = nw0[:x_dim], nw0[x_dim:]
    w_fused = cw3 @ nw0_c                               # (H, H)
    b_fused = (cb3 @ nw0_c + nb0).reshape(1, -1)        # (1, H) f32

    wd = WEIGHT_DTYPE
    return dict(
        mask=mask.reshape(1, -1).astype(jnp.float32),
        cw0=cw0.astype(wd), cb0=cb0.reshape(1, -1),
        cw1=cw1.astype(wd), cb1=cb1.reshape(1, -1),
        cw2=cw2.astype(wd), cb2=cb2.reshape(1, -1),
        nw0_x=nw0_x.astype(wd), w_fused=w_fused.astype(wd), b_fused=b_fused,
        nw1=nw1.astype(wd), nb1=nb1.reshape(1, -1),
        nw2=nw2.astype(wd), nb2=nb2.reshape(1, -1),
        nw_head=nw3.astype(wd), nb_head=nb3.reshape(1, -1),   # packed shift|scale
    )


# ------------------------- deterministic init ------------------------------ #
def init_linear(key, d_in, d_out):
    kw, kb = jax.random.split(key)
    bound = 1.0 / np.sqrt(d_in)
    w = jax.random.uniform(kw, (d_in, d_out), jnp.float32, -bound, bound)
    b = jax.random.uniform(kb, (d_out,), jnp.float32, -bound, bound)
    return w, b


def init_mlp(key, d_in, d_out, n_hidden, layer=3, wn=False):
    """MyDense: Linear(d_in,H), [tanh, Linear(H,H)]*(layer-1), tanh, Linear(H,d_out)."""
    dims = [d_in] + [n_hidden] * layer + [d_out]
    keys = jax.random.split(key, len(dims) - 1)
    params = []
    for k, di, do in zip(keys, dims[:-1], dims[1:]):
        w, b = init_linear(k, di, do)
        if wn:
            # weight_norm reparametrization: w_eff = g * v / ||v|| (norm over fan-in)
            kg = jax.random.fold_in(k, 7)
            g = jax.random.uniform(kg, (do,), jnp.float32, 0.5, 1.5)
            v_norm = jnp.sqrt(jnp.sum(w * w, axis=0, keepdims=True))  # (1, do)
            w = w * (g[None, :] / v_norm)
        params.append((w, b))
    return params


# ----------------------------- pure-JAX refs -------------------------------- #
def reference_forward_f32(x, y_task, mask, scaling_factor, cond_params, net_params):
    """Original (unfused, full-f32) module math — mirrors the torch forward."""
    def mlp(h, params):
        for i, (w, b) in enumerate(params):
            h = h @ w + b
            if i < len(params) - 1:
                h = jnp.tanh(h)
        return h

    x_dim = x.shape[-1]
    cond = mlp(y_task, cond_params)
    masked_x = x * mask
    aug_x = jnp.concatenate([masked_x, cond], axis=-1)
    ans = mlp(aug_x, net_params)
    shift = ans[:, :x_dim] * (1.0 - mask)
    scale = ans[:, x_dim:] * (1.0 - mask)
    s_fac = jnp.exp(scaling_factor[0])
    scale = jnp.tanh(scale / s_fac) * s_fac
    u = masked_x + (1.0 - mask) * (x * jnp.exp(scale) + shift)
    return u, scale


def reference_forward_prepared(x, y_task, scaling_factor, p, act_dtype):
    """Same math as the kernel (fused, bf16 weights, act_dtype acts), plain JAX."""
    def dense(h, w, b=None):
        out = jnp.dot(h.astype(WEIGHT_DTYPE), w,
                      preferred_element_type=jnp.float32)
        return out if b is None else out + b

    def act(pre):
        return jnp.tanh(pre.astype(act_dtype))

    mask = p["mask"]
    x_dim = x.shape[-1]
    h = act(dense(y_task, p["cw0"], p["cb0"]))
    h = act(dense(h, p["cw1"], p["cb1"]))
    hc = act(dense(h, p["cw2"], p["cb2"]))
    masked_x = x * mask
    h = act(dense(masked_x, p["nw0_x"]) + dense(hc, p["w_fused"]) + p["b_fused"])
    h = act(dense(h, p["nw1"], p["nb1"]))
    h = act(dense(h, p["nw2"], p["nb2"]))
    omm = 1.0 - mask
    head = dense(h, p["nw_head"], p["nb_head"])
    shift = head[:, :x_dim] * omm
    s_fac = jnp.exp(scaling_factor[0])
    inv_s = jnp.exp(-scaling_factor[0])
    scale = jnp.tanh(head[:, x_dim:] * omm * inv_s) * s_fac
    u = masked_x + omm * (x * jnp.exp(scale) + shift)
    return u, scale


# --------------------------------- main ------------------------------------- #
if __name__ == "__main__":
    # module config (consistent with CouplingLayerNVP / MyDense defaults)
    B = 512               # 2 grid blocks of 256 rows (amortizes fixed cost;
    block_b = 256         # grid=(2,) keeps both v7x TensorCores busy)
    x_dim = 16
    y_dim = 8
    task_dim = 4
    cond_dim = x_dim      # default: cond_dim = x_dim
    n_hidden = 128

    key = jax.random.PRNGKey(0)
    kx, ky, kt, kc, kn = jax.random.split(key, 5)

    x = jax.random.normal(kx, (B, x_dim), jnp.float32)
    y = jax.random.normal(ky, (B, y_dim), jnp.float32)
    task = jax.random.normal(kt, (B, task_dim), jnp.float32)
    y_task = jnp.concatenate([y, task], axis=-1)       # torch.hstack((y, task))

    # alternating binary mask (registered buffer in the torch module)
    mask = jnp.array([float(i % 2) for i in range(x_dim)], jnp.float32)
    # scaling_factor = nn.Parameter(torch.zeros(1))
    scaling_factor = jnp.zeros((1,), jnp.float32)

    # cond_net: MyDense(y_dim+task_dim -> cond_dim), weight-normalized
    cond_params = init_mlp(kc, y_dim + task_dim, cond_dim, n_hidden, layer=3, wn=True)
    # net: MyDense(x_dim+cond_dim -> 2*x_dim), plain Linear
    net_params = init_mlp(kn, x_dim + cond_dim, 2 * x_dim, n_hidden, layer=3, wn=False)

    prepared = prepare_params(mask, cond_params, net_params, x_dim)
    act_dtype = pick_act_dtype()

    u, ldj = coupling_layer_nvp(x, y_task, scaling_factor, prepared,
                                block_b=block_b, act_dtype=act_dtype)
    jax.block_until_ready((u, ldj))

    # Tight check: kernel vs precision-consistent fused reference (validates
    # the kernel's own math; looser when activations are bf16 on v6e/v7x).
    if act_dtype == jnp.bfloat16:
        tight = dict(rtol=3e-2, atol=3e-2)
    else:
        tight = dict(rtol=2e-3, atol=2e-3)
    u_s, ldj_s = reference_forward_prepared(x, y_task, scaling_factor, prepared,
                                            act_dtype)
    np.testing.assert_allclose(np.asarray(u), np.asarray(u_s), **tight)
    np.testing.assert_allclose(np.asarray(ldj), np.asarray(ldj_s), **tight)

    # Loose sanity: kernel vs original full-f32 module math (bound on bf16
    # weight/activation rounding + reassociation from the cw3->nw0 fusion).
    u_f, ldj_f = reference_forward_f32(x, y_task, mask, scaling_factor,
                                       cond_params, net_params)
    np.testing.assert_allclose(np.asarray(u), np.asarray(u_f), rtol=2e-1, atol=3e-1)
    np.testing.assert_allclose(np.asarray(ldj), np.asarray(ldj_f), rtol=2e-1, atol=2e-1)

    print("KERNEL_OK")
</pallas_src>

<mosaic_0001>
module attributes {stable_mosaic.version = 11 : i64} {
  func.func @coupling_kernel(%arg0: i32, %arg1: memref<256x16xf32, #tpu.memory_space<vmem>>, %arg2: memref<256x12xf32, #tpu.memory_space<vmem>>, %arg3: memref<1x16xf32, #tpu.memory_space<vmem>>, %arg4: memref<2xf32, #tpu.memory_space<smem>>, %arg5: memref<12x128xbf16, #tpu.memory_space<vmem>>, %arg6: memref<1x128xf32, #tpu.memory_space<vmem>>, %arg7: memref<128x128xbf16, #tpu.memory_space<vmem>>, %arg8: memref<1x128xf32, #tpu.memory_space<vmem>>, %arg9: memref<128x128xbf16, #tpu.memory_space<vmem>>, %arg10: memref<1x128xf32, #tpu.memory_space<vmem>>, %arg11: memref<16x128xbf16, #tpu.memory_space<vmem>>, %arg12: memref<128x128xbf16, #tpu.memory_space<vmem>>, %arg13: memref<1x128xf32, #tpu.memory_space<vmem>>, %arg14: memref<128x128xbf16, #tpu.memory_space<vmem>>, %arg15: memref<1x128xf32, #tpu.memory_space<vmem>>, %arg16: memref<128x128xbf16, #tpu.memory_space<vmem>>, %arg17: memref<1x128xf32, #tpu.memory_space<vmem>>, %arg18: memref<128x32xbf16, #tpu.memory_space<vmem>>, %arg19: memref<1x32xf32, #tpu.memory_space<vmem>>, %arg20: memref<256x32xf32, #tpu.memory_space<vmem>>) attributes {dimension_semantics = [#tpu.dimension_semantics<parallel>], iteration_bounds = array<i64: 2>, scalar_prefetch = 0 : i64, scratch_operands = 0 : i64, tpu.core_type = #tpu.core_type<tc>, window_params = [{transform_indices = @transform_0, window_bounds = array<i64: 256, 16>}, {transform_indices = @transform_1, window_bounds = array<i64: 256, 12>}, {pipeline_mode = #tpu.pipeline_mode<synchronous>, transform_indices = @transform_2, window_bounds = array<i64: 1, 16>}, {transform_indices = @transform_3, window_bounds = array<i64: 2>}, {pipeline_mode = #tpu.pipeline_mode<synchronous>, transform_indices = @transform_4, window_bounds = array<i64: 12, 128>}, {pipeline_mode = #tpu.pipeline_mode<synchronous>, transform_indices = @transform_5, window_bounds = array<i64: 1, 128>}, {pipeline_mode = #tpu.pipeline_mode<synchronous>, transform_indices = @transform_6, window_bounds = array<i64: 128, 128>}, {pipeline_mode = #tpu.pipeline_mode<synchronous>, transform_indices = @transform_7, window_bounds = array<i64: 1, 128>}, {pipeline_mode = #tpu.pipeline_mode<synchronous>, transform_indices = @transform_8, window_bounds = array<i64: 128, 128>}, {pipeline_mode = #tpu.pipeline_mode<synchronous>, transform_indices = @transform_9, window_bounds = array<i64: 1, 128>}, {pipeline_mode = #tpu.pipeline_mode<synchronous>, transform_indices = @transform_10, window_bounds = array<i64: 16, 128>}, {pipeline_mode = #tpu.pipeline_mode<synchronous>, transform_indices = @transform_11, window_bounds = array<i64: 128, 128>}, {pipeline_mode = #tpu.pipeline_mode<synchronous>, transform_indices = @transform_12, window_bounds = array<i64: 1, 128>}, {pipeline_mode = #tpu.pipeline_mode<synchronous>, transform_indices = @transform_13, window_bounds = array<i64: 128, 128>}, {pipeline_mode = #tpu.pipeline_mode<synchronous>, transform_indices = @transform_14, window_bounds = array<i64: 1, 128>}, {pipeline_mode = #tpu.pipeline_mode<synchronous>, transform_indices = @transform_15, window_bounds = array<i64: 128, 128>}, {pipeline_mode = #tpu.pipeline_mode<synchronous>, transform_indices = @transform_16, window_bounds = array<i64: 1, 128>}, {pipeline_mode = #tpu.pipeline_mode<synchronous>, transform_indices = @transform_17, window_bounds = array<i64: 128, 32>}, {pipeline_mode = #tpu.pipeline_mode<synchronous>, transform_indices = @transform_18, window_bounds = array<i64: 1, 32>}, {transform_indices = @transform_19, window_bounds = array<i64: 256, 32>}]} {
    %c0 = arith.constant 0 : index
    %c0_0 = arith.constant 0 : index
    %0 = vector.load %arg1[%c0, %c0_0] : memref<256x16xf32, #tpu.memory_space<vmem>>, vector<256x16xf32>
    %c0_1 = arith.constant 0 : index
    %c0_2 = arith.constant 0 : index
    %1 = vector.load %arg2[%c0_1, %c0_2] : memref<256x12xf32, #tpu.memory_space<vmem>>, vector<256x12xf32>
    %c0_3 = arith.constant 0 : index
    %c0_4 = arith.constant 0 : index
    %2 = vector.load %arg3[%c0_3, %c0_4] : memref<1x16xf32, #tpu.memory_space<vmem>>, vector<1x16xf32>
    %3 = arith.truncf %1 : vector<256x12xf32> to vector<256x12xbf16>
    %c0_5 = arith.constant 0 : index
    %c0_6 = arith.constant 0 : index
    %4 = vector.load %arg5[%c0_5, %c0_6] : memref<12x128xbf16, #tpu.memory_space<vmem>>, vector<12x128xbf16>
    %cst = arith.constant dense<0.000000e+00> : vector<256x128xf32>
    %5 = tpu.matmul %3, %4, %cst {dimension_numbers = #tpu.dot_dimension_numbers<[1], [0], [0], [1], [0, 0, 1, 1], [], []>} : vector<256x12xbf16>, vector<12x128xbf16>, vector<256x128xf32> -> vector<256x128xf32>
    %c0_7 = arith.constant 0 : index
    %c0_8 = arith.constant 0 : index
    %6 = vector.load %arg6[%c0_7, %c0_8] : memref<1x128xf32, #tpu.memory_space<vmem>>, vector<1x128xf32>
    %7 = vector.broadcast %6 : vector<1x128xf32> to vector<256x128xf32>
    %8 = arith.addf %5, %7 : vector<256x128xf32>
    %9 = math.tanh %8 : vector<256x128xf32>
    %10 = arith.truncf %9 : vector<256x128xf32> to vector<256x128xbf16>
    %c0_9 = arith.constant 0 : index
    %c0_10 = arith.constant 0 : index
    %11 = vector.load %arg7[%c0_9, %c0_10] : memref<128x128xbf16, #tpu.memory_space<vmem>>, vector<128x128xbf16>
    %cst_11 = arith.constant dense<0.000000e+00> : vector<256x128xf32>
    %12 = tpu.matmul %10, %11, %cst_11 {dimension_numbers = #tpu.dot_dimension_numbers<[1], [0], [0], [1], [0, 0, 1, 1], [], []>} : vector<256x128xbf16>, vector<128x128xbf16>, vector<256x128xf32> -> vector<256x128xf32>
    %c0_12 = arith.constant 0 : index
    %c0_13 = arith.constant 0 : index
    %13 = vector.load %arg8[%c0_12, %c0_13] : memref<1x128xf32, #tpu.memory_space<vmem>>, vector<1x128xf32>
    %14 = vector.broadcast %13 : vector<1x128xf32> to vector<256x128xf32>
    %15 = arith.addf %12, %14 : vector<256x128xf32>
    %16 = math.tanh %15 : vector<256x128xf32>
    %17 = arith.truncf %16 : vector<256x128xf32> to vector<256x128xbf16>
    %c0_14 = arith.constant 0 : index
    %c0_15 = arith.constant 0 : index
    %18 = vector.load %arg9[%c0_14, %c0_15] : memref<128x128xbf16, #tpu.memory_space<vmem>>, vector<128x128xbf16>
    %cst_16 = arith.constant dense<0.000000e+00> : vector<256x128xf32>
    %19 = tpu.matmul %17, %18, %cst_16 {dimension_numbers = #tpu.dot_dimension_numbers<[1], [0], [0], [1], [0, 0, 1, 1], [], []>} : vector<256x128xbf16>, vector<128x128xbf16>, vector<256x128xf32> -> vector<256x128xf32>
    %c0_17 = arith.constant 0 : index
    %c0_18 = arith.constant 0 : index
    %20 = vector.load %arg10[%c0_17, %c0_18] : memref<1x128xf32, #tpu.memory_space<vmem>>, vector<1x128xf32>
    %21 = vector.broadcast %20 : vector<1x128xf32> to vector<256x128xf32>
    %22 = arith.addf %19, %21 : vector<256x128xf32>
    %23 = math.tanh %22 : vector<256x128xf32>
    %24 = vector.broadcast %2 : vector<1x16xf32> to vector<256x16xf32>
    %25 = arith.mulf %0, %24 : vector<256x16xf32>
    %26 = arith.truncf %25 : vector<256x16xf32> to vector<256x16xbf16>
    %c0_19 = arith.constant 0 : index
    %c0_20 = arith.constant 0 : index
    %27 = vector.load %arg11[%c0_19, %c0_20] : memref<16x128xbf16, #tpu.memory_space<vmem>>, vector<16x128xbf16>
    %cst_21 = arith.constant dense<0.000000e+00> : vector<256x128xf32>
    %28 = tpu.matmul %26, %27, %cst_21 {dimension_numbers = #tpu.dot_dimension_numbers<[1], [0], [0], [1], [0, 0, 1, 1], [], []>} : vector<256x16xbf16>, vector<16x128xbf16>, vector<256x128xf32> -> vector<256x128xf32>
    %29 = arith.truncf %23 : vector<256x128xf32> to vector<256x128xbf16>
    %c0_22 = arith.constant 0 : index
    %c0_23 = arith.constant 0 : index
    %30 = vector.load %arg12[%c0_22, %c0_23] : memref<128x128xbf16, #tpu.memory_space<vmem>>, vector<128x128xbf16>
    %cst_24 = arith.constant dense<0.000000e+00> : vector<256x128xf32>
    %31 = tpu.matmul %29, %30, %cst_24 {dimension_numbers = #tpu.dot_dimension_numbers<[1], [0], [0], [1], [0, 0, 1, 1], [], []>} : vector<256x128xbf16>, vector<128x128xbf16>, vector<256x128xf32> -> vector<256x128xf32>
    %32 = arith.addf %28, %31 : vector<256x128xf32>
    %c0_25 = arith.constant 0 : index
    %c0_26 = arith.constant 0 : index
    %33 = vector.load %arg13[%c0_25, %c0_26] : memref<1x128xf32, #tpu.memory_space<vmem>>, vector<1x128xf32>
    %34 = vector.broadcast %33 : vector<1x128xf32> to vector<256x128xf32>
    %35 = arith.addf %32, %34 : vector<256x128xf32>
    %36 = math.tanh %35 : vector<256x128xf32>
    %37 = arith.truncf %36 : vector<256x128xf32> to vector<256x128xbf16>
    %c0_27 = arith.constant 0 : index
    %c0_28 = arith.constant 0 : index
    %38 = vector.load %arg14[%c0_27, %c0_28] : memref<128x128xbf16, #tpu.memory_space<vmem>>, vector<128x128xbf16>
    %cst_29 = arith.constant dense<0.000000e+00> : vector<256x128xf32>
    %39 = tpu.matmul %37, %38, %cst_29 {dimension_numbers = #tpu.dot_dimension_numbers<[1], [0], [0], [1], [0, 0, 1, 1], [], []>} : vector<256x128xbf16>, vector<128x128xbf16>, vector<256x128xf32> -> vector<256x128xf32>
    %c0_30 = arith.constant 0 : index
    %c0_31 = arith.constant 0 : index
    %40 = vector.load %arg15[%c0_30, %c0_31] : memref<1x128xf32, #tpu.memory_space<vmem>>, vector<1x128xf32>
    %41 = vector.broadcast %40 : vector<1x128xf32> to vector<256x128xf32>
    %42 = arith.addf %39, %41 : vector<256x128xf32>
    %43 = math.tanh %42 : vector<256x128xf32>
    %44 = arith.truncf %43 : vector<256x128xf32> to vector<256x128xbf16>
    %c0_32 = arith.constant 0 : index
    %c0_33 = arith.constant 0 : index
    %45 = vector.load %arg16[%c0_32, %c0_33] : memref<128x128xbf16, #tpu.memory_space<vmem>>, vector<128x128xbf16>
    %cst_34 = arith.constant dense<0.000000e+00> : vector<256x128xf32>
    %46 = tpu.matmul %44, %45, %cst_34 {dimension_numbers = #tpu.dot_dimension_numbers<[1], [0], [0], [1], [0, 0, 1, 1], [], []>} : vector<256x128xbf16>, vector<128x128xbf16>, vector<256x128xf32> -> vector<256x128xf32>
    %c0_35 = arith.constant 0 : index
    %c0_36 = arith.constant 0 : index
    %47 = vector.load %arg17[%c0_35, %c0_36] : memref<1x128xf32, #tpu.memory_space<vmem>>, vector<1x128xf32>
    %48 = vector.broadcast %47 : vector<1x128xf32> to vector<256x128xf32>
    %49 = arith.addf %46, %48 : vector<256x128xf32>
    %50 = math.tanh %49 : vector<256x128xf32>
    %cst_37 = arith.constant 1.000000e+00 : f32
    %51 = vector.broadcast %cst_37 : f32 to vector<1x16xf32>
    %52 = arith.subf %51, %2 : vector<1x16xf32>
    %53 = arith.truncf %50 : vector<256x128xf32> to vector<256x128xbf16>
    %c0_38 = arith.constant 0 : index
    %c0_39 = arith.constant 0 : index
    %54 = vector.load %arg18[%c0_38, %c0_39] : memref<128x32xbf16, #tpu.memory_space<vmem>>, vector<128x32xbf16>
    %cst_40 = arith.constant dense<0.000000e+00> : vector<256x32xf32>
    %55 = tpu.matmul %53, %54, %cst_40 {dimension_numbers = #tpu.dot_dimension_numbers<[1], [0], [0], [1], [0, 0, 1, 1], [], []>} : vector<256x128xbf16>, vector<128x32xbf16>, vector<256x32xf32> -> vector<256x32xf32>
    %c0_41 = arith.constant 0 : index
    %c0_42 = arith.constant 0 : index
    %56 = vector.load %arg19[%c0_41, %c0_42] : memref<1x32xf32, #tpu.memory_space<vmem>>, vector<1x32xf32>
    %57 = vector.broadcast %56 : vector<1x32xf32> to vector<256x32xf32>
    %58 = arith.addf %55, %57 : vector<256x32xf32>
    %59 = vector.extract_strided_slice %58 {offsets = [0, 0], sizes = [256, 16], strides = [1, 1]} : vector<256x32xf32> to vector<256x16xf32>
    %60 = vector.broadcast %52 : vector<1x16xf32> to vector<256x16xf32>
    %61 = arith.mulf %59, %60 : vector<256x16xf32>
    %62 = vector.extract_strided_slice %58 {offsets = [0, 16], sizes = [256, 16], strides = [1, 1]} : vector<256x32xf32> to vector<256x16xf32>
    %63 = vector.broadcast %52 : vector<1x16xf32> to vector<256x16xf32>
    %64 = arith.mulf %62, %63 : vector<256x16xf32>
    %c0_43 = arith.constant 0 : index
    %65 = memref.load %arg4[%c0_43] : memref<2xf32, #tpu.memory_space<smem>>
    %c1 = arith.constant 1 : index
    %66 = memref.load %arg4[%c1] : memref<2xf32, #tpu.memory_space<smem>>
    %67 = vector.broadcast %66 : f32 to vector<256x16xf32>
    %68 = arith.mulf %64, %67 : vector<256x16xf32>
    %69 = math.tanh %68 : vector<256x16xf32>
    %70 = vector.broadcast %65 : f32 to vector<256x16xf32>
    %71 = arith.mulf %69, %70 : vector<256x16xf32>
    %72 = math.exp %71 : vector<256x16xf32>
    %73 = arith.mulf %0, %72 : vector<256x16xf32>
    %74 = arith.addf %73, %61 : vector<256x16xf32>
    %75 = vector.broadcast %52 : vector<1x16xf32> to vector<256x16xf32>
    %76 = arith.mulf %75, %74 : vector<256x16xf32>
    %77 = arith.addf %25, %76 : vector<256x16xf32>
    %78 = tpu.concatenate %77, %71 in 1 : vector<256x16xf32>, vector<256x16xf32> -> vector<256x32xf32>
    %c0_44 = arith.constant 0 : index
    %c0_45 = arith.constant 0 : index
    %79 = vector.load %arg20[%c0_44, %c0_45] : memref<256x32xf32, #tpu.memory_space<vmem>>, vector<256x32xf32>
    tpu.vector_store %arg20[%c0_44, %c0_45], %78 {strides = array<i32>} : memref<256x32xf32, #tpu.memory_space<vmem>>, vector<256x32xf32>,
    return
  }
  func.func @transform_0(%arg0: i32) -> (i32, i32) {
    %c0_i32 = arith.constant 0 : i32
    %c0_i32_0 = arith.constant 0 : i32
    return %arg0, %c0_i32 : i32, i32
  }
  func.func @transform_1(%arg0: i32) -> (i32, i32) {
    %c0_i32 = arith.constant 0 : i32
    %c0_i32_0 = arith.constant 0 : i32
    return %arg0, %c0_i32 : i32, i32
  }
  func.func @transform_2(%arg0: i32) -> (i32, i32) {
    %c0_i32 = arith.constant 0 : i32
    %c0_i32_0 = arith.constant 0 : i32
    %c0_i32_1 = arith.constant 0 : i32
    return %c0_i32, %c0_i32_0 : i32, i32
  }
  func.func @transform_3(%arg0: i32) -> i32 {
    %c0_i32 = arith.constant 0 : i32
    %c0_i32_0 = arith.constant 0 : i32
    return %c0_i32 : i32
  }
  func.func @transform_4(%arg0: i32) -> (i32, i32) {
    %c0_i32 = arith.constant 0 : i32
    %c0_i32_0 = arith.constant 0 : i32
    %c0_i32_1 = arith.constant 0 : i32
    return %c0_i32, %c0_i32_0 : i32, i32
  }
  func.func @transform_5(%arg0: i32) -> (i32, i32) {
    %c0_i32 = arith.constant 0 : i32
    %c0_i32_0 = arith.constant 0 : i32
    %c0_i32_1 = arith.constant 0 : i32
    return %c0_i32, %c0_i32_0 : i32, i32
  }
  func.func @transform_6(%arg0: i32) -> (i32, i32) {
    %c0_i32 = arith.constant 0 : i32
    %c0_i32_0 = arith.constant 0 : i32
    %c0_i32_1 = arith.constant 0 : i32
    return %c0_i32, %c0_i32_0 : i32, i32
  }
  func.func @transform_7(%arg0: i32) -> (i32, i32) {
    %c0_i32 = arith.constant 0 : i32
    %c0_i32_0 = arith.constant 0 : i32
    %c0_i32_1 = arith.constant 0 : i32
    return %c0_i32, %c0_i32_0 : i32, i32
  }
  func.func @transform_8(%arg0: i32) -> (i32, i32) {
    %c0_i32 = arith.constant 0 : i32
    %c0_i32_0 = arith.constant 0 : i32
    %c0_i32_1 = arith.constant 0 : i32
    return %c0_i32, %c0_i32_0 : i32, i32
  }
  func.func @transform_9(%arg0: i32) -> (i32, i32) {
    %c0_i32 = arith.constant 0 : i32
    %c0_i32_0 = arith.constant 0 : i32
    %c0_i32_1 = arith.constant 0 : i32
    return %c0_i32, %c0_i32_0 : i32, i32
  }
  func.func @transform_10(%arg0: i32) -> (i32, i32) {
    %c0_i32 = arith.constant 0 : i32
    %c0_i32_0 = arith.constant 0 : i32
    %c0_i32_1 = arith.constant 0 : i32
    return %c0_i32, %c0_i32_0 : i32, i32
  }
  func.func @transform_11(%arg0: i32) -> (i32, i32) {
    %c0_i32 = arith.constant 0 : i32
    %c0_i32_0 = arith.constant 0 : i32
    %c0_i32_1 = arith.constant 0 : i32
    return %c0_i32, %c0_i32_0 : i32, i32
  }
  func.func @transform_12(%arg0: i32) -> (i32, i32) {
    %c0_i32 = arith.constant 0 : i32
    %c0_i32_0 = arith.constant 0 : i32
    %c0_i32_1 = arith.constant 0 : i32
    return %c0_i32, %c0_i32_0 : i32, i32
  }
  func.func @transform_13(%arg0: i32) -> (i32, i32) {
    %c0_i32 = arith.constant 0 : i32
    %c0_i32_0 = arith.constant 0 : i32
    %c0_i32_1 = arith.constant 0 : i32
    return %c0_i32, %c0_i32_0 : i32, i32
  }
  func.func @transform_14(%arg0: i32) -> (i32, i32) {
    %c0_i32 = arith.constant 0 : i32
    %c0_i32_0 = arith.constant 0 : i32
    %c0_i32_1 = arith.constant 0 : i32
    return %c0_i32, %c0_i32_0 : i32, i32
  }
  func.func @transform_15(%arg0: i32) -> (i32, i32) {
    %c0_i32 = arith.constant 0 : i32
    %c0_i32_0 = arith.constant 0 : i32
    %c0_i32_1 = arith.constant 0 : i32
    return %c0_i32, %c0_i32_0 : i32, i32
  }
  func.func @transform_16(%arg0: i32) -> (i32, i32) {
    %c0_i32 = arith.constant 0 : i32
    %c0_i32_0 = arith.constant 0 : i32
    %c0_i32_1 = arith.constant 0 : i32
    return %c0_i32, %c0_i32_0 : i32, i32
  }
  func.func @transform_17(%arg0: i32) -> (i32, i32) {
    %c0_i32 = arith.constant 0 : i32
    %c0_i32_0 = arith.constant 0 : i32
    %c0_i32_1 = arith.constant 0 : i32
    return %c0_i32, %c0_i32_0 : i32, i32
  }
  func.func @transform_18(%arg0: i32) -> (i32, i32) {
    %c0_i32 = arith.constant 0 : i32
    %c0_i32_0 = arith.constant 0 : i32
    %c0_i32_1 = arith.constant 0 : i32
    return %c0_i32, %c0_i32_0 : i32, i32
  }
  func.func @transform_19(%arg0: i32) -> (i32, i32) {
    %c0_i32 = arith.constant 0 : i32
    %c0_i32_0 = arith.constant 0 : i32
    return %arg0, %c0_i32 : i32, i32
  }
}

</mosaic_0001>

<bundles_post_ra>
// kernel: tpu_custom_call.1
= control target key start
LH: loop header
LB: loop body
LE: loop exit
PB: predicated region body
PF: predicated region fallthrough
CT: control target
= control target key end

     0   :  { %s6321_s0 = inlined_call_operand.vmem [shape: f32[512,16], index: 0, kind: input, shape index: {}]   ;;  %s6322_s1 = inlined_call_operand.vmem [shape: f32[512,12], index: 1, kind: input, shape index: {}]   ;;  %s6323_s2 = inlined_call_operand.vmem [shape: f32[1,16], index: 2, kind: input, shape index: {}]   ;;  %s6324_s3 = inlined_call_operand.vmem [shape: f32[2], index: 3, kind: input, shape index: {}]   ;;  %s6325_s4 = inlined_call_operand.vmem [shape: bf16[12,128], index: 4, kind: input, shape index: {}]   ;;  %s6326_s5 = inlined_call_operand.vmem [shape: f32[1,128], index: 5, kind: input, shape index: {}]   ;;  %s6327_s6 = inlined_call_operand.vmem [shape: bf16[128,128], index: 6, kind: input, shape index: {}]   ;;  %s6328_s7 = inlined_call_operand.vmem [shape: f32[1,128], index: 7, kind: input, shape index: {}]   ;;  %s6329_s8 = inlined_call_operand.vmem [shape: bf16[128,128], index: 8, kind: input, shape index: {}]   ;;  %s6330_s9 = inlined_call_operand.vmem [shape: f32[1,128], index: 9, kind: input, shape index: {}]   ;;  %s6331_s10 = inlined_call_operand.vmem [shape: bf16[16,128], index: 10, kind: input, shape index: {}]   ;;  %s6332_s11 = inlined_call_operand.vmem [shape: bf16[128,128], index: 11, kind: input, shape index: {}]   ;;  %s6333_s12 = inlined_call_operand.vmem [shape: f32[1,128], index: 12, kind: input, shape index: {}]   ;;  %s6334_s13 = inlined_call_operand.vmem [shape: bf16[128,128], index: 13, kind: input, shape index: {}]   ;;  %s6335_s14 = inlined_call_operand.vmem [shape: f32[1,128], index: 14, kind: input, shape index: {}]   ;;  %s6336_s15 = inlined_call_operand.vmem [shape: bf16[128,128], index: 15, kind: input, shape index: {}]   ;;  %s6337_s16 = inlined_call_operand.vmem [shape: f32[1,128], index: 16, kind: input, shape index: {}]   ;;  %s6338_s17 = inlined_call_operand.vmem [shape: bf16[128,32], index: 17, kind: input, shape index: {}]   ;;  %s6339_s18 = inlined_call_operand.vmem [shape: f32[1,32], index: 18, kind: input, shape index: {}]   ;;  %s6340_s19 = inlined_call_operand.vmem [shape: f32[512,32], index: 19, kind: output, shape index: {}]  }
   0x1   :  { %6390 = sst [smem:[#allocation54_spill]] %s6321_s0 }
   0x2   :  { %6391 = sst [smem:[#allocation55_spill]] %s6322_s1 }
   0x3   :  { %6392 = sst [smem:[#allocation56_spill]] %s6323_s2 }
   0x4   :  { %6393 = sst [smem:[#allocation57_spill]] %s6324_s3 }
   0x5   :  { %24 = vsyncpa [#allocation3], 0  ;;  %s4976_s0 = smov 0  }
   0x6 LB: > { %s3575_s30 = sadd.s32 4294967295, %s4871_s0   ;;  %p3577_p0 = scmp.ge.s32.totalorder %s4871_s0, 1  ;;  %s4871_s0 = sphi %s4976_s0, %s30_s0  }
   0x7   : > { %p470_p1 = scmp.lt.s32.totalorder %s4871_s0, 3  ;;  %s6394_s1 = sld [smem:[#allocation57_spill]] }
   0x8   : > { %p4991_p3 = scmp.eq.s32.totalorder %s3575_s30, 0 }
   0x9   : > { %p4987_p2 = pnand %p3577_p0, %p470_p1 }
   0xb   : > { %p4235_p4 = pneg %p4987_p2 }
   0xd   : > { %s486_s22 = sshll.u32 %s6394_s1, 4  ;;  %p4236_p5 = pnand %p4991_p3, %p4235_p4  ;;  %s487_s22 = int_to_ptr.vmem [resolvable:$true] %s486_s22 }
   0xe   : > { %s4846_s24 = scalar_lea.vmem %s487_s22, 16  ;;  %p4854_p10 = scmp.lt.s32.totalorder %s487_s22, %s487_s22 }
   0xf   : > { %p4847_p6 = scmp.ne.s32.totalorder %s487_s22, %s4846_s24  ;;  %p4848_p7 = pneg %p4236_p5 }
  0x10   : > { %p4855_p11 = scmp.lt.s32.totalorder %s4846_s24, %s4846_s24 }
  0x11   : > { %p4849_p8 = pnand %p4848_p7, %p4847_p6 }
  0x12   : > { %p4856_p12 = por %p4855_p11, %p4854_p10 }
  0x13   : > { %p4850_p9 = pneg %p4849_p8 }
  0x15   : > { %p4857_p13 = pnand %p4856_p12, %p4850_p9 }
  0x17   : > { %4860 = shalt.err (!%p4857_p13)
}
  0x18   : > { %s4873_s25 = smov [#allocation2]   ;;  %562 = sbr.rel (%p4987_p2) target bundleno = 1788 (0x6fc), region = 96 }
  0x19   : > { %4238 = dma.vmem_to_smem (!%p4236_p5), %s487_s22, 16, %s4873_s25, [#allocation3]  }
  0x1d   : > { %4866 = dma.done.wait (%p4991_p3), [#allocation3], 16  }
  0x1e   : > { %4868 = vsyncadd (%p4991_p3), [#allocation3], 4294967280 }
  0x1f   : > { %568 = sfence }
  0x20   : > { %v4252_v0 = vld [vmem:[%s6325_s4] sm:$0x3f]   ;;  %vm787_vm0 = vcmask 1045504   ;;  %s3582_s27 = sshll.u32 %s3575_s30, 5  ;;  %v4253_v1 = vld [vmem:[%s6327_s6 + $0x38] sm:$0xff]   ;;  %v4254_v3 = vld [vmem:[%s6327_s6 + $0x30] sm:$0xff]  }
  0x21   : > { %4230 = vmatprep.subr.msk.bf16.mxu0 %vm787_vm0, %v4252_v0  ;;  %v789_v2 = vsel %vm787_vm0, %v4252_v0, 0  ;;  %p625_p0 = scmp.lt.s32.totalorder %s3582_s27, 63  ;;  %3892 = vmatprep.subr.bf16.mxu1 %v4253_v1  ;;  %s6397_s2 = sld [smem:[#allocation55_spill]]  ;;  %vm738_vm1 = vcmask 97280   ;;  %v4255_v52 = vld [vmem:[%s6327_s6 + $0x28] sm:$0xff]   ;;  %v4256_v53 = vld [vmem:[%s6327_s6 + $0x20] sm:$0xff]  }
  0x22   : > { %3859 = vmatpush3.bf16.msra.mxu0 %v789_v2  ;;  %3893 = vmatpush3.bf16.msra.mxu1 %v4253_v1  ;;  %v4257_v54 = vld [vmem:[%s6327_s6 + $0x18] sm:$0xff]   ;;  %v4258_v55 = vld [vmem:[%s6327_s6 + $0x10] sm:$0xff]   ;;  %v4259_v56 = vld [vmem:[%s6327_s6 + $0x8] sm:$0xff]   ;;  %s6398_s24 = sld [smem:[#allocation56_spill]]  ;;  %vm1847_vm2 = vcmask 130048   ;;  %s4875_s28 = smov 112  }
  0x23   : > { %s6499_s27 = smov (!%p625_p0, %s3582_s27), 63  ;;  %3894 = vmatprep.subr.bf16.mxu1 %v4254_v3  ;;  %v4260_v57 = vld [vmem:[%s6327_s6] sm:$0xff]   ;;  %v4261_v58 = vld [vmem:[%s6329_s8 + $0x38] sm:$0xff]   ;;  %v4262_v59 = vld [vmem:[%s6329_s8 + $0x30] sm:$0xff]   ;;  %s6399_s20 = sld [smem:[#allocation54_spill]]  ;;  %vm3462_vm3 = vcmask 261120  }
  0x24   : > { %s5014_s1 = sshll.u32 %s6499_s27, 3  ;;  %3940 = vmatprep.subr.bf16.mxu0 %v4261_v58  ;;  %v4263_v60 = vld [vmem:[%s6329_s8 + $0x28] sm:$0xff]   ;;  %v4264_v61 = vld [vmem:[%s6329_s8 + $0x20] sm:$0xff]   ;;  %v4265_v62 = vld [vmem:[%s6329_s8 + $0x18] sm:$0xff]   ;;  %s3677_s25 = sld [smem:[#allocation2 + $0x1]] }
  0x25   : > { %v5106_v0 = vld [vmem:[%s6326_s5] ss:$0 sm:$0xff]  ;;  %s3010_s27 = sld [smem:[#allocation2]]  ;;  %s6042_s30 = scalar_lea.vmem %s6340_s19, %s5014_s1 }
  0x26   : > { %3895 = vmatpush3.bf16.msra.mxu1 %v4254_v3 }
  0x27   : > { %s5020_s23 = scalar_lea.vmem %s6397_s2, %s5014_s1  ;;  %3896 = vmatprep.subr.bf16.mxu1 %v4255_v52  ;;  %s4874_s2 = smov 16  }
  0x28   : > { %v675_v4 = vld [vmem:[%s5020_s23] sm:$0xff]  ;;  %v676_v5 = vld [vmem:[%s5020_s23 + $0x8] sm:$0xff]  ;;  %v677_v6 = vld [vmem:[%s5020_s23 + $0x10] sm:$0xff] }
  0x29   : > { %v708_v7 = vpack.c.bf16 %v676_v5, %v675_v4  ;;  %v678_v8 = vld [vmem:[%s5020_s23 + $0x18] sm:$0xff]  ;;  %v679_v9 = vld [vmem:[%s5020_s23 + $0x20] sm:$0xff]  ;;  %v680_v10 = vld [vmem:[%s5020_s23 + $0x28] sm:$0xff]  ;;  %s5271_s21 = scalar_lea.vmem %s6399_s20, %s5014_s1 }
  0x2a   : > { %v709_v11 = vpack.c.bf16 %v678_v8, %v677_v6  ;;  %v710_v12 = vpack.c.bf16 %v680_v10, %v679_v9  ;;  %v681_v13 = vld [vmem:[%s5020_s23 + $0x30] sm:$0xff]  ;;  %v682_v14 = vld [vmem:[%s5020_s23 + $0x38] sm:$0xff]  ;;  %v683_v15 = vld [vmem:[%s5020_s23 + $0x40] sm:$0xff]  ;;  %3897 = vmatpush3.bf16.msra.mxu1 %v4255_v52 }
  0x2b   : > { %3860 = vmatprep.mubr.msk.bf16.mxu0 %vm738_vm1, %v708_v7  ;;  %v684_v16 = vld [vmem:[%s5020_s23 + $0x48] sm:$0xff]  ;;  %v711_v17 = vpack.c.bf16 %v682_v14, %v681_v13  ;;  %v685_v19 = vld [vmem:[%s5020_s23 + $0x50] sm:$0xff]  ;;  %v686_v20 = vld [vmem:[%s5020_s23 + $0x58] sm:$0xff]  ;;  %3898 = vmatprep.subr.bf16.mxu1 %v4256_v53 }
  0x2c   : > { %3861 = vmatmul.mubr.msk.bf16.vlgmr.msra.gmra.mxu0 %vm738_vm1, %v709_v11  ;;  %v712_v18 = vpack.c.bf16 %v684_v16, %v683_v15  ;;  %v687_v21 = vld [vmem:[%s5020_s23 + $0x60] sm:$0xff]  ;;  %v688_v22 = vld [vmem:[%s5020_s23 + $0x68] sm:$0xff]  ;;  %v713_v23 = vpack.c.bf16 %v686_v20, %v685_v19  ;;  %v689_v25 = vld [vmem:[%s5020_s23 + $0x70] sm:$0xff] }
  0x2d   : > { %3864 = vmatprep.mubr.msk.bf16.mxu0 %vm738_vm1, %v710_v12  ;;  %v714_v24 = vpack.c.bf16 %v688_v22, %v687_v21  ;;  %v690_v26 = vld [vmem:[%s5020_s23 + $0x78] sm:$0xff]  ;;  %v691_v27 = vld [vmem:[%s5020_s23 + $0x80] sm:$0xff]  ;;  %v692_v28 = vld [vmem:[%s5020_s23 + $0x88] sm:$0xff]  ;;  %3941 = vmatpush3.bf16.msra.mxu0 %v4261_v58 }
  0x2e   : > { %v715_v29 = vpack.c.bf16 %v690_v26, %v689_v25  ;;  %v716_v30 = vpack.c.bf16 %v692_v28, %v691_v27  ;;  %v693_v31 = vld [vmem:[%s5020_s23 + $0x90] sm:$0xff]  ;;  %v694_v32 = vld [vmem:[%s5020_s23 + $0x98] sm:$0xff]  ;;  %v695_v33 = vld [vmem:[%s5020_s23 + $0xa0] sm:$0xff]  ;;  %3899 = vmatpush3.bf16.msra.mxu1 %v4256_v53  ;;  %3942 = vmatprep.subr.bf16.mxu0 %v4262_v59 }
  0x2f   : > { %v696_v34 = vld [vmem:[%s5020_s23 + $0xa8] sm:$0xff]  ;;  %v717_v35 = vpack.c.bf16 %v694_v32, %v693_v31  ;;  %v697_v37 = vld [vmem:[%s5020_s23 + $0xb0] sm:$0xff]  ;;  %v698_v38 = vld [vmem:[%s5020_s23 + $0xb8] sm:$0xff]  ;;  %3900 = vmatprep.subr.bf16.mxu1 %v4257_v54 }
  0x30   : > { %v718_v36 = vpack.c.bf16 %v696_v34, %v695_v33  ;;  %v699_v39 = vld [vmem:[%s5020_s23 + $0xc0] sm:$0xff]  ;;  %v700_v40 = vld [vmem:[%s5020_s23 + $0xc8] sm:$0xff]  ;;  %v719_v41 = vpack.c.bf16 %v698_v38, %v697_v37  ;;  %v701_v43 = vld [vmem:[%s5020_s23 + $0xd0] sm:$0xff] }
  0x31   : > { %v720_v42 = vpack.c.bf16 %v700_v40, %v699_v39  ;;  %v702_v44 = vld [vmem:[%s5020_s23 + $0xd8] sm:$0xff]  ;;  %v703_v45 = vld [vmem:[%s5020_s23 + $0xe0] sm:$0xff]  ;;  %v704_v46 = vld [vmem:[%s5020_s23 + $0xe8] sm:$0xff]  ;;  %3943 = vmatpush3.bf16.msra.mxu0 %v4262_v59 }
  0x32   : > { %v721_v47 = vpack.c.bf16 %v702_v44, %v701_v43  ;;  %v722_v48 = vpack.c.bf16 %v704_v46, %v703_v45  ;;  %v705_v49 = vld [vmem:[%s5020_s23 + $0xf0] sm:$0xff]  ;;  %v706_v50 = vld [vmem:[%s5020_s23 + $0xf8] sm:$0xff]  ;;  %3901 = vmatpush3.bf16.msra.mxu1 %v4257_v54  ;;  %3944 = vmatprep.subr.bf16.mxu0 %v4263_v60 }
  0x33   : > { %v723_v51 = vpack.c.bf16 %v706_v50, %v705_v49  ;;  %3902 = vmatprep.subr.bf16.mxu1 %v4258_v55 }
  0x34   : > { %3865 = vmatmul.mubr.msk.bf16.gmra.mxu0 %vm738_vm1, %v711_v17 }
  0x35   : > { %3868 = vmatprep.mubr.msk.bf16.mxu0 %vm738_vm1, %v712_v18  ;;  %3945 = vmatpush3.bf16.msra.mxu0 %v4263_v60 }
  0x36   : > { %3903 = vmatpush3.bf16.msra.mxu1 %v4258_v55  ;;  %3946 = vmatprep.subr.bf16.mxu0 %v4264_v61 }
  0x37   : > { %3904 = vmatprep.subr.bf16.mxu1 %v4259_v56 }
  0x39   : > { %3947 = vmatpush3.bf16.msra.mxu0 %v4264_v61 }
  0x3a   : > { %3905 = vmatpush3.bf16.msra.mxu1 %v4259_v56  ;;  %3948 = vmatprep.subr.bf16.mxu0 %v4265_v62 }
  0x3b   : > { %3906 = vmatprep.subr.bf16.mxu1 %v4260_v57 }
  0x3c   : > { %3869 = vmatmul.mubr.msk.bf16.gmra.mxu0 %vm738_vm1, %v713_v23 }
  0x3d   : > { %3872 = vmatprep.mubr.msk.bf16.mxu0 %vm738_vm1, %v714_v24  ;;  %3949 = vmatpush3.bf16.msra.mxu0 %v4265_v62 }
  0x3e   : > { %3907 = vmatpush3.bf16.msra.mxu1 %v4260_v57 }
  0x44   : > { %3873 = vmatmul.mubr.msk.bf16.gmra.mxu0 %vm738_vm1, %v715_v29 }
  0x45   : > { %3876 = vmatprep.mubr.msk.bf16.mxu0 %vm738_vm1, %v716_v30 }
  0x4c   : > { %3877 = vmatmul.mubr.msk.bf16.gmra.mxu0 %vm738_vm1, %v717_v35 }
  0x4d   : > { %3880 = vmatprep.mubr.msk.bf16.mxu0 %vm738_vm1, %v718_v36 }
  0x54   : > { %3881 = vmatmul.mubr.msk.bf16.gmra.mxu0 %vm738_vm1, %v719_v41 }
  0x55   : > { %3884 = vmatprep.mubr.msk.bf16.mxu0 %vm738_vm1, %v720_v42 }
  0x5c   : > { %3885 = vmatmul.mubr.msk.bf16.gmra.mxu0 %vm738_vm1, %v721_v47 }
  0x5d   : > { %3888 = vmatprep.mubr.msk.bf16.mxu0 %vm738_vm1, %v722_v48 }
  0x64   : > { %3889 = vmatmul.mubr.msk.bf16.gmra.mxu0 %vm738_vm1, %v723_v51 }
  0xec   : > { %v3862_v63 = vpop.f32.mrf.mxu0 }
  0xed   : > { %v834_v5 = vadd.f32 %v3862_v63, %v5106_v0 }
  0xee   : > { %v825_v1 = vpop.f32.mrf.mxu0 }
  0xef   : > { %v826_v2 = vadd.f32 %v5106_v0, %v825_v1 }
  0xf0   : > { %v3863_v3 = vpop.f32.mrf.mxu0 }
  0xf1   : > { %v837_v4 = vadd.f32 %v3863_v3, %v5106_v0  ;;  %4302 = vtanh.f32 %v826_v2 }
  0xf2   : > { %v828_v6 = vpop.f32.mrf.mxu0 }
  0xf3   : > { %v829_v7 = vadd.f32 %v5106_v0, %v828_v6  ;;  %4304 = vtanh.f32 %v837_v4 }
  0xf4   : > { %v3866_v8 = vpop.f32.mrf.mxu0 }
  0xf5   : > { %4306 = vtanh.f32 %v829_v7  ;;  %v850_v9 = vadd.f32 %v3866_v8, %v5106_v0 }
  0xf6   : > { %4308 = vtanh.f32 %v834_v5  ;;  %v841_v10 = vpop.f32.mrf.mxu0 }
  0xf7   : > { %v842_v11 = vadd.f32 %v5106_v0, %v841_v10  ;;  %4310 = vtanh.f32 %v850_v9 }
  0xf8   : > { %v3867_v12 = vpop.f32.mrf.mxu0 }
  0xf9   : > { %v853_v13 = vadd.f32 %v3867_v12, %v5106_v0  ;;  %4312 = vtanh.f32 %v842_v11 }
  0xfa   : > { %v844_v14 = vpop.f32.mrf.mxu0 }
  0xfb   : > { %4314 = vtanh.f32 %v853_v13  ;;  %v845_v15 = vadd.f32 %v5106_v0, %v844_v14 }
  0xfc   : > { %v3870_v16 = vpop.f32.mrf.mxu0 }
  0xfd   : > { %4316 = vtanh.f32 %v845_v15  ;;  %v866_v17 = vadd.f32 %v3870_v16, %v5106_v0 }
  0xfe   : > { %v857_v18 = vpop.f32.mrf.mxu0  ;;  %v4303_v20 = vpop.eup %4302 }
  0xff   : > { %v858_v19 = vadd.f32 %v5106_v0, %v857_v18  ;;  %4318 = vtanh.f32 %v866_v17 }
 0x100   : > { %v3871_v21 = vpop.f32.mrf.mxu0  ;;  %v4305_v22 = vpop.eup %4304 }
 0x101   : > { %v869_v23 = vadd.f32 %v3871_v21, %v5106_v0  ;;  %4320 = vtanh.f32 %v858_v19 }
 0x102   : > { %v4307_v24 = vpop.eup %4306  ;;  %v860_v25 = vpop.f32.mrf.mxu0 }
 0x103   : > { %v4309_v26 = vpop.eup %4308  ;;  %4322 = vtanh.f32 %v869_v23  ;;  %v861_v27 = vadd.f32 %v5106_v0, %v860_v25  ;;  %v984_v28 = vpack.c.bf16 %v4307_v24, %v4303_v20 }
 0x104   : > { %v3874_v29 = vpop.f32.mrf.mxu0  ;;  %v985_v30 = vpack.c.bf16 %v4305_v22, %v4309_v26  ;;  %v4311_v32 = vpop.eup %4310 }
 0x105   : > { %4324 = vtanh.f32 %v861_v27  ;;  %v882_v31 = vadd.f32 %v3874_v29, %v5106_v0  ;;  %3908 = vmatprep.mubr.bf16.mxu1 %v984_v28 }
 0x106   : > { %v873_v33 = vpop.f32.mrf.mxu0  ;;  %3909 = vmatmul.mubr.bf16.vlgmr.msra.gmra.mxu1 %v985_v30  ;;  %v4313_v34 = vpop.eup %4312 }
 0x107   : > { %v874_v35 = vadd.f32 %v5106_v0, %v873_v33  ;;  %4326 = vtanh.f32 %v882_v31 }
 0x108   : > { %v4315_v36 = vpop.eup %4314  ;;  %v3875_v37 = vpop.f32.mrf.mxu0 }
 0x109   : > { %v885_v38 = vadd.f32 %v3875_v37, %v5106_v0  ;;  %4328 = vtanh.f32 %v874_v35  ;;  %v987_v41 = vpack.c.bf16 %v4315_v36, %v4311_v32 }
 0x10a   : > { %v4317_v39 = vpop.eup %4316  ;;  %v876_v40 = vpop.f32.mrf.mxu0 }
 0x10b   : > { %4330 = vtanh.f32 %v885_v38  ;;  %v877_v42 = vadd.f32 %v5106_v0, %v876_v40  ;;  %v986_v43 = vpack.c.bf16 %v4317_v39, %v4313_v34 }
 0x10c   : > { %v3878_v44 = vpop.f32.mrf.mxu0  ;;  %v4319_v46 = vpop.eup %4318 }
 0x10d   : > { %4332 = vtanh.f32 %v877_v42  ;;  %v898_v45 = vadd.f32 %v3878_v44, %v5106_v0  ;;  %3912 = vmatprep.mubr.bf16.mxu1 %v986_v43 }
 0x10e   : > { %v889_v47 = vpop.f32.mrf.mxu0  ;;  %3913 = vmatmul.mubr.bf16.gmra.mxu1 %v987_v41  ;;  %v4321_v48 = vpop.eup %4320 }
 0x10f   : > { %v890_v49 = vadd.f32 %v5106_v0, %v889_v47  ;;  %4334 = vtanh.f32 %v898_v45 }
 0x110   : > { %v4323_v50 = vpop.eup %4322  ;;  %v3879_v51 = vpop.f32.mrf.mxu0 }
 0x111   : > { %v901_v52 = vadd.f32 %v3879_v51, %v5106_v0  ;;  %4336 = vtanh.f32 %v890_v49  ;;  %v989_v55 = vpack.c.bf16 %v4323_v50, %v4319_v46  ;;  %v4267_v49 = vld [vmem:[%s6329_s8 + $0x8] sm:$0xff]   ;;  %v4268_v50 = vld [vmem:[%s6329_s8] sm:$0xff]   ;;  %v5152_v51 = vld [vmem:[%s6332_s11 + $0x38] sm:$0xff]  }
 0x112   : > { %v4325_v53 = vpop.eup %4324  ;;  %v892_v54 = vpop.f32.mrf.mxu0  ;;  %4214 = vmatprep.subr.bf16.mxu1 %v5152_v51 }
 0x113   : > { %4338 = vtanh.f32 %v901_v52  ;;  %v893_v56 = vadd.f32 %v5106_v0, %v892_v54  ;;  %v988_v57 = vpack.c.bf16 %v4325_v53, %v4321_v48  ;;  %v5158_v52 = vld [vmem:[%s6332_s11 + $0x30] sm:$0xff]   ;;  %4222 = vmatpush3.bf16.msra.mxu1 %v5152_v51  ;;  %v5166_v53 = vld [vmem:[%s6332_s11 + $0x28] sm:$0xff]   ;;  %v5173_v54 = vld [vmem:[%s6332_s11 + $0x20] sm:$0xff]  }
 0x114   : > { %v3882_v58 = vpop.f32.mrf.mxu0  ;;  %v4327_v60 = vpop.eup %4326  ;;  %4215 = vmatprep.subr.bf16.mxu1 %v5158_v52 }
 0x115   : > { %4340 = vtanh.f32 %v893_v56  ;;  %v914_v59 = vadd.f32 %v3882_v58, %v5106_v0  ;;  %3916 = vmatprep.mubr.bf16.mxu1 %v988_v57  ;;  %v5188_v57 = vld [vmem:[%s6328_s7] ss:$0 sm:$0xff] }
 0x116   : > { %v905_v61 = vpop.f32.mrf.mxu0  ;;  %3917 = vmatmul.mubr.bf16.gmra.mxu1 %v989_v55  ;;  %v4329_v62 = vpop.eup %4328  ;;  %v5180_v55 = vld [vmem:[%s6332_s11 + $0x18] sm:$0xff]  }
 0x117   : > { %v906_v63 = vadd.f32 %v5106_v0, %v905_v61  ;;  %4342 = vtanh.f32 %v914_v59  ;;  %4223 = vmatpush3.bf16.msra.mxu1 %v5158_v52 }
 0x118   : > { %v4331_v1 = vpop.eup %4330  ;;  %v3883_v2 = vpop.f32.mrf.mxu0  ;;  %4216 = vmatprep.subr.bf16.mxu1 %v5166_v53 }
 0x119   : > { %v917_v3 = vadd.f32 %v3883_v2, %v5106_v0  ;;  %4344 = vtanh.f32 %v906_v63  ;;  %v991_v6 = vpack.c.bf16 %v4331_v1, %v4327_v60 }
 0x11a   : > { %v4333_v4 = vpop.eup %4332  ;;  %v908_v5 = vpop.f32.mrf.mxu0 }
 0x11b   : > { %4346 = vtanh.f32 %v917_v3  ;;  %v909_v7 = vadd.f32 %v5106_v0, %v908_v5  ;;  %v990_v8 = vpack.c.bf16 %v4333_v4, %v4329_v62  ;;  %4224 = vmatpush3.bf16.msra.mxu1 %v5166_v53 }
 0x11c   : > { %v3886_v9 = vpop.f32.mrf.mxu0  ;;  %v4335_v11 = vpop.eup %4334  ;;  %4217 = vmatprep.subr.bf16.mxu1 %v5173_v54 }
 0x11d   : > { %4348 = vtanh.f32 %v909_v7  ;;  %v930_v10 = vadd.f32 %v3886_v9, %v5106_v0  ;;  %3920 = vmatprep.mubr.bf16.mxu1 %v990_v8 }
 0x11e   : > { %v921_v12 = vpop.f32.mrf.mxu0  ;;  %3921 = vmatmul.mubr.bf16.gmra.mxu1 %v991_v6  ;;  %v4337_v13 = vpop.eup %4336 }
 0x11f   : > { %v922_v14 = vadd.f32 %v5106_v0, %v921_v12  ;;  %4350 = vtanh.f32 %v930_v10  ;;  %4225 = vmatpush3.bf16.msra.mxu1 %v5173_v54 }
 0x120   : > { %v4339_v15 = vpop.eup %4338  ;;  %v3887_v16 = vpop.f32.mrf.mxu0  ;;  %4218 = vmatprep.subr.bf16.mxu1 %v5180_v55 }
 0x121   : > { %v933_v17 = vadd.f32 %v3887_v16, %v5106_v0  ;;  %4352 = vtanh.f32 %v922_v14  ;;  %v993_v20 = vpack.c.bf16 %v4339_v15, %v4335_v11 }
 0x122   : > { %v4341_v18 = vpop.eup %4340  ;;  %v924_v19 = vpop.f32.mrf.mxu0 }
 0x123   : > { %4354 = vtanh.f32 %v933_v17  ;;  %v925_v21 = vadd.f32 %v5106_v0, %v924_v19  ;;  %v992_v22 = vpack.c.bf16 %v4341_v18, %v4337_v13  ;;  %4226 = vmatpush3.bf16.msra.mxu1 %v5180_v55 }
 0x124   : > { %v3890_v23 = vpop.f32.mrf.mxu0  ;;  %v4343_v25 = vpop.eup %4342 }
 0x125   : > { %4356 = vtanh.f32 %v925_v21  ;;  %v946_v24 = vadd.f32 %v3890_v23, %v5106_v0  ;;  %3924 = vmatprep.mubr.bf16.mxu1 %v992_v22 }
 0x126   : > { %v937_v26 = vpop.f32.mrf.mxu0  ;;  %3925 = vmatmul.mubr.bf16.gmra.mxu1 %v993_v20  ;;  %v4345_v27 = vpop.eup %4344 }
 0x127   : > { %v938_v28 = vadd.f32 %v5106_v0, %v937_v26  ;;  %4358 = vtanh.f32 %v946_v24 }
 0x128   : > { %v4347_v29 = vpop.eup %4346  ;;  %v3891_v30 = vpop.f32.mrf.mxu0 }
 0x129   : > { %v949_v31 = vadd.f32 %v3891_v30, %v5106_v0  ;;  %4360 = vtanh.f32 %v938_v28  ;;  %v995_v34 = vpack.c.bf16 %v4347_v29, %v4343_v25 }
 0x12a   : > { %v4349_v32 = vpop.eup %4348  ;;  %v940_v33 = vpop.f32.mrf.mxu0 }
 0x12b   : > { %4362 = vtanh.f32 %v949_v31  ;;  %v941_v35 = vadd.f32 %v5106_v0, %v940_v33  ;;  %v994_v36 = vpack.c.bf16 %v4349_v32, %v4345_v27  ;;  %v4266_v0 = vld [vmem:[%s6329_s8 + $0x10] sm:$0xff]  }
 0x12c   : > { %v4351_v37 = vpop.eup %4350  ;;  %3950 = vmatprep.subr.bf16.mxu0 %v4266_v0 }
 0x12d   : > { %4364 = vtanh.f32 %v941_v35  ;;  %3928 = vmatprep.mubr.bf16.mxu1 %v994_v36  ;;  %3951 = vmatpush3.bf16.msra.mxu0 %v4266_v0 }
 0x12e   : > { %3929 = vmatmul.mubr.bf16.gmra.mxu1 %v995_v34  ;;  %v4353_v38 = vpop.eup %4352  ;;  %3952 = vmatprep.subr.bf16.mxu0 %v4267_v49 }
 0x130   : > { %v4355_v39 = vpop.eup %4354 }
 0x131   : > { %v997_v41 = vpack.c.bf16 %v4355_v39, %v4351_v37  ;;  %3953 = vmatpush3.bf16.msra.mxu0 %v4267_v49 }
 0x132   : > { %v4357_v40 = vpop.eup %4356  ;;  %3954 = vmatprep.subr.bf16.mxu0 %v4268_v50 }
 0x133   : > { %v996_v42 = vpack.c.bf16 %v4357_v40, %v4353_v38 }
 0x134   : > { %v4359_v43 = vpop.eup %4358 }
 0x135   : > { %3932 = vmatprep.mubr.bf16.mxu1 %v996_v42  ;;  %3955 = vmatpush3.bf16.msra.mxu0 %v4268_v50 }
 0x136   : > { %3933 = vmatmul.mubr.bf16.gmra.mxu1 %v997_v41  ;;  %v4361_v44 = vpop.eup %4360  ;;  %3988 = vmatprep.subr.bf16.mxu0 %v5152_v51 }
 0x138   : > { %v4363_v45 = vpop.eup %4362 }
 0x139   : > { %v999_v47 = vpack.c.bf16 %v4363_v45, %v4359_v43 }
 0x13a   : > { %v4365_v46 = vpop.eup %4364 }
 0x13b   : > { %v998_v48 = vpack.c.bf16 %v4365_v46, %v4361_v44 }
 0x13d   : > { %3936 = vmatprep.mubr.bf16.mxu1 %v998_v48 }
 0x13e   : > { %3937 = vmatmul.mubr.bf16.gmra.mxu1 %v999_v47 }
 0x1c6   : > { %v3910_v56 = vpop.f32.mrf.mxu1 }
 0x1c7   : > { %v1114_v62 = vadd.f32 %v3910_v56, %v5188_v57 }
 0x1c8   : > { %v1105_v58 = vpop.f32.mrf.mxu1 }
 0x1c9   : > { %v1106_v59 = vadd.f32 %v5188_v57, %v1105_v58 }
 0x1ca   : > { %v3911_v60 = vpop.f32.mrf.mxu1 }
 0x1cb   : > { %v1117_v61 = vadd.f32 %v3911_v60, %v5188_v57  ;;  %4366 = vtanh.f32 %v1106_v59 }
 0x1cc   : > { %v1108_v63 = vpop.f32.mrf.mxu1 }
 0x1cd   : > { %v1109_v1 = vadd.f32 %v5188_v57, %v1108_v63  ;;  %4368 = vtanh.f32 %v1117_v61 }
 0x1ce   : > { %v3914_v2 = vpop.f32.mrf.mxu1 }
 0x1cf   : > { %4370 = vtanh.f32 %v1109_v1  ;;  %v1130_v7 = vadd.f32 %v3914_v2, %v5188_v57 }
 0x1d0   : > { %4372 = vtanh.f32 %v1114_v62  ;;  %v1121_v3 = vpop.f32.mrf.mxu1 }
 0x1d1   : > { %v1122_v4 = vadd.f32 %v5188_v57, %v1121_v3 }
 0x1d2   : > { %v3915_v5 = vpop.f32.mrf.mxu1 }
 0x1d3   : > { %v1133_v6 = vadd.f32 %v3915_v5, %v5188_v57  ;;  %4374 = vtanh.f32 %v1122_v4 }
 0x1d4   : > { %v1124_v8 = vpop.f32.mrf.mxu1 }
 0x1d5   : > { %v1125_v9 = vadd.f32 %v5188_v57, %v1124_v8  ;;  %4376 = vtanh.f32 %v1133_v6 }
 0x1d6   : > { %v3918_v10 = vpop.f32.mrf.mxu1 }
 0x1d7   : > { %4378 = vtanh.f32 %v1125_v9  ;;  %v1146_v18 = vadd.f32 %v3918_v10, %v5188_v57 }
 0x1d8   : > { %4380 = vtanh.f32 %v1130_v7  ;;  %v1137_v11 = vpop.f32.mrf.mxu1  ;;  %v4367_v13 = vpop.eup %4366 }
 0x1d9   : > { %v1138_v12 = vadd.f32 %v5188_v57, %v1137_v11 }
 0x1da   : > { %v3919_v14 = vpop.f32.mrf.mxu1  ;;  %v4369_v15 = vpop.eup %4368 }
 0x1db   : > { %v1149_v16 = vadd.f32 %v3919_v14, %v5188_v57  ;;  %4382 = vtanh.f32 %v1138_v12 }
 0x1dc   : > { %v4371_v17 = vpop.eup %4370  ;;  %v1140_v19 = vpop.f32.mrf.mxu1 }
 0x1dd   : > { %v4373_v20 = vpop.eup %4372  ;;  %v1141_v21 = vadd.f32 %v5188_v57, %v1140_v19  ;;  %v1264_v22 = vpack.c.bf16 %v4371_v17, %v4367_v13  ;;  %4384 = vtanh.f32 %v1149_v16 }
 0x1de   : > { %v3922_v23 = vpop.f32.mrf.mxu1  ;;  %v1265_v24 = vpack.c.bf16 %v4369_v15, %v4373_v20 }
 0x1df   : > { %4386 = vtanh.f32 %v1141_v21  ;;  %3956 = vmatprep.mubr.bf16.mxu0 %v1264_v22  ;;  %v1162_v32 = vadd.f32 %v3922_v23, %v5188_v57 }
 0x1e0   : > { %4388 = vtanh.f32 %v1146_v18  ;;  %v1153_v25 = vpop.f32.mrf.mxu1  ;;  %3957 = vmatmul.mubr.bf16.vlgmr.msra.gmra.mxu0 %v1265_v24  ;;  %v4375_v27 = vpop.eup %4374 }
 0x1e1   : > { %v1154_v26 = vadd.f32 %v5188_v57, %v1153_v25  ;;  %3989 = vmatpush3.bf16.msra.mxu0 %v5152_v51 }
 0x1e2   : > { %v3923_v28 = vpop.f32.mrf.mxu1  ;;  %3990 = vmatprep.subr.bf16.mxu0 %v5158_v52  ;;  %v4377_v29 = vpop.eup %4376 }
 0x1e3   : > { %v1165_v30 = vadd.f32 %v3923_v28, %v5188_v57  ;;  %4390 = vtanh.f32 %v1154_v26 }
 0x1e4   : > { %v4379_v31 = vpop.eup %4378  ;;  %v1156_v33 = vpop.f32.mrf.mxu1 }
 0x1e5   : > { %v4381_v34 = vpop.eup %4380  ;;  %v1157_v35 = vadd.f32 %v5188_v57, %v1156_v33  ;;  %v1266_v36 = vpack.c.bf16 %v4379_v31, %v4375_v27  ;;  %3991 = vmatpush3.bf16.msra.mxu0 %v5158_v52  ;;  %4392 = vtanh.f32 %v1165_v30 }
 0x1e6   : > { %v3926_v37 = vpop.f32.mrf.mxu1  ;;  %v1267_v38 = vpack.c.bf16 %v4377_v29, %v4381_v34  ;;  %3992 = vmatprep.subr.bf16.mxu0 %v5166_v53 }
 0x1e7   : > { %4394 = vtanh.f32 %v1157_v35  ;;  %3960 = vmatprep.mubr.bf16.mxu0 %v1266_v36  ;;  %v1178_v46 = vadd.f32 %v3926_v37, %v5188_v57 }
 0x1e8   : > { %4396 = vtanh.f32 %v1162_v32  ;;  %v1169_v39 = vpop.f32.mrf.mxu1  ;;  %3961 = vmatmul.mubr.bf16.gmra.mxu0 %v1267_v38  ;;  %v4383_v41 = vpop.eup %4382 }
 0x1e9   : > { %v1170_v40 = vadd.f32 %v5188_v57, %v1169_v39  ;;  %3993 = vmatpush3.bf16.msra.mxu0 %v5166_v53 }
 0x1ea   : > { %v3927_v42 = vpop.f32.mrf.mxu1  ;;  %3994 = vmatprep.subr.bf16.mxu0 %v5173_v54  ;;  %v4385_v43 = vpop.eup %4384 }
 0x1eb   : > { %v1181_v44 = vadd.f32 %v3927_v42, %v5188_v57  ;;  %4398 = vtanh.f32 %v1170_v40  ;;  %v4274_v42 = vld [vmem:[%s6332_s11 + $0x10] sm:$0xff]  }
 0x1ec   : > { %v4387_v45 = vpop.eup %4386  ;;  %v1172_v47 = vpop.f32.mrf.mxu1  ;;  %4219 = vmatprep.subr.bf16.mxu1 %v4274_v42 }
 0x1ed   : > { %v4389_v48 = vpop.eup %4388  ;;  %v1173_v0 = vadd.f32 %v5188_v57, %v1172_v47  ;;  %v1268_v49 = vpack.c.bf16 %v4387_v45, %v4383_v41  ;;  %3995 = vmatpush3.bf16.msra.mxu0 %v5173_v54  ;;  %4400 = vtanh.f32 %v1181_v44  ;;  %4227 = vmatpush3.bf16.msra.mxu1 %v4274_v42  ;;  %v4276_v44 = vld [vmem:[%s6332_s11] sm:$0xff]  }
 0x1ee   : > { %v3930_v50 = vpop.f32.mrf.mxu1  ;;  %v1269_v51 = vpack.c.bf16 %v4385_v43, %v4389_v48  ;;  %3996 = vmatprep.subr.bf16.mxu0 %v5180_v55  ;;  %v4275_v43 = vld [vmem:[%s6332_s11 + $0x8] sm:$0xff]   ;;  %v5243_v45 = vld [vmem:[%s6331_s10] sm:$0xff]  }
 0x1ef   : > { %4402 = vtanh.f32 %v1173_v0  ;;  %3964 = vmatprep.mubr.bf16.mxu0 %v1268_v49  ;;  %v1194_v61 = vadd.f32 %v3930_v50, %v5188_v57  ;;  %4220 = vmatprep.subr.bf16.mxu1 %v4275_v43  ;;  %v707_v48 = vld [vmem:[%s6398_s24] sm:$0x1] }
 0x1f0   : > { %4404 = vtanh.f32 %v1178_v46  ;;  %v1185_v52 = vpop.f32.mrf.mxu1  ;;  %3965 = vmatmul.mubr.bf16.gmra.mxu0 %v1269_v51  ;;  %v4391_v56 = vpop.eup %4390  ;;  %v1545_v46 = vlaneseq  ;;  %v2688_v49 = vsub.f32 1.0, %v707_v48  ;;  %v5254_v51 = vld [vmem:[%s6334_s13 + $0x38] sm:$0xff]  }
 0x1f1   : > { %v1186_v53 = vadd.f32 %v5188_v57, %v1185_v52  ;;  %3997 = vmatpush3.bf16.msra.mxu0 %v5180_v55  ;;  %4228 = vmatpush3.bf16.msra.mxu1 %v4275_v43 }
 0x1f2   : > { %v3931_v58 = vpop.f32.mrf.mxu1  ;;  %v4393_v59 = vpop.eup %4392  ;;  %3998 = vmatprep.subr.bf16.mxu0 %v4274_v42  ;;  %4221 = vmatprep.subr.bf16.mxu1 %v4276_v44  ;;  %v1546_v47 = vshrl.u32 %v1545_v46, 7 }
 0x1f3   : > { %v1197_v60 = vadd.f32 %v3931_v58, %v5188_v57  ;;  %4406 = vtanh.f32 %v1186_v53  ;;  %v5260_v53 = vld [vmem:[%s6330_s9] ss:$0 sm:$0xff] }
 0x1f4   : > { %v4395_v54 = vpop.eup %4394  ;;  %v1188_v62 = vpop.f32.mrf.mxu1  ;;  %v1547_v0 = vsub.s32 0, %v1546_v47 }
 0x1f5   : > { %v4397_v63 = vpop.eup %4396  ;;  %v1189_v1 = vadd.f32 %v5188_v57, %v1188_v62  ;;  %v1270_v2 = vpack.c.bf16 %v4395_v54, %v4391_v56  ;;  %4408 = vtanh.f32 %v1197_v60  ;;  %3999 = vmatpush3.bf16.msra.mxu0 %v4274_v42  ;;  %4229 = vmatpush3.bf16.msra.mxu1 %v4276_v44 }
 0x1f6   : > { %v3934_v3 = vpop.f32.mrf.mxu1  ;;  %v1271_v4 = vpack.c.bf16 %v4393_v59, %v4397_v63  ;;  %4000 = vmatprep.subr.bf16.mxu0 %v4275_v43  ;;  %v5249_v50 = vrot.slane %v2688_v49, %v1547_v0  ;;  %4070 = vmatprep.subr.bf16.mxu1 %v5254_v51  ;;  %v650_v49 = vld [vmem:[%s5271_s21 + $0x38] sm:$0xff] }
 0x1f7   : > { %4410 = vtanh.f32 %v1189_v1  ;;  %3968 = vmatprep.mubr.bf16.mxu0 %v1270_v2  ;;  %v1210_v11 = vadd.f32 %v3934_v3, %v5188_v57 }
 0x1f8   : > { %4412 = vtanh.f32 %v1194_v61  ;;  %v1201_v55 = vpop.f32.mrf.mxu1  ;;  %3969 = vmatmul.mubr.bf16.gmra.mxu0 %v1271_v4  ;;  %v4399_v6 = vpop.eup %4398  ;;  %2975 = vrot.lane.b32.xlu0 %v5249_v50, %s4874_s2 }
 0x1f9   : > { %v1202_v5 = vadd.f32 %v5188_v57, %v1201_v55  ;;  %4001 = vmatpush3.bf16.msra.mxu0 %v4275_v43 }
 0x1fa   : > { %v3935_v7 = vpop.f32.mrf.mxu1  ;;  %v4401_v8 = vpop.eup %4400  ;;  %4002 = vmatprep.subr.bf16.mxu0 %v4276_v44 }
 0x1fb   : > { %v1213_v9 = vadd.f32 %v3935_v7, %v5188_v57  ;;  %4414 = vtanh.f32 %v1202_v5  ;;  %v5276_v7 = vrot.slane %v707_v48, %v1547_v0  ;;  %v649_v0 = vld [vmem:[%s5271_s21 + $0x30] sm:$0xff] }
 0x1fc   : > { %v4403_v10 = vpop.eup %4402  ;;  %v1204_v12 = vpop.f32.mrf.mxu1 }
 0x1fd   : > { %v4405_v13 = vpop.eup %4404  ;;  %v1205_v14 = vadd.f32 %v5188_v57, %v1204_v12  ;;  %v1272_v15 = vpack.c.bf16 %v4403_v10, %v4399_v6  ;;  %4416 = vtanh.f32 %v1213_v9  ;;  %4003 = vmatpush3.bf16.msra.mxu0 %v4276_v44  ;;  %v643_v9 = vld [vmem:[%s5271_s21] sm:$0xff]  ;;  %v644_v10 = vld [vmem:[%s5271_s21 + $0x8] sm:$0xff] }
 0x1fe   : > { %v3938_v16 = vpop.f32.mrf.mxu1  ;;  %v1273_v17 = vpack.c.bf16 %v4401_v8, %v4405_v13  ;;  %4036 = vmatprep.subr.bf16.mxu0 %v5243_v45  ;;  %v5282_v13 = vmul.f32 %v5276_v7, %v643_v9 }
 0x1ff   : > { %4418 = vtanh.f32 %v1205_v14  ;;  %3972 = vmatprep.mubr.bf16.mxu0 %v1272_v15  ;;  %v1226_v25 = vadd.f32 %v3938_v16, %v5188_v57  ;;  %v5285_v14 = vmul.f32 %v5276_v7, %v644_v10 }
 0x200   : > { %4420 = vtanh.f32 %v1210_v11  ;;  %v1217_v18 = vpop.f32.mrf.mxu1  ;;  %3973 = vmatmul.mubr.bf16.gmra.mxu0 %v1273_v17  ;;  %v4407_v20 = vpop.eup %4406 }
 0x201   : > { %v1218_v19 = vadd.f32 %v5188_v57, %v1217_v18 }
 0x202   : > { %v3939_v21 = vpop.f32.mrf.mxu1  ;;  %v4409_v22 = vpop.eup %4408 }
 0x203   : > { %v1229_v23 = vadd.f32 %v3939_v21, %v5188_v57  ;;  %4422 = vtanh.f32 %v1218_v19 }
 0x204   : > { %v4411_v24 = vpop.eup %4410  ;;  %v1220_v26 = vpop.f32.mrf.mxu1 }
 0x205   : > { %v4413_v27 = vpop.eup %4412  ;;  %v1221_v28 = vadd.f32 %v5188_v57, %v1220_v26  ;;  %v1274_v29 = vpack.c.bf16 %v4411_v24, %v4407_v20  ;;  %4424 = vtanh.f32 %v1229_v23  ;;  %v645_v26 = vld [vmem:[%s5271_s21 + $0x10] sm:$0xff] }
 0x206   : > { %v1275_v30 = vpack.c.bf16 %v4409_v22, %v4413_v27  ;;  %v646_v27 = vld [vmem:[%s5271_s21 + $0x18] sm:$0xff] }
 0x207   : > { %4426 = vtanh.f32 %v1221_v28  ;;  %3976 = vmatprep.mubr.bf16.mxu0 %v1274_v29 }
 0x208   : > { %4428 = vtanh.f32 %v1226_v25  ;;  %3977 = vmatmul.mubr.bf16.gmra.mxu0 %v1275_v30  ;;  %v4415_v31 = vpop.eup %4414  ;;  %v1582_v25 = vpack.c.bf16 %v5285_v14, %v5282_v13  ;;  %v647_v30 = vld [vmem:[%s5271_s21 + $0x20] sm:$0xff] }
 0x20a   : > { %v4417_v32 = vpop.eup %4416 }
 0x20c   : > { %v4419_v33 = vpop.eup %4418 }
 0x20d   : > { %v4421_v34 = vpop.eup %4420  ;;  %v1276_v35 = vpack.c.bf16 %v4419_v33, %v4415_v31  ;;  %v648_v31 = vld [vmem:[%s5271_s21 + $0x28] sm:$0xff]  ;;  %v5297_v33 = vmul.f32 %v5276_v7, %v645_v26 }
 0x20e   : > { %v1277_v36 = vpack.c.bf16 %v4417_v32, %v4421_v34  ;;  %v5300_v34 = vmul.f32 %v5276_v7, %v646_v27 }
 0x20f   : > { %3980 = vmatprep.mubr.bf16.mxu0 %v1276_v35 }
 0x210   : > { %3981 = vmatmul.mubr.bf16.gmra.mxu0 %v1277_v36  ;;  %v4423_v37 = vpop.eup %4422  ;;  %v5306_v36 = vmul.f32 %v5276_v7, %v647_v30  ;;  %v1583_v44 = vpack.c.bf16 %v5300_v34, %v5297_v33 }
 0x212   : > { %v4425_v38 = vpop.eup %4424 }
 0x214   : > { %v4427_v39 = vpop.eup %4426 }
 0x215   : > { %v4429_v40 = vpop.eup %4428  ;;  %v1278_v57 = vpack.c.bf16 %v4427_v39, %v4423_v37  ;;  %v5309_v37 = vmul.f32 %v5276_v7, %v648_v31 }
 0x216   : > { %v1279_v41 = vpack.c.bf16 %v4425_v38, %v4429_v40 }
 0x217   : > { %3984 = vmatprep.mubr.bf16.mxu0 %v1278_v57  ;;  %v1584_v48 = vpack.c.bf16 %v5309_v37, %v5306_v36 }
 0x218   : > { %3985 = vmatmul.mubr.bf16.gmra.mxu0 %v1279_v41 }
 0x2a0   : > { %v3958_v52 = vpop.f32.mrf.mxu0 }
 0x2a1   : > { %v1394_v54 = vadd.f32 %v3958_v52, %v5260_v53 }
 0x2a2   : > { %v1385_v56 = vpop.f32.mrf.mxu0 }
 0x2a3   : > { %v1386_v58 = vadd.f32 %v5260_v53, %v1385_v56 }
 0x2a4   : > { %v3959_v59 = vpop.f32.mrf.mxu0 }
 0x2a5   : > { %v1397_v60 = vadd.f32 %v3959_v59, %v5260_v53  ;;  %4430 = vtanh.f32 %v1386_v58  ;;  %v651_v58 = vld [vmem:[%s5271_s21 + $0x40] sm:$0xff]  ;;  %v652_v59 = vld [vmem:[%s5271_s21 + $0x48] sm:$0xff] }
 0x2a6   : > { %v1388_v61 = vpop.f32.mrf.mxu0 }
 0x2a7   : > { %v1389_v62 = vadd.f32 %v5260_v53, %v1388_v61  ;;  %4432 = vtanh.f32 %v1397_v60  ;;  %v4279_v60 = vld [vmem:[%s6334_s13 + $0x30] sm:$0xff]   ;;  %v5327_v61 = vmul.f32 %v5276_v7, %v649_v0  ;;  %v660_v0 = vld [vmem:[%s5271_s21 + $0x88] sm:$0xff] }
 0x2a8   : > { %v3962_v63 = vpop.f32.mrf.mxu0 }
 0x2a9   : > { %4434 = vtanh.f32 %v1389_v62  ;;  %v1410_v55 = vadd.f32 %v3962_v63, %v5260_v53  ;;  %v5330_v62 = vmul.f32 %v5276_v7, %v650_v49 }
 0x2aa   : > { %4436 = vtanh.f32 %v1394_v54  ;;  %v1401_v1 = vpop.f32.mrf.mxu0 }
 0x2ab   : > { %v1402_v2 = vadd.f32 %v5260_v53, %v1401_v1  ;;  %v5335_v1 = vmul.f32 %v5276_v7, %v651_v58 }
 0x2ac   : > { %v3963_v3 = vpop.f32.mrf.mxu0 }
 0x2ad   : > { %v1413_v4 = vadd.f32 %v3963_v3, %v5260_v53  ;;  %4438 = vtanh.f32 %v1402_v2  ;;  %v5338_v2 = vmul.f32 %v5276_v7, %v652_v59 }
 0x2ae   : > { %v1404_v5 = vpop.f32.mrf.mxu0 }
 0x2af   : > { %v1405_v6 = vadd.f32 %v5260_v53, %v1404_v5  ;;  %4440 = vtanh.f32 %v1413_v4 }
 0x2b0   : > { %v3966_v8 = vpop.f32.mrf.mxu0 }
 0x2b1   : > { %4442 = vtanh.f32 %v1405_v6  ;;  %v1426_v20 = vadd.f32 %v3966_v8, %v5260_v53 }
 0x2b2   : > { %4444 = vtanh.f32 %v1410_v55  ;;  %v1417_v11 = vpop.f32.mrf.mxu0  ;;  %v4431_v15 = vpop.eup %4430  ;;  %v4280_v55 = vld [vmem:[%s6334_s13 + $0x28] sm:$0xff]  }
 0x2b3   : > { %v1418_v12 = vadd.f32 %v5260_v53, %v1417_v11 }
 0x2b4   : > { %v3967_v16 = vpop.f32.mrf.mxu0  ;;  %v4433_v17 = vpop.eup %4432 }
 0x2b5   : > { %v1429_v18 = vadd.f32 %v3967_v16, %v5260_v53  ;;  %4446 = vtanh.f32 %v1418_v12  ;;  %v1586_v16 = vpack.c.bf16 %v5338_v2, %v5335_v1 }
 0x2b6   : > { %v4435_v19 = vpop.eup %4434  ;;  %v1420_v21 = vpop.f32.mrf.mxu0 }
 0x2b7   : > { %v4437_v22 = vpop.eup %4436  ;;  %v1421_v23 = vadd.f32 %v5260_v53, %v1420_v21  ;;  %v1600_v24 = vpack.c.bf16 %v4435_v19, %v4431_v15  ;;  %4448 = vtanh.f32 %v1429_v18  ;;  %v654_v18 = vld [vmem:[%s5271_s21 + $0x58] sm:$0xff]  ;;  %v655_v21 = vld [vmem:[%s5271_s21 + $0x60] sm:$0xff] }
 0x2b8   : > { %v3970_v28 = vpop.f32.mrf.mxu0  ;;  %v1601_v29 = vpack.c.bf16 %v4433_v17, %v4437_v22  ;;  %v653_v17 = vld [vmem:[%s5271_s21 + $0x50] sm:$0xff]  ;;  %v656_v22 = vld [vmem:[%s5271_s21 + $0x68] sm:$0xff]  ;;  %v5365_v27 = vmul.f32 %v5276_v7, %v655_v21 }
 0x2b9   : > { %4450 = vtanh.f32 %v1421_v23  ;;  %4004 = vmatprep.mubr.bf16.mxu0 %v1600_v24  ;;  %v1442_v42 = vadd.f32 %v3970_v28, %v5260_v53  ;;  %v5357_v24 = vmul.f32 %v5276_v7, %v653_v17  ;;  %v5368_v28 = vmul.f32 %v5276_v7, %v656_v22 }
 0x2ba   : > { %4452 = vtanh.f32 %v1426_v20  ;;  %v1433_v32 = vpop.f32.mrf.mxu0  ;;  %4005 = vmatmul.mubr.bf16.vlgmr.msra.gmra.mxu0 %v1601_v29  ;;  %v4439_v38 = vpop.eup %4438  ;;  %6400 = vst [vmem:[#allocation5_spill] sm:$0xff] %v5365_v27 }
 0x2bb   : > { %v1434_v35 = vadd.f32 %v5260_v53, %v1433_v32  ;;  %4037 = vmatpush3.bf16.msra.mxu0 %v5243_v45  ;;  %4038 = vmatprep.mubr.msk.bf16.mxu0 %vm1847_vm2, %v1582_v25  ;;  %v5360_v25 = vmul.f32 %v5276_v7, %v654_v18  ;;  %6401 = vst [vmem:[#allocation6_spill] sm:$0xff] %v5368_v28  ;;  %v663_v18 = vld [vmem:[%s5271_s21 + $0xa0] sm:$0xff] }
 0x2bc   : > { %v3971_v39 = vpop.f32.mrf.mxu0  ;;  %v4441_v40 = vpop.eup %4440 }
 0x2bd   : > { %v1445_v57 = vadd.f32 %v3971_v39, %v5260_v53  ;;  %4454 = vtanh.f32 %v1434_v35 }
 0x2be   : > { %v4443_v41 = vpop.eup %4442  ;;  %v1436_v43 = vpop.f32.mrf.mxu0 }
 0x2bf   : > { %v4445_v45 = vpop.eup %4444  ;;  %v1437_v46 = vadd.f32 %v5260_v53, %v1436_v43  ;;  %v1602_v47 = vpack.c.bf16 %v4443_v41, %v4439_v38  ;;  %4456 = vtanh.f32 %v1445_v57  ;;  %v1588_v43 = vpack.c.bf16 %v5368_v28, %v5365_v27 }
 0x2c0   : > { %v3974_v52 = vpop.f32.mrf.mxu0  ;;  %v1603_v56 = vpack.c.bf16 %v4441_v40, %v4445_v45  ;;  %v1587_v40 = vpack.c.bf16 %v5360_v25, %v5357_v24  ;;  %v658_v45 = vld [vmem:[%s5271_s21 + $0x78] sm:$0xff] }
 0x2c1   : > { %4458 = vtanh.f32 %v1437_v46  ;;  %4008 = vmatprep.mubr.bf16.mxu1 %v1602_v47  ;;  %v1458_v9 = vadd.f32 %v3974_v52, %v5260_v53 }
 0x2c2   : > { %4460 = vtanh.f32 %v1442_v42  ;;  %v1449_v54 = vpop.f32.mrf.mxu0  ;;  %4009 = vmatmul.mubr.bf16.vlgmr.msra.gmra.mxu1 %v1603_v56  ;;  %4039 = vmatmul.mubr.msk.bf16.vlgmr.msra.gmra.mxu0 %vm1847_vm2, %v1583_v44  ;;  %v4447_v3 = vpop.eup %4446  ;;  %v657_v44 = vld [vmem:[%s5271_s21 + $0x70] sm:$0xff]  ;;  %v5386_v56 = vmul.f32 %v5276_v7, %v658_v45 }
 0x2c3   : > { %v1450_v63 = vadd.f32 %v5260_v53, %v1449_v54  ;;  %4042 = vmatprep.mubr.msk.bf16.mxu0 %vm1847_vm2, %v1584_v48  ;;  %4071 = vmatpush3.bf16.msra.mxu1 %v5254_v51  ;;  %v1585_v51 = vpack.c.bf16 %v5330_v62, %v5327_v61  ;;  %v659_v48 = vld [vmem:[%s5271_s21 + $0x80] sm:$0xff]  ;;  %v5383_v52 = vmul.f32 %v5276_v7, %v657_v44  ;;  %v665_v45 = vld [vmem:[%s5271_s21 + $0xb0] sm:$0xff] }
 0x2c4   : > { %v3975_v4 = vpop.f32.mrf.mxu0  ;;  %4072 = vmatprep.subr.bf16.mxu1 %v4279_v60  ;;  %v4449_v5 = vpop.eup %4448  ;;  %6402 = vst [vmem:[#allocation7_spill] sm:$0xff] %v5386_v56  ;;  %v5391_v59 = vmul.f32 %v5276_v7, %v659_v48  ;;  %v667_v48 = vld [vmem:[%s5271_s21 + $0xc0] sm:$0xff] }
 0x2c5   : > { %v1461_v6 = vadd.f32 %v3975_v4, %v5260_v53  ;;  %4462 = vtanh.f32 %v1450_v63 }
 0x2c6   : > { %v4451_v8 = vpop.eup %4450  ;;  %v1452_v10 = vpop.f32.mrf.mxu0  ;;  %6403 = vst [vmem:[#allocation8_spill] sm:$0xff] %v5391_v59 }
 0x2c7   : > { %v4453_v11 = vpop.eup %4452  ;;  %v1453_v12 = vadd.f32 %v5260_v53, %v1452_v10  ;;  %v1604_v15 = vpack.c.bf16 %v4451_v8, %v4447_v3  ;;  %4073 = vmatpush3.bf16.msra.mxu1 %v4279_v60  ;;  %4464 = vtanh.f32 %v1461_v6  ;;  %v5394_v60 = vmul.f32 %v5276_v7, %v660_v0  ;;  %v668_v0 = vld [vmem:[%s5271_s21 + $0xc8] sm:$0xff] }
 0x2c8   : > { %v3978_v19 = vpop.f32.mrf.mxu0  ;;  %v1605_v20 = vpack.c.bf16 %v4449_v5, %v4453_v11  ;;  %4074 = vmatprep.subr.bf16.mxu1 %v4280_v55  ;;  %v1589_v8 = vpack.c.bf16 %v5386_v56, %v5383_v52 }
 0x2c9   : > { %4466 = vtanh.f32 %v1453_v12  ;;  %4012 = vmatprep.mubr.bf16.mxu1 %v1604_v15  ;;  %v1474_v38 = vadd.f32 %v3978_v19, %v5260_v53  ;;  %6404 = vst [vmem:[#allocation9_spill] sm:$0xff] %v5394_v60  ;;  %v1590_v11 = vpack.c.bf16 %v5394_v60, %v5391_v59  ;;  %v661_v12 = vld [vmem:[%s5271_s21 + $0x90] sm:$0xff]  ;;  %v662_v15 = vld [vmem:[%s5271_s21 + $0x98] sm:$0xff]  ;;  %v664_v19 = vld [vmem:[%s5271_s21 + $0xa8] sm:$0xff] }
 0x2ca   : > { %4468 = vtanh.f32 %v1458_v9  ;;  %v1465_v23 = vpop.f32.mrf.mxu0  ;;  %4013 = vmatmul.mubr.bf16.gmra.mxu1 %v1605_v20  ;;  %4043 = vmatmul.mubr.msk.bf16.gmra.mxu0 %vm1847_vm2, %v1585_v51  ;;  %v4455_v29 = vpop.eup %4454  ;;  %v5409_v21 = vmul.f32 %v5276_v7, %v661_v12  ;;  %v5412_v22 = vmul.f32 %v5276_v7, %v662_v15  ;;  %v672_v12 = vld [vmem:[%s5271_s21 + $0xe8] sm:$0xff] }
 0x2cb   : > { %v1466_v26 = vadd.f32 %v5260_v53, %v1465_v23  ;;  %4046 = vmatprep.mubr.msk.bf16.mxu0 %vm1847_vm2, %v1586_v16  ;;  %4075 = vmatpush3.bf16.msra.mxu1 %v4280_v55 }
 0x2cc   : > { %v3979_v30 = vpop.f32.mrf.mxu0  ;;  %v4457_v31 = vpop.eup %4456  ;;  %6405 = vst [vmem:[#allocation10_spill] sm:$0xff] %v5409_v21  ;;  %6406 = vst [vmem:[#allocation11_spill] sm:$0xff] %v5412_v22 }
 0x2cd   : > { %v1477_v32 = vadd.f32 %v3979_v30, %v5260_v53  ;;  %4470 = vtanh.f32 %v1466_v26  ;;  %v5417_v26 = vmul.f32 %v5276_v7, %v663_v18  ;;  %v5467_v18 = vmul.f32 %v5276_v7, %v672_v12 }
 0x2ce   : > { %v4459_v35 = vpop.eup %4458  ;;  %v1468_v39 = vpop.f32.mrf.mxu0 }
 0x2cf   : > { %v4461_v57 = vpop.eup %4460  ;;  %v1469_v41 = vadd.f32 %v5260_v53, %v1468_v39  ;;  %v1606_v42 = vpack.c.bf16 %v4459_v35, %v4455_v29  ;;  %4472 = vtanh.f32 %v1477_v32  ;;  %6407 = vst [vmem:[#allocation12_spill] sm:$0xff] %v5417_v26  ;;  %v5420_v29 = vmul.f32 %v5276_v7, %v664_v19  ;;  %6416 = vst [vmem:[#allocation21_spill] sm:$0xff] %v5467_v18 }
 0x2d0   : > { %v3982_v46 = vpop.f32.mrf.mxu0  ;;  %v1607_v47 = vpack.c.bf16 %v4457_v31, %v4461_v57  ;;  %v1591_v57 = vpack.c.bf16 %v5412_v22, %v5409_v21 }
 0x2d1   : > { %4474 = vtanh.f32 %v1469_v41  ;;  %4016 = vmatprep.mubr.bf16.mxu1 %v1606_v42  ;;  %v1490_v5 = vadd.f32 %v3982_v46, %v5260_v53  ;;  %6408 = vst [vmem:[#allocation13_spill] sm:$0xff] %v5420_v29  ;;  %v1592_v44 = vpack.c.bf16 %v5420_v29, %v5417_v26  ;;  %v666_v46 = vld [vmem:[%s5271_s21 + $0xb8] sm:$0xff] }
 0x2d2   : > { %4476 = vtanh.f32 %v1474_v38  ;;  %v1481_v49 = vpop.f32.mrf.mxu0  ;;  %4017 = vmatmul.mubr.bf16.gmra.mxu1 %v1607_v47  ;;  %4047 = vmatmul.mubr.msk.bf16.gmra.mxu0 %vm1847_vm2, %v1587_v40  ;;  %v4463_v54 = vpop.eup %4462 }
 0x2d3   : > { %v1482_v58 = vadd.f32 %v5260_v53, %v1481_v49  ;;  %4050 = vmatprep.mubr.msk.bf16.mxu0 %vm1847_vm2, %v1588_v43  ;;  %v5438_v49 = vmul.f32 %v5276_v7, %v666_v46  ;;  %v4285_v46 = vld [vmem:[%s6334_s13] sm:$0xff]  }
 0x2d4   : > { %v3983_v63 = vpop.f32.mrf.mxu0  ;;  %v4465_v3 = vpop.eup %4464 }
 0x2d5   : > { %v1493_v4 = vadd.f32 %v3983_v63, %v5260_v53  ;;  %4478 = vtanh.f32 %v1482_v58  ;;  %6410 = vst [vmem:[#allocation15_spill] sm:$0xff] %v5438_v49  ;;  %v5442_v58 = vmul.f32 %v5276_v7, %v667_v48  ;;  %v4287_v48 = vld [vmem:[%s6336_s15 + $0x30] sm:$0xff]  }
 0x2d6   : > { %v4467_v55 = vpop.eup %4466  ;;  %v1484_v6 = vpop.f32.mrf.mxu0 }
 0x2d7   : > { %v4469_v9 = vpop.eup %4468  ;;  %v1485_v10 = vadd.f32 %v5260_v53, %v1484_v6  ;;  %v1608_v51 = vpack.c.bf16 %v4467_v55, %v4463_v54  ;;  %4480 = vtanh.f32 %v1493_v4  ;;  %6411 = vst [vmem:[#allocation16_spill] sm:$0xff] %v5442_v58  ;;  %v5445_v54 = vmul.f32 %v5276_v7, %v668_v0  ;;  %v4288_v0 = vld [vmem:[%s6336_s15 + $0x28] sm:$0xff]  }
 0x2d8   : > { %v3986_v16 = vpop.f32.mrf.mxu0  ;;  %v1609_v17 = vpack.c.bf16 %v4465_v3, %v4469_v9  ;;  %v669_v9 = vld [vmem:[%s5271_s21 + $0xd0] sm:$0xff] }
 0x2d9   : > { %4482 = vtanh.f32 %v1485_v10  ;;  %4020 = vmatprep.mubr.bf16.mxu1 %v1608_v51  ;;  %v1506_v39 = vadd.f32 %v3986_v16, %v5260_v53  ;;  %6412 = vst [vmem:[#allocation17_spill] sm:$0xff] %v5445_v54  ;;  %v670_v10 = vld [vmem:[%s5271_s21 + $0xd8] sm:$0xff]  ;;  %v5457_v15 = vmul.f32 %v5276_v7, %v669_v9 }
 0x2da   : > { %4484 = vtanh.f32 %v1490_v5  ;;  %v1497_v20 = vpop.f32.mrf.mxu0  ;;  %4021 = vmatmul.mubr.bf16.gmra.mxu1 %v1609_v17  ;;  %4051 = vmatmul.mubr.msk.bf16.gmra.mxu0 %vm1847_vm2, %v1589_v8  ;;  %v4471_v30 = vpop.eup %4470  ;;  %v1594_v8 = vpack.c.bf16 %v5445_v54, %v5442_v58  ;;  %v5460_v16 = vmul.f32 %v5276_v7, %v670_v10 }
 0x2db   : > { %v1498_v23 = vadd.f32 %v5260_v53, %v1497_v20  ;;  %4054 = vmatprep.mubr.msk.bf16.mxu0 %vm1847_vm2, %v1590_v11  ;;  %v671_v11 = vld [vmem:[%s5271_s21 + $0xe0] sm:$0xff]  ;;  %6413 = vst [vmem:[#allocation18_spill] sm:$0xff] %v5457_v15 }
 0x2dc   : > { %v3987_v31 = vpop.f32.mrf.mxu0  ;;  %v4473_v32 = vpop.eup %4472  ;;  %6414 = vst [vmem:[#allocation19_spill] sm:$0xff] %v5460_v16  ;;  %v5464_v17 = vmul.f32 %v5276_v7, %v671_v11 }
 0x2dd   : > { %v1509_v35 = vadd.f32 %v3987_v31, %v5260_v53  ;;  %4486 = vtanh.f32 %v1498_v23 }
 0x2de   : > { %v4475_v38 = vpop.eup %4474  ;;  %v1500_v40 = vpop.f32.mrf.mxu0  ;;  %6415 = vst [vmem:[#allocation20_spill] sm:$0xff] %v5464_v17 }
 0x2df   : > { %v4477_v41 = vpop.eup %4476  ;;  %v1501_v42 = vadd.f32 %v5260_v53, %v1500_v40  ;;  %v1610_v43 = vpack.c.bf16 %v4475_v38, %v4471_v30  ;;  %4488 = vtanh.f32 %v1509_v35  ;;  %v5435_v53 = vmul.f32 %v5276_v7, %v665_v45  ;;  %v673_v38 = vld [vmem:[%s5271_s21 + $0xf0] sm:$0xff]  ;;  %v4284_v45 = vld [vmem:[%s6334_s13 + $0x8] sm:$0xff]  }
 0x2e0   : > { %v1611_v47 = vpack.c.bf16 %v4473_v32, %v4477_v41  ;;  %v1595_v30 = vpack.c.bf16 %v5460_v16, %v5457_v15  ;;  %v1596_v35 = vpack.c.bf16 %v5467_v18, %v5464_v17 }
 0x2e1   : > { %4490 = vtanh.f32 %v1501_v42  ;;  %4024 = vmatprep.mubr.bf16.mxu1 %v1610_v43  ;;  %6409 = vst [vmem:[#allocation14_spill] sm:$0xff] %v5435_v53  ;;  %v1593_v55 = vpack.c.bf16 %v5438_v49, %v5435_v53  ;;  %v4281_v43 = vld [vmem:[%s6334_s13 + $0x20] sm:$0xff]  }
 0x2e2   : > { %4492 = vtanh.f32 %v1506_v39  ;;  %4025 = vmatmul.mubr.bf16.gmra.mxu1 %v1611_v47  ;;  %4055 = vmatmul.mubr.msk.bf16.gmra.mxu0 %vm1847_vm2, %v1591_v57  ;;  %v4479_v63 = vpop.eup %4478  ;;  %v674_v39 = vld [vmem:[%s5271_s21 + $0xf8] sm:$0xff]  ;;  %v5477_v57 = vmul.f32 %v5276_v7, %v673_v38 }
 0x2e3   : > { %4058 = vmatprep.mubr.msk.bf16.mxu0 %vm1847_vm2, %v1592_v44  ;;  %v5480_v41 = vmul.f32 %v5276_v7, %v674_v39  ;;  %4076 = vmatprep.subr.bf16.mxu1 %v4281_v43  ;;  %v4282_v44 = vld [vmem:[%s6334_s13 + $0x18] sm:$0xff]   ;;  %v4283_v7 = vld [vmem:[%s6334_s13 + $0x10] sm:$0xff]  }
 0x2e4   : > { %v4481_v3 = vpop.eup %4480  ;;  %6417 = vst [vmem:[#allocation22_spill] sm:$0xff] %v5477_v57  ;;  %4077 = vmatpush3.bf16.msra.mxu1 %v4281_v43  ;;  %v4286_v47 = vld [vmem:[%s6336_s15 + $0x38] sm:$0xff]  }
 0x2e5   : > { %6418 = vst [vmem:[#allocation23_spill] sm:$0xff] %v5480_v41  ;;  %v1597_v42 = vpack.c.bf16 %v5480_v41, %v5477_v57  ;;  %4078 = vmatprep.subr.bf16.mxu1 %v4282_v44  ;;  %4118 = vmatprep.subr.bf16.mxu0 %v4286_v47 }
 0x2e6   : > { %v4483_v4 = vpop.eup %4482  ;;  %4119 = vmatpush3.bf16.msra.mxu0 %v4286_v47 }
 0x2e7   : > { %v4485_v5 = vpop.eup %4484  ;;  %v1612_v6 = vpack.c.bf16 %v4483_v4, %v4479_v63  ;;  %4120 = vmatprep.subr.bf16.mxu0 %v4287_v48  ;;  %v4289_v63 = vld [vmem:[%s6336_s15 + $0x20] sm:$0xff]  }
 0x2e8   : > { %v1613_v51 = vpack.c.bf16 %v4481_v3, %v4485_v5  ;;  %4079 = vmatpush3.bf16.msra.mxu1 %v4282_v44  ;;  %v4290_v3 = vld [vmem:[%s6336_s15 + $0x18] sm:$0xff]  }
 0x2e9   : > { %4028 = vmatprep.mubr.bf16.mxu1 %v1612_v6  ;;  %4080 = vmatprep.subr.bf16.mxu1 %v4283_v7 }
 0x2ea   : > { %4029 = vmatmul.mubr.bf16.gmra.mxu1 %v1613_v51  ;;  %4059 = vmatmul.mubr.msk.bf16.gmra.mxu0 %vm1847_vm2, %v1593_v55  ;;  %v4487_v19 = vpop.eup %4486 }
 0x2eb   : > { %4062 = vmatprep.mubr.msk.bf16.mxu0 %vm1847_vm2, %v1594_v8  ;;  %4121 = vmatpush3.bf16.msra.mxu0 %v4287_v48 }
 0x2ec   : > { %v4489_v20 = vpop.eup %4488  ;;  %4081 = vmatpush3.bf16.msra.mxu1 %v4283_v7  ;;  %4122 = vmatprep.subr.bf16.mxu0 %v4288_v0 }
 0x2ed   : > { %4082 = vmatprep.subr.bf16.mxu1 %v4284_v45 }
 0x2ee   : > { %v4491_v23 = vpop.eup %4490 }
 0x2ef   : > { %v4493_v31 = vpop.eup %4492  ;;  %v1614_v32 = vpack.c.bf16 %v4491_v23, %v4487_v19  ;;  %4123 = vmatpush3.bf16.msra.mxu0 %v4288_v0  ;;  %v5519_v19 = vld [vmem:[%s6333_s12] ss:$0 sm:$0xff] }
 0x2f0   : > { %v1615_v40 = vpack.c.bf16 %v4489_v20, %v4493_v31  ;;  %4083 = vmatpush3.bf16.msra.mxu1 %v4284_v45  ;;  %4124 = vmatprep.subr.bf16.mxu0 %v4289_v63 }
 0x2f1   : > { %4032 = vmatprep.mubr.bf16.mxu1 %v1614_v32  ;;  %4084 = vmatprep.subr.bf16.mxu1 %v4285_v46 }
 0x2f2   : > { %4033 = vmatmul.mubr.bf16.gmra.mxu1 %v1615_v40  ;;  %4063 = vmatmul.mubr.msk.bf16.gmra.mxu0 %vm1847_vm2, %v1595_v30 }
 0x2f3   : > { %4066 = vmatprep.mubr.msk.bf16.mxu0 %vm1847_vm2, %v1596_v35  ;;  %4125 = vmatpush3.bf16.msra.mxu0 %v4289_v63 }
 0x2f4   : > { %4085 = vmatpush3.bf16.msra.mxu1 %v4285_v46  ;;  %4126 = vmatprep.subr.bf16.mxu0 %v4290_v3 }
 0x2f7   : > { %4127 = vmatpush3.bf16.msra.mxu0 %v4290_v3 }
 0x2fa   : > { %4067 = vmatmul.mubr.msk.bf16.gmra.mxu0 %vm1847_vm2, %v1597_v42 }
 0x37a   : > { %v4006_v4 = vpop.f32.mrf.mxu0 }
 0x37c   : > { %v1714_v55 = vpop.f32.mrf.mxu0 }
 0x37e   : > { %v4007_v5 = vpop.f32.mrf.mxu0 }
 0x380   : > { %v1717_v6 = vpop.f32.mrf.mxu0 }
 0x382   : > { %v4010_v8 = vpop.f32.mrf.mxu1  ;;  %v4040_v9 = vpop.f32.mrf.mxu0 }
 0x383   : > { %v1939_v12 = vadd.f32 %v4040_v9, %v4006_v4 }
 0x384   : > { %v1730_v10 = vpop.f32.mrf.mxu1  ;;  %v1930_v51 = vpop.f32.mrf.mxu0 }
 0x385   : > { %v1931_v11 = vadd.f32 %v1930_v51, %v1714_v55  ;;  %v2066_v40 = vadd.f32 %v5519_v19, %v1939_v12 }
 0x386   : > { %v4011_v20 = vpop.f32.mrf.mxu1  ;;  %v4041_v23 = vpop.f32.mrf.mxu0 }
 0x387   : > { %v2064_v30 = vadd.f32 %v5519_v19, %v1931_v11  ;;  %v1942_v31 = vadd.f32 %v4041_v23, %v4007_v5 }
 0x388   : > { %v1733_v32 = vpop.f32.mrf.mxu1  ;;  %v1933_v35 = vpop.f32.mrf.mxu0 }
 0x389   : > { %v2067_v38 = vadd.f32 %v5519_v19, %v1942_v31  ;;  %v1934_v39 = vadd.f32 %v1933_v35, %v1717_v6  ;;  %4494 = vtanh.f32 %v2064_v30 }
 0x38a   : > { %v4014_v42 = vpop.f32.mrf.mxu1  ;;  %v4044_v43 = vpop.f32.mrf.mxu0 }
 0x38b   : > { %v2065_v44 = vadd.f32 %v5519_v19, %v1934_v39  ;;  %4496 = vtanh.f32 %v2067_v38  ;;  %v1955_v47 = vadd.f32 %v4044_v43, %v4010_v8 }
 0x38c   : > { %v1746_v7 = vpop.f32.mrf.mxu1  ;;  %v1946_v45 = vpop.f32.mrf.mxu0 }
 0x38d   : > { %4498 = vtanh.f32 %v2065_v44  ;;  %v1947_v46 = vadd.f32 %v1946_v45, %v1730_v10  ;;  %v2070_v9 = vadd.f32 %v5519_v19, %v1955_v47 }
 0x38e   : > { %4500 = vtanh.f32 %v2066_v40  ;;  %v4015_v48 = vpop.f32.mrf.mxu1  ;;  %v4045_v0 = vpop.f32.mrf.mxu0 }
 0x38f   : > { %v2068_v63 = vadd.f32 %v5519_v19, %v1947_v46  ;;  %v1958_v3 = vadd.f32 %v4045_v0, %v4011_v20 }
 0x390   : > { %v1749_v4 = vpop.f32.mrf.mxu1  ;;  %v1949_v55 = vpop.f32.mrf.mxu0 }
 0x391   : > { %v2071_v5 = vadd.f32 %v5519_v19, %v1958_v3  ;;  %v1950_v6 = vadd.f32 %v1949_v55, %v1733_v32  ;;  %4502 = vtanh.f32 %v2068_v63 }
 0x392   : > { %v4018_v51 = vpop.f32.mrf.mxu1  ;;  %v4048_v11 = vpop.f32.mrf.mxu0 }
 0x393   : > { %v2069_v12 = vadd.f32 %v5519_v19, %v1950_v6  ;;  %4504 = vtanh.f32 %v2071_v5  ;;  %v1971_v30 = vadd.f32 %v4048_v11, %v4014_v42 }
 0x394   : > { %v1762_v10 = vpop.f32.mrf.mxu1  ;;  %v1962_v8 = vpop.f32.mrf.mxu0 }
 0x395   : > { %4506 = vtanh.f32 %v2069_v12  ;;  %v1963_v23 = vadd.f32 %v1962_v8, %v1746_v7  ;;  %v2074_v47 = vadd.f32 %v5519_v19, %v1971_v30 }
 0x396   : > { %4508 = vtanh.f32 %v2070_v9  ;;  %v4019_v20 = vpop.f32.mrf.mxu1  ;;  %v4049_v31 = vpop.f32.mrf.mxu0 }
 0x397   : > { %v2072_v35 = vadd.f32 %v5519_v19, %v1963_v23  ;;  %v1974_v38 = vadd.f32 %v4049_v31, %v4015_v48  ;;  %v4495_v32 = vpop.eup %4494 }
 0x398   : > { %v1765_v39 = vpop.f32.mrf.mxu1  ;;  %v1965_v40 = vpop.f32.mrf.mxu0 }
 0x399   : > { %v4497_v43 = vpop.eup %4496  ;;  %v2075_v44 = vadd.f32 %v5519_v19, %v1974_v38  ;;  %v1966_v45 = vadd.f32 %v1965_v40, %v1749_v4  ;;  %4510 = vtanh.f32 %v2072_v35 }
 0x39a   : > { %v4499_v46 = vpop.eup %4498  ;;  %v4022_v0 = vpop.f32.mrf.mxu1 }
 0x39b   : > { %v4052_v63 = vpop.f32.mrf.mxu0  ;;  %v4501_v7 = vpop.eup %4500  ;;  %v2073_v42 = vadd.f32 %v5519_v19, %v1966_v45  ;;  %v2128_v3 = vpack.c.bf16 %v4499_v46, %v4495_v32  ;;  %4512 = vtanh.f32 %v2075_v44 }
 0x39c   : > { %v1778_v55 = vpop.f32.mrf.mxu1  ;;  %v2129_v5 = vpack.c.bf16 %v4497_v43, %v4501_v7  ;;  %v1987_v9 = vadd.f32 %v4052_v63, %v4018_v51 }
 0x39d   : > { %v1978_v48 = vpop.f32.mrf.mxu0  ;;  %4514 = vtanh.f32 %v2073_v42  ;;  %4086 = vmatprep.mubr.bf16.mxu1 %v2128_v3 }
 0x39e   : > { %v1979_v6 = vadd.f32 %v1978_v48, %v1762_v10  ;;  %4516 = vtanh.f32 %v2074_v47  ;;  %v4023_v4 = vpop.f32.mrf.mxu1  ;;  %4087 = vmatmul.mubr.bf16.vlgmr.msra.gmra.mxu1 %v2129_v5  ;;  %v4503_v23 = vpop.eup %4502  ;;  %v2078_v43 = vadd.f32 %v5519_v19, %v1987_v9 }
 0x39f   : > { %v4053_v11 = vpop.f32.mrf.mxu0 }
 0x3a0   : > { %v2076_v12 = vadd.f32 %v5519_v19, %v1979_v6  ;;  %v1990_v8 = vadd.f32 %v4053_v11, %v4019_v20  ;;  %v1781_v30 = vpop.f32.mrf.mxu1  ;;  %v4505_v35 = vpop.eup %4504 }
 0x3a1   : > { %v1981_v31 = vpop.f32.mrf.mxu0 }
 0x3a2   : > { %v2079_v38 = vadd.f32 %v5519_v19, %v1990_v8  ;;  %v1982_v32 = vadd.f32 %v1981_v31, %v1765_v39  ;;  %v4507_v40 = vpop.eup %4506  ;;  %v4026_v10 = vpop.f32.mrf.mxu1  ;;  %4518 = vtanh.f32 %v2076_v12 }
 0x3a3   : > { %v4056_v44 = vpop.f32.mrf.mxu0  ;;  %v4509_v45 = vpop.eup %4508  ;;  %v2130_v46 = vpack.c.bf16 %v4507_v40, %v4503_v23 }
 0x3a4   : > { %v2077_v51 = vadd.f32 %v5519_v19, %v1982_v32  ;;  %4520 = vtanh.f32 %v2079_v38  ;;  %v1794_v47 = vpop.f32.mrf.mxu1  ;;  %v2131_v63 = vpack.c.bf16 %v4505_v35, %v4509_v45  ;;  %v2003_v42 = vadd.f32 %v4056_v44, %v4022_v0 }
 0x3a5   : > { %v1994_v20 = vpop.f32.mrf.mxu0  ;;  %4090 = vmatprep.mubr.bf16.mxu1 %v2130_v46 }
 0x3a6   : > { %4522 = vtanh.f32 %v2077_v51  ;;  %v1995_v7 = vadd.f32 %v1994_v20, %v1778_v55  ;;  %v4027_v39 = vpop.f32.mrf.mxu1  ;;  %4091 = vmatmul.mubr.bf16.gmra.mxu1 %v2131_v63  ;;  %v4511_v6 = vpop.eup %4510  ;;  %v2082_v35 = vadd.f32 %v5519_v19, %v2003_v42 }
 0x3a7   : > { %4524 = vtanh.f32 %v2078_v43  ;;  %v4057_v3 = vpop.f32.mrf.mxu0 }
 0x3a8   : > { %v2080_v48 = vadd.f32 %v5519_v19, %v1995_v7  ;;  %v2006_v5 = vadd.f32 %v4057_v3, %v4023_v4  ;;  %v1797_v9 = vpop.f32.mrf.mxu1  ;;  %v4513_v12 = vpop.eup %4512 }
 0x3a9   : > { %v1997_v11 = vpop.f32.mrf.mxu0 }
 0x3aa   : > { %v2083_v8 = vadd.f32 %v5519_v19, %v2006_v5  ;;  %v1998_v23 = vadd.f32 %v1997_v11, %v1781_v30  ;;  %v4515_v31 = vpop.eup %4514  ;;  %v4030_v55 = vpop.f32.mrf.mxu1  ;;  %4526 = vtanh.f32 %v2080_v48 }
 0x3ab   : > { %v4060_v38 = vpop.f32.mrf.mxu0  ;;  %v4517_v32 = vpop.eup %4516  ;;  %v2132_v40 = vpack.c.bf16 %v4515_v31, %v4511_v6 }
 0x3ac   : > { %v2081_v0 = vadd.f32 %v5519_v19, %v1998_v23  ;;  %4528 = vtanh.f32 %v2083_v8  ;;  %v1810_v43 = vpop.f32.mrf.mxu1  ;;  %v2133_v44 = vpack.c.bf16 %v4513_v12, %v4517_v32  ;;  %v2019_v51 = vadd.f32 %v4060_v38, %v4026_v10 }
 0x3ad   : > { %v2010_v4 = vpop.f32.mrf.mxu0  ;;  %4094 = vmatprep.mubr.bf16.mxu1 %v2132_v40 }
 0x3ae   : > { %4530 = vtanh.f32 %v2081_v0  ;;  %v2011_v45 = vadd.f32 %v2010_v4, %v1794_v47  ;;  %v4031_v30 = vpop.f32.mrf.mxu1  ;;  %4095 = vmatmul.mubr.bf16.gmra.mxu1 %v2133_v44  ;;  %v2086_v12 = vadd.f32 %v5519_v19, %v2019_v51 }
 0x3af   : > { %4532 = vtanh.f32 %v2082_v35  ;;  %v4061_v46 = vpop.f32.mrf.mxu0  ;;  %v4519_v7 = vpop.eup %4518 }
 0x3b0   : > { %v2084_v20 = vadd.f32 %v5519_v19, %v2011_v45  ;;  %v2022_v63 = vadd.f32 %v4061_v46, %v4027_v39  ;;  %v1813_v42 = vpop.f32.mrf.mxu1 }
 0x3b1   : > { %v2013_v3 = vpop.f32.mrf.mxu0  ;;  %v4521_v48 = vpop.eup %4520 }
 0x3b2   : > { %v2087_v5 = vadd.f32 %v5519_v19, %v2022_v63  ;;  %v2014_v6 = vadd.f32 %v2013_v3, %v1797_v9  ;;  %4534 = vtanh.f32 %v2084_v20  ;;  %v4034_v31 = vpop.f32.mrf.mxu1 }
 0x3b3   : > { %v4523_v11 = vpop.eup %4522  ;;  %v4064_v47 = vpop.f32.mrf.mxu0 }
 0x3b4   : > { %v4525_v8 = vpop.eup %4524  ;;  %v2085_v10 = vadd.f32 %v5519_v19, %v2014_v6  ;;  %v2134_v23 = vpack.c.bf16 %v4523_v11, %v4519_v7  ;;  %4536 = vtanh.f32 %v2087_v5  ;;  %v2035_v32 = vadd.f32 %v4064_v47, %v4030_v55  ;;  %v1826_v44 = vpop.f32.mrf.mxu1 }
 0x3b5   : > { %v2026_v35 = vpop.f32.mrf.mxu0  ;;  %v2135_v39 = vpack.c.bf16 %v4521_v48, %v4525_v8 }
 0x3b6   : > { %4538 = vtanh.f32 %v2085_v10  ;;  %v2027_v38 = vadd.f32 %v2026_v35, %v1810_v43  ;;  %4098 = vmatprep.mubr.bf16.mxu1 %v2134_v23  ;;  %v2090_v7 = vadd.f32 %v5519_v19, %v2035_v32  ;;  %v4035_v5 = vpop.f32.mrf.mxu1 }
 0x3b7   : > { %4540 = vtanh.f32 %v2086_v12  ;;  %v4065_v0 = vpop.f32.mrf.mxu0  ;;  %4099 = vmatmul.mubr.bf16.gmra.mxu1 %v2135_v39  ;;  %v4527_v4 = vpop.eup %4526 }
 0x3b8   : > { %v2088_v9 = vadd.f32 %v5519_v19, %v2027_v38  ;;  %v2038_v40 = vadd.f32 %v4065_v0, %v4031_v30  ;;  %v1829_v23 = vpop.f32.mrf.mxu1 }
 0x3b9   : > { %v2029_v45 = vpop.f32.mrf.mxu0  ;;  %v4529_v51 = vpop.eup %4528 }
 0x3ba   : > { %v2091_v46 = vadd.f32 %v5519_v19, %v2038_v40  ;;  %v2030_v20 = vadd.f32 %v2029_v45, %v1813_v42  ;;  %4542 = vtanh.f32 %v2088_v9 }
 0x3bb   : > { %v4531_v63 = vpop.eup %4530  ;;  %v4068_v3 = vpop.f32.mrf.mxu0 }
 0x3bc   : > { %v4533_v43 = vpop.eup %4532  ;;  %v2089_v55 = vadd.f32 %v5519_v19, %v2030_v20  ;;  %v2136_v48 = vpack.c.bf16 %v4531_v63, %v4527_v4  ;;  %4544 = vtanh.f32 %v2091_v46  ;;  %v2051_v12 = vadd.f32 %v4068_v3, %v4034_v31 }
 0x3bd   : > { %v2042_v6 = vpop.f32.mrf.mxu0  ;;  %v2137_v30 = vpack.c.bf16 %v4529_v51, %v4533_v43 }
 0x3be   : > { %4546 = vtanh.f32 %v2089_v55  ;;  %v2043_v11 = vadd.f32 %v2042_v6, %v1826_v44  ;;  %4102 = vmatprep.mubr.bf16.mxu1 %v2136_v48  ;;  %v2094_v9 = vadd.f32 %v5519_v19, %v2051_v12  ;;  %v4291_v6 = vld [vmem:[%s6336_s15 + $0x10] sm:$0xff]   ;;  %v4294_v12 = vld [vmem:[%s6338_s17 + $0x38] sm:$0xff]  }
 0x3bf   : > { %4548 = vtanh.f32 %v2090_v7  ;;  %v4069_v47 = vpop.f32.mrf.mxu0  ;;  %4103 = vmatmul.mubr.bf16.gmra.mxu1 %v2137_v30  ;;  %v4535_v10 = vpop.eup %4534  ;;  %4128 = vmatprep.subr.bf16.mxu0 %v4291_v6  ;;  %v4292_v30 = vld [vmem:[%s6336_s15 + $0x8] sm:$0xff]  }
 0x3c0   : > { %v2092_v42 = vadd.f32 %v5519_v19, %v2043_v11  ;;  %v2054_v8 = vadd.f32 %v4069_v47, %v4035_v5  ;;  %4129 = vmatpush3.bf16.msra.mxu0 %v4291_v6  ;;  %v4293_v11 = vld [vmem:[%s6336_s15] sm:$0xff]   ;;  %v4295_v47 = vld [vmem:[%s6338_s17 + $0x30] sm:$0xff]   ;;  %4166 = vmatprep.subr.bf16.mxu1 %v4294_v12 }
 0x3c1   : > { %v2045_v35 = vpop.f32.mrf.mxu0  ;;  %v4537_v39 = vpop.eup %4536  ;;  %4130 = vmatprep.subr.bf16.mxu0 %v4292_v30  ;;  %4167 = vmatpush3.bf16.msra.mxu1 %v4294_v12 }
 0x3c2   : > { %v2095_v38 = vadd.f32 %v5519_v19, %v2054_v8  ;;  %v2046_v32 = vadd.f32 %v2045_v35, %v1829_v23  ;;  %4550 = vtanh.f32 %v2092_v42  ;;  %4168 = vmatprep.subr.bf16.mxu1 %v4295_v47  ;;  %v4296_v42 = vld [vmem:[%s6338_s17 + $0x28] sm:$0xff]   ;;  %v4297_v8 = vld [vmem:[%s6338_s17 + $0x20] sm:$0xff]  }
 0x3c3   : > { %v4539_v0 = vpop.eup %4538  ;;  %v5580_v35 = vld [vmem:[%s6335_s14] ss:$0 sm:$0xff] }
 0x3c4   : > { %v4541_v40 = vpop.eup %4540  ;;  %v2093_v4 = vadd.f32 %v5519_v19, %v2046_v32  ;;  %v2138_v31 = vpack.c.bf16 %v4539_v0, %v4535_v10  ;;  %4552 = vtanh.f32 %v2095_v38  ;;  %4131 = vmatpush3.bf16.msra.mxu0 %v4292_v30  ;;  %v4298_v10 = vld [vmem:[%s6338_s17 + $0x18] sm:$0xff]  }
 0x3c5   : > { %v2139_v44 = vpack.c.bf16 %v4537_v39, %v4541_v40  ;;  %4132 = vmatprep.subr.bf16.mxu0 %v4293_v11  ;;  %4169 = vmatpush3.bf16.msra.mxu1 %v4295_v47 }
 0x3c6   : > { %4554 = vtanh.f32 %v2093_v4  ;;  %4106 = vmatprep.mubr.bf16.mxu1 %v2138_v31  ;;  %4170 = vmatprep.subr.bf16.mxu1 %v4296_v42 }
 0x3c7   : > { %4556 = vtanh.f32 %v2094_v9  ;;  %4107 = vmatmul.mubr.bf16.gmra.mxu1 %v2139_v44  ;;  %v4543_v45 = vpop.eup %4542 }
 0x3c8   : > { %4133 = vmatpush3.bf16.msra.mxu0 %v4293_v11 }
 0x3c9   : > { %v4545_v51 = vpop.eup %4544  ;;  %4171 = vmatpush3.bf16.msra.mxu1 %v4296_v42 }
 0x3ca   : > { %4172 = vmatprep.subr.bf16.mxu1 %v4297_v8 }
 0x3cb   : > { %v4547_v46 = vpop.eup %4546 }
 0x3cc   : > { %v4549_v20 = vpop.eup %4548  ;;  %v2140_v63 = vpack.c.bf16 %v4547_v46, %v4543_v45 }
 0x3cd   : > { %v2141_v7 = vpack.c.bf16 %v4545_v51, %v4549_v20  ;;  %4173 = vmatpush3.bf16.msra.mxu1 %v4297_v8 }
 0x3ce   : > { %4110 = vmatprep.mubr.bf16.mxu1 %v2140_v63  ;;  %4174 = vmatprep.subr.bf16.mxu1 %v4298_v10 }
 0x3cf   : > { %4111 = vmatmul.mubr.bf16.gmra.mxu1 %v2141_v7  ;;  %v4551_v3 = vpop.eup %4550 }
 0x3d1   : > { %v4553_v43 = vpop.eup %4552  ;;  %4175 = vmatpush3.bf16.msra.mxu1 %v4298_v10 }
 0x3d3   : > { %v4555_v55 = vpop.eup %4554 }
 0x3d4   : > { %v4557_v48 = vpop.eup %4556  ;;  %v2142_v19 = vpack.c.bf16 %v4555_v55, %v4551_v3 }
 0x3d5   : > { %v2143_v5 = vpack.c.bf16 %v4553_v43, %v4557_v48 }
 0x3d6   : > { %4114 = vmatprep.mubr.bf16.mxu1 %v2142_v19 }
 0x3d7   : > { %4115 = vmatmul.mubr.bf16.gmra.mxu1 %v2143_v5 }
 0x45e   : > { %v4088_v23 = vpop.f32.mrf.mxu1 }
 0x45f   : > { %v2258_v9 = vadd.f32 %v4088_v23, %v5580_v35 }
 0x460   : > { %v2249_v39 = vpop.f32.mrf.mxu1 }
 0x461   : > { %v2250_v38 = vadd.f32 %v5580_v35, %v2249_v39 }
 0x462   : > { %v4089_v32 = vpop.f32.mrf.mxu1 }
 0x463   : > { %v2261_v0 = vadd.f32 %v4089_v32, %v5580_v35  ;;  %4558 = vtanh.f32 %v2250_v38 }
 0x464   : > { %v2252_v40 = vpop.f32.mrf.mxu1 }
 0x465   : > { %v2253_v4 = vadd.f32 %v5580_v35, %v2252_v40  ;;  %4560 = vtanh.f32 %v2261_v0 }
 0x466   : > { %v4092_v31 = vpop.f32.mrf.mxu1 }
 0x467   : > { %4562 = vtanh.f32 %v2253_v4  ;;  %v2274_v20 = vadd.f32 %v4092_v31, %v5580_v35 }
 0x468   : > { %4564 = vtanh.f32 %v2258_v9  ;;  %v2265_v44 = vpop.f32.mrf.mxu1 }
 0x469   : > { %v2266_v45 = vadd.f32 %v5580_v35, %v2265_v44 }
 0x46a   : > { %v4093_v51 = vpop.f32.mrf.mxu1 }
 0x46b   : > { %v2277_v46 = vadd.f32 %v4093_v51, %v5580_v35  ;;  %4566 = vtanh.f32 %v2266_v45 }
 0x46c   : > { %v2268_v63 = vpop.f32.mrf.mxu1 }
 0x46d   : > { %v2269_v7 = vadd.f32 %v5580_v35, %v2268_v63  ;;  %4568 = vtanh.f32 %v2277_v46 }
 0x46e   : > { %v4096_v3 = vpop.f32.mrf.mxu1 }
 0x46f   : > { %4570 = vtanh.f32 %v2269_v7  ;;  %v2290_v11 = vadd.f32 %v4096_v3, %v5580_v35 }
 0x470   : > { %4572 = vtanh.f32 %v2274_v20  ;;  %v2281_v43 = vpop.f32.mrf.mxu1  ;;  %v4559_v48 = vpop.eup %4558 }
 0x471   : > { %v2282_v55 = vadd.f32 %v5580_v35, %v2281_v43 }
 0x472   : > { %v4097_v19 = vpop.f32.mrf.mxu1  ;;  %v4561_v5 = vpop.eup %4560 }
 0x473   : > { %v2293_v6 = vadd.f32 %v4097_v19, %v5580_v35  ;;  %4574 = vtanh.f32 %v2282_v55 }
 0x474   : > { %v4563_v30 = vpop.eup %4562  ;;  %v2284_v12 = vpop.f32.mrf.mxu1 }
 0x475   : > { %v4565_v47 = vpop.eup %4564  ;;  %v2285_v42 = vadd.f32 %v5580_v35, %v2284_v12  ;;  %v2408_v8 = vpack.c.bf16 %v4563_v30, %v4559_v48  ;;  %4576 = vtanh.f32 %v2293_v6 }
 0x476   : > { %v2409_v23 = vpack.c.bf16 %v4561_v5, %v4565_v47 }
 0x477   : > { %v4100_v10 = vpop.f32.mrf.mxu1  ;;  %4578 = vtanh.f32 %v2285_v42  ;;  %4134 = vmatprep.mubr.bf16.mxu0 %v2408_v8 }
 0x478   : > { %4580 = vtanh.f32 %v2290_v11  ;;  %4135 = vmatmul.mubr.bf16.vlgmr.msra.gmra.mxu0 %v2409_v23  ;;  %v4567_v32 = vpop.eup %4566  ;;  %v2306_v31 = vadd.f32 %v4100_v10, %v5580_v35 }
 0x479   : > { %v2297_v39 = vpop.f32.mrf.mxu1 }
 0x47a   : > { %v2298_v38 = vadd.f32 %v5580_v35, %v2297_v39  ;;  %v4569_v9 = vpop.eup %4568 }
 0x47b   : > { %v4101_v0 = vpop.f32.mrf.mxu1 }
 0x47c   : > { %v2309_v40 = vadd.f32 %v4101_v0, %v5580_v35  ;;  %v4571_v4 = vpop.eup %4570  ;;  %4582 = vtanh.f32 %v2298_v38 }
 0x47d   : > { %v2300_v44 = vpop.f32.mrf.mxu1  ;;  %v4573_v45 = vpop.eup %4572  ;;  %v2410_v46 = vpack.c.bf16 %v4571_v4, %v4567_v32 }
 0x47e   : > { %v2301_v51 = vadd.f32 %v5580_v35, %v2300_v44  ;;  %4584 = vtanh.f32 %v2309_v40  ;;  %v2411_v63 = vpack.c.bf16 %v4569_v9, %v4573_v45 }
 0x47f   : > { %v4104_v20 = vpop.f32.mrf.mxu1  ;;  %4138 = vmatprep.mubr.bf16.mxu0 %v2410_v46 }
 0x480   : > { %4586 = vtanh.f32 %v2301_v51  ;;  %4139 = vmatmul.mubr.bf16.gmra.mxu0 %v2411_v63  ;;  %v4575_v43 = vpop.eup %4574  ;;  %v2322_v6 = vadd.f32 %v4104_v20, %v5580_v35 }
 0x481   : > { %4588 = vtanh.f32 %v2306_v31  ;;  %v2313_v7 = vpop.f32.mrf.mxu1 }
 0x482   : > { %v2314_v3 = vadd.f32 %v5580_v35, %v2313_v7  ;;  %v4577_v48 = vpop.eup %4576 }
 0x483   : > { %v4105_v55 = vpop.f32.mrf.mxu1 }
 0x484   : > { %v2325_v19 = vadd.f32 %v4105_v55, %v5580_v35  ;;  %v4579_v5 = vpop.eup %4578  ;;  %4590 = vtanh.f32 %v2314_v3 }
 0x485   : > { %v2316_v30 = vpop.f32.mrf.mxu1  ;;  %v4581_v11 = vpop.eup %4580  ;;  %v2412_v47 = vpack.c.bf16 %v4579_v5, %v4575_v43 }
 0x486   : > { %v2317_v12 = vadd.f32 %v5580_v35, %v2316_v30  ;;  %4592 = vtanh.f32 %v2325_v19  ;;  %v2413_v8 = vpack.c.bf16 %v4577_v48, %v4581_v11 }
 0x487   : > { %v4108_v42 = vpop.f32.mrf.mxu1  ;;  %4142 = vmatprep.mubr.bf16.mxu0 %v2412_v47 }
 0x488   : > { %4594 = vtanh.f32 %v2317_v12  ;;  %4143 = vmatmul.mubr.bf16.gmra.mxu0 %v2413_v8  ;;  %v2338_v40 = vadd.f32 %v4108_v42, %v5580_v35 }
 0x489   : > { %4596 = vtanh.f32 %v2322_v6  ;;  %v2329_v10 = vpop.f32.mrf.mxu1  ;;  %v4583_v39 = vpop.eup %4582 }
 0x48a   : > { %v2330_v23 = vadd.f32 %v5580_v35, %v2329_v10 }
 0x48b   : > { %v4109_v38 = vpop.f32.mrf.mxu1  ;;  %v4585_v32 = vpop.eup %4584 }
 0x48c   : > { %v2341_v0 = vadd.f32 %v4109_v38, %v5580_v35  ;;  %4598 = vtanh.f32 %v2330_v23 }
 0x48d   : > { %v4587_v9 = vpop.eup %4586  ;;  %v2332_v4 = vpop.f32.mrf.mxu1 }
 0x48e   : > { %v4589_v31 = vpop.eup %4588  ;;  %v2333_v44 = vadd.f32 %v5580_v35, %v2332_v4  ;;  %v2414_v45 = vpack.c.bf16 %v4587_v9, %v4583_v39  ;;  %4600 = vtanh.f32 %v2341_v0 }
 0x48f   : > { %v4112_v51 = vpop.f32.mrf.mxu1  ;;  %v2415_v46 = vpack.c.bf16 %v4585_v32, %v4589_v31 }
 0x490   : > { %4602 = vtanh.f32 %v2333_v44  ;;  %4146 = vmatprep.mubr.bf16.mxu0 %v2414_v45  ;;  %v2354_v19 = vadd.f32 %v4112_v51, %v5580_v35 }
 0x491   : > { %4604 = vtanh.f32 %v2338_v40  ;;  %v2345_v20 = vpop.f32.mrf.mxu1  ;;  %4147 = vmatmul.mubr.bf16.gmra.mxu0 %v2415_v46  ;;  %v4591_v7 = vpop.eup %4590 }
 0x492   : > { %v2346_v63 = vadd.f32 %v5580_v35, %v2345_v20 }
 0x493   : > { %v4113_v3 = vpop.f32.mrf.mxu1  ;;  %v4593_v43 = vpop.eup %4592 }
 0x494   : > { %v2357_v55 = vadd.f32 %v4113_v3, %v5580_v35  ;;  %4606 = vtanh.f32 %v2346_v63 }
 0x495   : > { %v4595_v48 = vpop.eup %4594  ;;  %v2348_v5 = vpop.f32.mrf.mxu1 }
 0x496   : > { %v4597_v6 = vpop.eup %4596  ;;  %v2349_v30 = vadd.f32 %v5580_v35, %v2348_v5  ;;  %v2416_v11 = vpack.c.bf16 %v4595_v48, %v4591_v7  ;;  %4608 = vtanh.f32 %v2357_v55  ;;  %v4299_v5 = vld [vmem:[%s6338_s17 + $0x10] sm:$0xff]  }
 0x497   : > { %v4116_v12 = vpop.f32.mrf.mxu1  ;;  %v2417_v47 = vpack.c.bf16 %v4593_v43, %v4597_v6  ;;  %4176 = vmatprep.subr.bf16.mxu1 %v4299_v5  ;;  %v4300_v6 = vld [vmem:[%s6338_s17 + $0x8] sm:$0xff]  }
 0x498   : > { %4610 = vtanh.f32 %v2349_v30  ;;  %4150 = vmatprep.mubr.bf16.mxu0 %v2416_v11  ;;  %v2370_v0 = vadd.f32 %v4116_v12, %v5580_v35  ;;  %4177 = vmatpush3.bf16.msra.mxu1 %v4299_v5  ;;  %v4301_v30 = vld [vmem:[%s6338_s17] sm:$0xff]  }
 0x499   : > { %4612 = vtanh.f32 %v2354_v19  ;;  %v2361_v42 = vpop.f32.mrf.mxu1  ;;  %4151 = vmatmul.mubr.bf16.gmra.mxu0 %v2417_v47  ;;  %v4599_v10 = vpop.eup %4598  ;;  %4178 = vmatprep.subr.bf16.mxu1 %v4300_v6  ;;  %v5627_v12 = vld [vmem:[%s6337_s16] ss:$0 sm:$0xff] }
 0x49a   : > { %v2362_v8 = vadd.f32 %v5580_v35, %v2361_v42 }
 0x49b   : > { %v4117_v23 = vpop.f32.mrf.mxu1  ;;  %v4601_v39 = vpop.eup %4600 }
 0x49c   : > { %v2373_v38 = vadd.f32 %v4117_v23, %v5580_v35  ;;  %4614 = vtanh.f32 %v2362_v8  ;;  %4179 = vmatpush3.bf16.msra.mxu1 %v4300_v6 }
 0x49d   : > { %v4603_v32 = vpop.eup %4602  ;;  %v2364_v9 = vpop.f32.mrf.mxu1  ;;  %4180 = vmatprep.subr.bf16.mxu1 %v4301_v30 }
 0x49e   : > { %v4605_v40 = vpop.eup %4604  ;;  %v2365_v4 = vadd.f32 %v5580_v35, %v2364_v9  ;;  %v2418_v31 = vpack.c.bf16 %v4603_v32, %v4599_v10  ;;  %4616 = vtanh.f32 %v2373_v38 }
 0x49f   : > { %v2419_v44 = vpack.c.bf16 %v4601_v39, %v4605_v40 }
 0x4a0   : > { %4618 = vtanh.f32 %v2365_v4  ;;  %4154 = vmatprep.mubr.bf16.mxu0 %v2418_v31  ;;  %4181 = vmatpush3.bf16.msra.mxu1 %v4301_v30 }
 0x4a1   : > { %4620 = vtanh.f32 %v2370_v0  ;;  %4155 = vmatmul.mubr.bf16.gmra.mxu0 %v2419_v44  ;;  %v4607_v45 = vpop.eup %4606 }
 0x4a3   : > { %v4609_v51 = vpop.eup %4608 }
 0x4a5   : > { %v4611_v46 = vpop.eup %4610 }
 0x4a6   : > { %v4613_v20 = vpop.eup %4612  ;;  %v2420_v63 = vpack.c.bf16 %v4611_v46, %v4607_v45 }
 0x4a7   : > { %v2421_v7 = vpack.c.bf16 %v4609_v51, %v4613_v20 }
 0x4a8   : > { %4158 = vmatprep.mubr.bf16.mxu0 %v2420_v63 }
 0x4a9   : > { %4159 = vmatmul.mubr.bf16.gmra.mxu0 %v2421_v7  ;;  %v4615_v3 = vpop.eup %4614 }
 0x4ab   : > { %v4617_v43 = vpop.eup %4616 }
 0x4ad   : > { %v4619_v55 = vpop.eup %4618 }
 0x4ae   : > { %v4621_v48 = vpop.eup %4620  ;;  %v2422_v35 = vpack.c.bf16 %v4619_v55, %v4615_v3 }
 0x4af   : > { %v2423_v19 = vpack.c.bf16 %v4617_v43, %v4621_v48 }
 0x4b0   : > { %4162 = vmatprep.mubr.bf16.mxu0 %v2422_v35 }
 0x4b1   : > { %4163 = vmatmul.mubr.bf16.gmra.mxu0 %v2423_v19 }
 0x538   : > { %v4136_v11 = vpop.f32.mrf.mxu0 }
 0x539   : > { %v2538_v23 = vadd.f32 %v4136_v11, %v5627_v12 }
 0x53a   : > { %v2529_v47 = vpop.f32.mrf.mxu0 }
 0x53b   : > { %v2530_v42 = vadd.f32 %v5627_v12, %v2529_v47 }
 0x53c   : > { %v4137_v8 = vpop.f32.mrf.mxu0 }
 0x53d   : > { %v2541_v10 = vadd.f32 %v4137_v8, %v5627_v12  ;;  %4622 = vtanh.f32 %v2530_v42 }
 0x53e   : > { %v2532_v39 = vpop.f32.mrf.mxu0 }
 0x53f   : > { %v2533_v38 = vadd.f32 %v5627_v12, %v2532_v39  ;;  %4624 = vtanh.f32 %v2541_v10 }
 0x540   : > { %v4140_v32 = vpop.f32.mrf.mxu0 }
 0x541   : > { %4626 = vtanh.f32 %v2533_v38  ;;  %v2554_v31 = vadd.f32 %v4140_v32, %v5627_v12 }
 0x542   : > { %4628 = vtanh.f32 %v2538_v23  ;;  %v2545_v0 = vpop.f32.mrf.mxu0 }
 0x543   : > { %v2546_v9 = vadd.f32 %v5627_v12, %v2545_v0 }
 0x544   : > { %v4141_v40 = vpop.f32.mrf.mxu0 }
 0x545   : > { %v2557_v4 = vadd.f32 %v4141_v40, %v5627_v12  ;;  %4630 = vtanh.f32 %v2546_v9 }
 0x546   : > { %v2548_v44 = vpop.f32.mrf.mxu0 }
 0x547   : > { %v2549_v45 = vadd.f32 %v5627_v12, %v2548_v44  ;;  %4632 = vtanh.f32 %v2557_v4 }
 0x548   : > { %v4144_v51 = vpop.f32.mrf.mxu0 }
 0x549   : > { %4634 = vtanh.f32 %v2549_v45  ;;  %v2570_v48 = vadd.f32 %v4144_v51, %v5627_v12 }
 0x54a   : > { %4636 = vtanh.f32 %v2554_v31  ;;  %v2561_v46 = vpop.f32.mrf.mxu0  ;;  %v4623_v63 = vpop.eup %4622 }
 0x54b   : > { %v2562_v20 = vadd.f32 %v5627_v12, %v2561_v46 }
 0x54c   : > { %v4145_v7 = vpop.f32.mrf.mxu0  ;;  %v4625_v3 = vpop.eup %4624 }
 0x54d   : > { %v2573_v43 = vadd.f32 %v4145_v7, %v5627_v12  ;;  %4638 = vtanh.f32 %v2562_v20 }
 0x54e   : > { %v4627_v55 = vpop.eup %4626  ;;  %v2564_v35 = vpop.f32.mrf.mxu0 }
 0x54f   : > { %v4629_v19 = vpop.eup %4628  ;;  %v2565_v5 = vadd.f32 %v5627_v12, %v2564_v35  ;;  %v2689_v6 = vpack.c.bf16 %v4627_v55, %v4623_v63  ;;  %4640 = vtanh.f32 %v2573_v43 }
 0x550   : > { %v2690_v11 = vpack.c.bf16 %v4625_v3, %v4629_v19 }
 0x551   : > { %v4148_v30 = vpop.f32.mrf.mxu0  ;;  %4642 = vtanh.f32 %v2565_v5  ;;  %4182 = vmatprep.mubr.bf16.mxu1 %v2689_v6 }
 0x552   : > { %4644 = vtanh.f32 %v2570_v48  ;;  %4183 = vmatmul.mubr.bf16.vlgmr.msra.gmra.mxu1 %v2690_v11  ;;  %v4631_v8 = vpop.eup %4630  ;;  %v2586_v32 = vadd.f32 %v4148_v30, %v5627_v12 }
 0x553   : > { %v2577_v47 = vpop.f32.mrf.mxu0 }
 0x554   : > { %v2578_v42 = vadd.f32 %v5627_v12, %v2577_v47  ;;  %v4633_v23 = vpop.eup %4632 }
 0x555   : > { %v4149_v10 = vpop.f32.mrf.mxu0 }
 0x556   : > { %v2589_v39 = vadd.f32 %v4149_v10, %v5627_v12  ;;  %v4635_v38 = vpop.eup %4634  ;;  %4646 = vtanh.f32 %v2578_v42 }
 0x557   : > { %v2580_v0 = vpop.f32.mrf.mxu0  ;;  %v4637_v9 = vpop.eup %4636  ;;  %v2691_v4 = vpack.c.bf16 %v4635_v38, %v4631_v8 }
 0x558   : > { %v2581_v40 = vadd.f32 %v5627_v12, %v2580_v0  ;;  %4648 = vtanh.f32 %v2589_v39  ;;  %v2692_v44 = vpack.c.bf16 %v4633_v23, %v4637_v9 }
 0x559   : > { %v4152_v31 = vpop.f32.mrf.mxu0  ;;  %4186 = vmatprep.mubr.bf16.mxu1 %v2691_v4 }
 0x55a   : > { %4650 = vtanh.f32 %v2581_v40  ;;  %4187 = vmatmul.mubr.bf16.gmra.mxu1 %v2692_v44  ;;  %v4639_v46 = vpop.eup %4638  ;;  %v2602_v43 = vadd.f32 %v4152_v31, %v5627_v12 }
 0x55b   : > { %4652 = vtanh.f32 %v2586_v32  ;;  %v2593_v45 = vpop.f32.mrf.mxu0 }
 0x55c   : > { %v2594_v51 = vadd.f32 %v5627_v12, %v2593_v45  ;;  %v4641_v63 = vpop.eup %4640 }
 0x55d   : > { %v4153_v20 = vpop.f32.mrf.mxu0 }
 0x55e   : > { %v2605_v7 = vadd.f32 %v4153_v20, %v5627_v12  ;;  %v4643_v3 = vpop.eup %4642  ;;  %4654 = vtanh.f32 %v2594_v51 }
 0x55f   : > { %v2596_v55 = vpop.f32.mrf.mxu0  ;;  %v4645_v48 = vpop.eup %4644  ;;  %v2693_v19 = vpack.c.bf16 %v4643_v3, %v4639_v46 }
 0x560   : > { %v2597_v35 = vadd.f32 %v5627_v12, %v2596_v55  ;;  %4656 = vtanh.f32 %v2605_v7  ;;  %v2694_v6 = vpack.c.bf16 %v4641_v63, %v4645_v48 }
 0x561   : > { %v4156_v5 = vpop.f32.mrf.mxu0  ;;  %4190 = vmatprep.mubr.bf16.mxu1 %v2693_v19 }
 0x562   : > { %4658 = vtanh.f32 %v2597_v35  ;;  %4191 = vmatmul.mubr.bf16.gmra.mxu1 %v2694_v6  ;;  %v2618_v39 = vadd.f32 %v4156_v5, %v5627_v12 }
 0x563   : > { %4660 = vtanh.f32 %v2602_v43  ;;  %v2609_v30 = vpop.f32.mrf.mxu0  ;;  %v4647_v47 = vpop.eup %4646 }
 0x564   : > { %v2610_v11 = vadd.f32 %v5627_v12, %v2609_v30 }
 0x565   : > { %v4157_v42 = vpop.f32.mrf.mxu0  ;;  %v4649_v8 = vpop.eup %4648 }
 0x566   : > { %v2621_v10 = vadd.f32 %v4157_v42, %v5627_v12  ;;  %4662 = vtanh.f32 %v2610_v11 }
 0x567   : > { %v4651_v23 = vpop.eup %4650  ;;  %v2612_v38 = vpop.f32.mrf.mxu0 }
 0x568   : > { %v4653_v32 = vpop.eup %4652  ;;  %v2613_v0 = vadd.f32 %v5627_v12, %v2612_v38  ;;  %v2695_v9 = vpack.c.bf16 %v4651_v23, %v4647_v47  ;;  %4664 = vtanh.f32 %v2621_v10 }
 0x569   : > { %v4160_v40 = vpop.f32.mrf.mxu0  ;;  %v2696_v4 = vpack.c.bf16 %v4649_v8, %v4653_v32 }
 0x56a   : > { %4666 = vtanh.f32 %v2613_v0  ;;  %4194 = vmatprep.mubr.bf16.mxu1 %v2695_v9  ;;  %v2634_v7 = vadd.f32 %v4160_v40, %v5627_v12 }
 0x56b   : > { %4668 = vtanh.f32 %v2618_v39  ;;  %v2625_v31 = vpop.f32.mrf.mxu0  ;;  %4195 = vmatmul.mubr.bf16.gmra.mxu1 %v2696_v4  ;;  %v4655_v45 = vpop.eup %4654 }
 0x56c   : > { %v2626_v44 = vadd.f32 %v5627_v12, %v2625_v31 }
 0x56d   : > { %v4161_v51 = vpop.f32.mrf.mxu0  ;;  %v4657_v46 = vpop.eup %4656 }
 0x56e   : > { %v2637_v20 = vadd.f32 %v4161_v51, %v5627_v12  ;;  %4670 = vtanh.f32 %v2626_v44 }
 0x56f   : > { %v4659_v63 = vpop.eup %4658  ;;  %v2628_v3 = vpop.f32.mrf.mxu0 }
 0x570   : > { %v4661_v43 = vpop.eup %4660  ;;  %v2629_v55 = vadd.f32 %v5627_v12, %v2628_v3  ;;  %v2697_v48 = vpack.c.bf16 %v4659_v63, %v4655_v45  ;;  %4672 = vtanh.f32 %v2637_v20  ;;  %v5664_v3 = vld [vmem:[%s6339_s18] ss:$0 sm:$0xff] }
 0x571   : > { %v4164_v35 = vpop.f32.mrf.mxu0  ;;  %v2698_v19 = vpack.c.bf16 %v4657_v46, %v4661_v43 }
 0x572   : > { %4674 = vtanh.f32 %v2629_v55  ;;  %4198 = vmatprep.mubr.bf16.mxu1 %v2697_v48  ;;  %v2650_v10 = vadd.f32 %v4164_v35, %v5627_v12  ;;  %v5666_v55 = vpop.permute.xlu0 %2975 }
 0x573   : > { %4676 = vtanh.f32 %v2634_v7  ;;  %v2641_v5 = vpop.f32.mrf.mxu0  ;;  %4199 = vmatmul.mubr.bf16.gmra.mxu1 %v2698_v19  ;;  %v4663_v30 = vpop.eup %4662  ;;  %v5671_v19 = vstv %s3677_s25 }
 0x574   : > { %v2642_v6 = vadd.f32 %v5627_v12, %v2641_v5 }
 0x575   : > { %v4165_v11 = vpop.f32.mrf.mxu0  ;;  %v4665_v47 = vpop.eup %4664 }
 0x576   : > { %v2653_v42 = vadd.f32 %v4165_v11, %v5627_v12  ;;  %4678 = vtanh.f32 %v2642_v6 }
 0x577   : > { %v4667_v8 = vpop.eup %4666  ;;  %v2644_v23 = vpop.f32.mrf.mxu0 }
 0x578   : > { %v4669_v39 = vpop.eup %4668  ;;  %v2645_v38 = vadd.f32 %v5627_v12, %v2644_v23  ;;  %v2699_v32 = vpack.c.bf16 %v4667_v8, %v4663_v30  ;;  %4680 = vtanh.f32 %v2653_v42 }
 0x579   : > { %v2700_v0 = vpack.c.bf16 %v4665_v47, %v4669_v39 }
 0x57a   : > { %4682 = vtanh.f32 %v2645_v38  ;;  %4202 = vmatprep.mubr.bf16.mxu1 %v2699_v32 }
 0x57b   : > { %4684 = vtanh.f32 %v2650_v10  ;;  %4203 = vmatmul.mubr.bf16.gmra.mxu1 %v2700_v0  ;;  %v4671_v9 = vpop.eup %4670 }
 0x57d   : > { %v4673_v40 = vpop.eup %4672 }
 0x57f   : > { %v4675_v4 = vpop.eup %4674 }
 0x580   : > { %v4677_v31 = vpop.eup %4676  ;;  %v2701_v44 = vpack.c.bf16 %v4675_v4, %v4671_v9 }
 0x581   : > { %v2702_v45 = vpack.c.bf16 %v4673_v40, %v4677_v31 }
 0x582   : > { %4206 = vmatprep.mubr.bf16.mxu1 %v2701_v44 }
 0x583   : > { %4207 = vmatmul.mubr.bf16.gmra.mxu1 %v2702_v45  ;;  %v4679_v51 = vpop.eup %4678 }
 0x585   : > { %v4681_v46 = vpop.eup %4680 }
 0x587   : > { %v4683_v20 = vpop.eup %4682 }
 0x588   : > { %v4685_v63 = vpop.eup %4684  ;;  %v2703_v12 = vpack.c.bf16 %v4683_v20, %v4679_v51 }
 0x589   : > { %v2704_v7 = vpack.c.bf16 %v4681_v46, %v4685_v63 }
 0x58a   : > { %4210 = vmatprep.mubr.bf16.mxu1 %v2703_v12 }
 0x58b   : > { %4211 = vmatmul.mubr.bf16.gmra.mxu1 %v2704_v7 }
 0x612   : > { %v4184_v43 = vpop.f32.mrf.mxu1 }
 0x613   : > { %v5669_v48 = vadd.f32 %v4184_v43, %v5664_v3 }
 0x614   : > { %v2810_v35 = vpop.f32.mrf.mxu1 }
 0x615   : > { %v5674_v5 = vadd.f32 %v5664_v3, %v2810_v35  ;;  %v2980_v6 = vmul.f32 %v5666_v55, %v5669_v48 }
 0x616   : > { %v4185_v30 = vpop.f32.mrf.mxu1 }
 0x617   : > { %v2978_v11 = vmul.f32 %v5666_v55, %v5674_v5  ;;  %v5681_v47 = vadd.f32 %v4185_v30, %v5664_v3  ;;  %v3015_v42 = vmul.f32 %v5671_v19, %v2980_v6 }
 0x618   : > { %v2813_v8 = vpop.f32.mrf.mxu1 }
 0x619   : > { %v3013_v10 = vmul.f32 %v5671_v19, %v2978_v11  ;;  %v2981_v23 = vmul.f32 %v5666_v55, %v5681_v47  ;;  %v5688_v39 = vadd.f32 %v5664_v3, %v2813_v8  ;;  %4686 = vtanh.f32 %v3015_v42 }
 0x61a   : > { %v4188_v38 = vpop.f32.mrf.mxu1  ;;  %v5720_v8 = vstv %s3010_s27 }
 0x61b   : > { %4688 = vtanh.f32 %v3013_v10  ;;  %v3016_v32 = vmul.f32 %v5671_v19, %v2981_v23  ;;  %v2979_v0 = vmul.f32 %v5666_v55, %v5688_v39  ;;  %v5694_v9 = vadd.f32 %v4188_v38, %v5664_v3 }
 0x61c   : > { %v2826_v40 = vpop.f32.mrf.mxu1 }
 0x61d   : > { %4690 = vtanh.f32 %v3016_v32  ;;  %v3014_v4 = vmul.f32 %v5671_v19, %v2979_v0  ;;  %v5698_v31 = vadd.f32 %v5664_v3, %v2826_v40  ;;  %v2984_v44 = vmul.f32 %v5666_v55, %v5694_v9 }
 0x61e   : > { %v4189_v45 = vpop.f32.mrf.mxu1 }
 0x61f   : > { %4692 = vtanh.f32 %v3014_v4  ;;  %v2982_v51 = vmul.f32 %v5666_v55, %v5698_v31  ;;  %v5705_v46 = vadd.f32 %v4189_v45, %v5664_v3  ;;  %v3019_v20 = vmul.f32 %v5671_v19, %v2984_v44 }
 0x620   : > { %v2829_v63 = vpop.f32.mrf.mxu1 }
 0x621   : > { %v3017_v12 = vmul.f32 %v5671_v19, %v2982_v51  ;;  %v2985_v7 = vmul.f32 %v5666_v55, %v5705_v46  ;;  %v5712_v43 = vadd.f32 %v5664_v3, %v2829_v63  ;;  %4694 = vtanh.f32 %v3019_v20 }
 0x622   : > { %v4192_v35 = vpop.f32.mrf.mxu1 }
 0x623   : > { %4696 = vtanh.f32 %v3017_v12  ;;  %v3020_v6 = vmul.f32 %v5671_v19, %v2985_v7  ;;  %v2983_v30 = vmul.f32 %v5666_v55, %v5712_v43  ;;  %v5718_v11 = vadd.f32 %v4192_v35, %v5664_v3 }
 0x624   : > { %v2842_v42 = vpop.f32.mrf.mxu1 }
 0x625   : > { %4698 = vtanh.f32 %v3020_v6  ;;  %v3018_v10 = vmul.f32 %v5671_v19, %v2983_v30  ;;  %v5724_v23 = vadd.f32 %v5664_v3, %v2842_v42  ;;  %v2988_v38 = vmul.f32 %v5666_v55, %v5718_v11 }
 0x626   : > { %v4193_v32 = vpop.f32.mrf.mxu1  ;;  %v4687_v0 = vpop.eup %4686 }
 0x627   : > { %4700 = vtanh.f32 %v3018_v10  ;;  %v2986_v40 = vmul.f32 %v5666_v55, %v5724_v23  ;;  %v5731_v4 = vadd.f32 %v4193_v32, %v5664_v3  ;;  %v3023_v45 = vmul.f32 %v5671_v19, %v2988_v38 }
 0x628   : > { %v4689_v44 = vpop.eup %4688  ;;  %v2845_v51 = vpop.f32.mrf.mxu1  ;;  %v5735_v20 = vmul.f32 %v4687_v0, %v5720_v8 }
 0x629   : > { %v5738_v63 = vmul.f32 %v4689_v44, %v5720_v8  ;;  %v3021_v12 = vmul.f32 %v5671_v19, %v2986_v40  ;;  %v2989_v7 = vmul.f32 %v5666_v55, %v5731_v4  ;;  %4702 = vtanh.f32 %v3023_v45 }
 0x62a   : > { %v4691_v35 = vpop.eup %4690  ;;  %v5744_v6 = vadd.f32 %v5664_v3, %v2845_v51  ;;  %v3114_v42 = vmul.f32 1.442695, %v5735_v20 }
 0x62b   : > { %v4196_v30 = vpop.f32.mrf.mxu1  ;;  %v3110_v10 = vmul.f32 1.442695, %v5738_v63  ;;  %v5749_v38 = vmul.f32 %v4691_v35, %v5720_v8  ;;  %4704 = vtanh.f32 %v3021_v12  ;;  %v3024_v32 = vmul.f32 %v5671_v19, %v2989_v7 }
 0x62c   : > { %v4693_v0 = vpop.eup %4692  ;;  %v2987_v40 = vmul.f32 %v5666_v55, %v5744_v6  ;;  %v5755_v44 = vadd.f32 %v4196_v30, %v5664_v3  ;;  %4706 = vpow2.f32 %v3114_v42 }
 0x62d   : > { %v2858_v45 = vpop.f32.mrf.mxu1  ;;  %4708 = vpow2.f32 %v3110_v10  ;;  %v3116_v51 = vmul.f32 1.442695, %v5749_v38  ;;  %v5759_v41 = vmul.f32 %v4693_v0, %v5720_v8 }
 0x62e   : > { %v5762_v35 = vadd.f32 %v5664_v3, %v2858_v45  ;;  %4710 = vtanh.f32 %v3024_v32  ;;  %v3022_v12 = vmul.f32 %v5671_v19, %v2987_v40  ;;  %v2992_v7 = vmul.f32 %v5666_v55, %v5755_v44  ;;  %v4695_v30 = vpop.eup %4694 }
 0x62f   : > { %v4197_v18 = vpop.f32.mrf.mxu1  ;;  %4712 = vpow2.f32 %v3116_v51  ;;  %v3112_v42 = vmul.f32 1.442695, %v5759_v41  ;;  %v5771_v0 = vmul.f32 %v4695_v30, %v5720_v8 }
 0x630   : > { %v2990_v10 = vmul.f32 %v5666_v55, %v5762_v35  ;;  %v4697_v57 = vpop.eup %4696  ;;  %4714 = vtanh.f32 %v3022_v12  ;;  %v3027_v32 = vmul.f32 %v5671_v19, %v2992_v7  ;;  %v5775_v40 = vadd.f32 %v4197_v18, %v5664_v3 }
 0x631   : > { %v2861_v45 = vpop.f32.mrf.mxu1  ;;  %4716 = vpow2.f32 %v3112_v42  ;;  %v5778_v17 = vmul.f32 %v4697_v57, %v5720_v8  ;;  %v3122_v30 = vmul.f32 1.442695, %v5771_v0 }
 0x632   : > { %v3025_v51 = vmul.f32 %v5671_v19, %v2990_v10  ;;  %v5782_v54 = vadd.f32 %v5664_v3, %v2861_v45  ;;  %v4699_v58 = vpop.eup %4698  ;;  %4718 = vtanh.f32 %v3027_v32  ;;  %v2993_v12 = vmul.f32 %v5666_v55, %v5775_v40 }
 0x633   : > { %v4200_v7 = vpop.f32.mrf.mxu1  ;;  %v3118_v18 = vmul.f32 1.442695, %v5778_v17  ;;  %v5789_v42 = vmul.f32 %v4699_v58, %v5720_v8 }
 0x634   : > { %4720 = vtanh.f32 %v3025_v51  ;;  %v4701_v57 = vpop.eup %4700  ;;  %v3028_v10 = vmul.f32 %v5671_v19, %v2993_v12  ;;  %v2991_v45 = vmul.f32 %v5666_v55, %v5782_v54  ;;  %v5795_v16 = vadd.f32 %v4200_v7, %v5664_v3 }
 0x635   : > { %4722 = vpow2.f32 %v3122_v30  ;;  %v2874_v32 = vpop.f32.mrf.mxu1  ;;  %v3124_v15 = vmul.f32 1.442695, %v5789_v42  ;;  %v5799_v29 = vmul.f32 %v4701_v57, %v5720_v8 }
 0x636   : > { %6419 = vst [vmem:[#allocation24_spill] sm:$0xff] %v5795_v16  ;;  %4724 = vpow2.f32 %v3118_v18  ;;  %v5802_v58 = vadd.f32 %v5664_v3, %v2874_v32  ;;  %v3026_v51 = vmul.f32 %v5671_v19, %v2991_v45  ;;  %v2996_v30 = vmul.f32 %v5666_v55, %v5795_v16  ;;  %v4703_v26 = vpop.eup %4702 }
 0x637   : > { %4726 = vtanh.f32 %v3028_v10  ;;  %v4201_v12 = vpop.f32.mrf.mxu1  ;;  %v3120_v7 = vmul.f32 1.442695, %v5799_v29  ;;  %v5811_v57 = vmul.f32 %v4703_v26, %v5720_v8 }
 0x638   : > { %6420 = vst [vmem:[#allocation25_spill] sm:$0xff] %v5802_v58  ;;  %4728 = vpow2.f32 %v3124_v15  ;;  %v2994_v18 = vmul.f32 %v5666_v55, %v5802_v58  ;;  %v4705_v49 = vpop.eup %4704  ;;  %v3031_v10 = vmul.f32 %v5671_v19, %v2996_v30  ;;  %v5815_v45 = vadd.f32 %v4201_v12, %v5664_v3 }
 0x639   : > { %4730 = vtanh.f32 %v3026_v51  ;;  %v2877_v32 = vpop.f32.mrf.mxu1  ;;  %v4707_v53 = vpop.eup %4706  ;;  %v5818_v15 = vmul.f32 %v4705_v49, %v5720_v8  ;;  %v3130_v26 = vmul.f32 1.442695, %v5811_v57 }
 0x63a   : > { %6421 = vst [vmem:[#allocation26_spill] sm:$0xff] %v5815_v45  ;;  %4732 = vpow2.f32 %v3120_v7  ;;  %v3029_v60 = vmul.f32 %v5671_v19, %v2994_v18  ;;  %v5822_v59 = vadd.f32 %v5664_v3, %v2877_v32  ;;  %v4709_v22 = vpop.eup %4708  ;;  %v2997_v51 = vmul.f32 %v5666_v55, %v5815_v45  ;;  %3210 = vrot.lane.b32.xlu1 %v4707_v53, %s4875_s28 }
 0x63b   : > { %4734 = vtanh.f32 %v3031_v10  ;;  %v4204_v30 = vpop.f32.mrf.mxu1  ;;  %v4711_v12 = vpop.eup %4710  ;;  %3206 = vrot.lane.b32.xlu0 %v4709_v22, %s4875_s28  ;;  %v3126_v53 = vmul.f32 1.442695, %v5818_v15 }
 0x63c   : > { %6422 = vst [vmem:[#allocation27_spill] sm:$0xff] %v5822_v59  ;;  %4736 = vtanh.f32 %v3029_v60  ;;  %v2995_v49 = vmul.f32 %v5666_v55, %v5822_v59  ;;  %v4713_v7 = vpop.eup %4712  ;;  %v5832_v18 = vmul.f32 %v4711_v12, %v5720_v8  ;;  %v3032_v10 = vmul.f32 %v5671_v19, %v2997_v51 }
 0x63d   : > { %v5836_v32 = vadd.f32 %v4204_v30, %v5664_v3  ;;  %v2890_v21 = vpop.f32.mrf.mxu1  ;;  %v4715_v28 = vpop.eup %4714  ;;  %4738 = vpow2.f32 %v3130_v26 }
 0x63e   : > { %v3030_v60 = vmul.f32 %v5671_v19, %v2995_v49  ;;  %v5841_v59 = vadd.f32 %v5664_v3, %v2890_v21  ;;  %v4717_v22 = vpop.eup %4716  ;;  %v3132_v58 = vmul.f32 1.442695, %v5832_v18  ;;  %v5845_v12 = vmul.f32 %v4715_v28, %v5720_v8 }
 0x63f   : > { %6423 = vst [vmem:[#allocation28_spill] sm:$0xff] %v5836_v32  ;;  %4740 = vtanh.f32 %v3032_v10  ;;  %v4205_v51 = vpop.f32.mrf.mxu1  ;;  %v4719_v30 = vpop.eup %4718  ;;  %v3000_v26 = vmul.f32 %v5666_v55, %v5836_v32  ;;  %3208 = vrot.lane.b32.xlu1 %v4717_v22, %s4875_s28  ;;  %3212 = vrot.lane.b32.xlu0 %v4713_v7, %s4875_s28 }
 0x640   : > { %6424 = vst [vmem:[#allocation29_spill] sm:$0xff] %v5841_v59  ;;  %4742 = vtanh.f32 %v3030_v60  ;;  %v2998_v45 = vmul.f32 %v5666_v55, %v5841_v59  ;;  %v3128_v49 = vmul.f32 1.442695, %v5845_v12  ;;  %v5855_v28 = vmul.f32 %v4719_v30, %v5720_v8 }
 0x641   : > { %v4721_v21 = vpop.eup %4720  ;;  %4744 = vpow2.f32 %v3132_v58  ;;  %v5858_v10 = vadd.f32 %v4205_v51, %v5664_v3  ;;  %v2893_v60 = vpop.f32.mrf.mxu1  ;;  %v3035_v22 = vmul.f32 %v5671_v19, %v3000_v26 }
 0x642   : > { %6425 = vst [vmem:[#allocation30_spill] sm:$0xff] %v5855_v28  ;;  %v4723_v27 = vpop.eup %4722  ;;  %4746 = vpow2.f32 %v3126_v53  ;;  %v5861_v32 = vmul.f32 %v4721_v21, %v5720_v8  ;;  %v5865_v7 = vadd.f32 %v5664_v3, %v2893_v60  ;;  %v3138_v59 = vmul.f32 1.442695, %v5855_v28 }
 0x643   : > { %6426 = vst [vmem:[#allocation31_spill] sm:$0xff] %v5858_v10  ;;  %v4725_v58 = vpop.eup %4724  ;;  %4748 = vpow2.f32 %v3128_v49  ;;  %v3033_v30 = vmul.f32 %v5671_v19, %v2998_v45  ;;  %v3001_v51 = vmul.f32 %v5666_v55, %v5858_v10  ;;  %v4208_v56 = vpop.f32.mrf.mxu1  ;;  %3218 = vrot.lane.b32.xlu1 %v4723_v27, %s4875_s28 }
 0x644   : > { %6427 = vst [vmem:[#allocation32_spill] sm:$0xff] %v5861_v32  ;;  %6428 = vst [vmem:[#allocation33_spill] sm:$0xff] %v5865_v7  ;;  %v4727_v16 = vpop.eup %4726  ;;  %v3134_v53 = vmul.f32 1.442695, %v5861_v32  ;;  %4750 = vtanh.f32 %v3035_v22  ;;  %v2999_v26 = vmul.f32 %v5666_v55, %v5865_v7  ;;  %v5880_v60 = vadd.f32 %v4208_v56, %v5664_v3 }
 0x645   : > { %v4729_v21 = vpop.eup %4728  ;;  %4752 = vpow2.f32 %v3138_v59  ;;  %v5876_v49 = vmul.f32 %v4727_v16, %v5720_v8  ;;  %v3036_v45 = vmul.f32 %v5671_v19, %v3001_v51  ;;  %v2906_v10 = vpop.f32.mrf.mxu1 }
 0x646   : > { %6430 = vst [vmem:[#allocation35_spill] sm:$0xff] %v5880_v60  ;;  %v4731_v28 = vpop.eup %4730  ;;  %4754 = vpow2.f32 %v3134_v53  ;;  %v3034_v22 = vmul.f32 %v5671_v19, %v2999_v26  ;;  %v5884_v32 = vadd.f32 %v5664_v3, %v2906_v10  ;;  %3220 = vrot.lane.b32.xlu0 %v4729_v21, %s4875_s28  ;;  %v3004_v53 = vmul.f32 %v5666_v55, %v5880_v60 }
 0x647   : > { %6429 = vst [vmem:[#allocation34_spill] sm:$0xff] %v5876_v49  ;;  %v4733_v27 = vpop.eup %4732  ;;  %v3140_v59 = vmul.f32 1.442695, %v5876_v49  ;;  %v5889_v16 = vmul.f32 %v4731_v28, %v5720_v8  ;;  %4756 = vtanh.f32 %v3033_v30  ;;  %v4209_v51 = vpop.f32.mrf.mxu1  ;;  %3214 = vrot.lane.b32.xlu1 %v4725_v58, %s4875_s28 }
 0x648   : > { %6431 = vst [vmem:[#allocation36_spill] sm:$0xff] %v5884_v32  ;;  %v4735_v56 = vpop.eup %4734  ;;  %4758 = vtanh.f32 %v3036_v45  ;;  %v3002_v26 = vmul.f32 %v5666_v55, %v5884_v32  ;;  %v5901_v28 = vadd.f32 %v4209_v51, %v5664_v3  ;;  %v3039_v60 = vmul.f32 %v5671_v19, %v3004_v53 }
 0x649   : > { %6432 = vst [vmem:[#allocation37_spill] sm:$0xff] %v5889_v16  ;;  %v4737_v10 = vpop.eup %4736  ;;  %4760 = vpow2.f32 %v3140_v59  ;;  %v3136_v21 = vmul.f32 1.442695, %v5889_v16  ;;  %v5898_v7 = vmul.f32 %v4735_v56, %v5720_v8  ;;  %v2909_v30 = vpop.f32.mrf.mxu1 }
 0x64a   : > { %6434 = vst [vmem:[#allocation39_spill] sm:$0xff] %v5901_v28  ;;  %v5904_v45 = vmul.f32 %v4737_v10, %v5720_v8  ;;  %4762 = vtanh.f32 %v3034_v22  ;;  %3216 = vrot.lane.b32.xlu0 %v4733_v27, %s4875_s28  ;;  %v4739_v58 = vpop.eup %4738  ;;  %v3037_v32 = vmul.f32 %v5671_v19, %v3002_v26  ;;  %v3005_v56 = vmul.f32 %v5666_v55, %v5901_v28 }
 0x64b   : > { %6433 = vst [vmem:[#allocation38_spill] sm:$0xff] %v5898_v7  ;;  %v3146_v59 = vmul.f32 1.442695, %v5898_v7  ;;  %v4212_v16 = vpop.f32.mrf.mxu1  ;;  %4764 = vtanh.f32 %v3039_v60  ;;  %v5913_v49 = vadd.f32 %v5664_v3, %v2909_v30  ;;  %3226 = vrot.lane.b32.xlu1 %v4739_v58, %s4875_s28 }
 0x64c   : > { %6435 = vst [vmem:[#allocation40_spill] sm:$0xff] %v5904_v45  ;;  %v4741_v51 = vpop.eup %4740  ;;  %v5916_v22 = vadd.f32 %v4212_v16, %v5664_v3  ;;  %4766 = vpow2.f32 %v3136_v21  ;;  %v3040_v26 = vmul.f32 %v5671_v19, %v3005_v56  ;;  %v3142_v60 = vmul.f32 1.442695, %v5904_v45 }
 0x64d   : > { %6436 = vst [vmem:[#allocation41_spill] sm:$0xff] %v5913_v49  ;;  %v4743_v27 = vpop.eup %4742  ;;  %v5920_v53 = vmul.f32 %v4741_v51, %v5720_v8  ;;  %v2922_v10 = vpop.f32.mrf.mxu1  ;;  %4768 = vpow2.f32 %v3146_v59  ;;  %v3003_v16 = vmul.f32 %v5666_v55, %v5913_v49 }
 0x64e   : > { %6437 = vst [vmem:[#allocation42_spill] sm:$0xff] %v5916_v22  ;;  %v4745_v28 = vpop.eup %4744  ;;  %v5925_v30 = vmul.f32 %v4743_v27, %v5720_v8  ;;  %4770 = vtanh.f32 %v3037_v32  ;;  %v3008_v21 = vmul.f32 %v5666_v55, %v5916_v22  ;;  %v5935_v27 = vadd.f32 %v5664_v3, %v2922_v10 }
 0x64f   : > { %6438 = vst [vmem:[#allocation43_spill] sm:$0xff] %v5920_v53  ;;  %v4747_v7 = vpop.eup %4746  ;;  %v3148_v58 = vmul.f32 1.442695, %v5920_v53  ;;  %3228 = vrot.lane.b32.xlu0 %v4745_v28, %s4875_s28  ;;  %v4213_v56 = vpop.f32.mrf.mxu1  ;;  %4772 = vtanh.f32 %v3040_v26  ;;  %v3038_v59 = vmul.f32 %v5671_v19, %v3003_v16 }
 0x650   : > { %v4749_v51 = vpop.eup %4748  ;;  %6439 = vst [vmem:[#allocation44_spill] sm:$0xff] %v5935_v27  ;;  %3222 = vrot.lane.b32.xlu1 %v4747_v7, %s4875_s28  ;;  %v3144_v45 = vmul.f32 1.442695, %v5925_v30  ;;  %v3043_v32 = vmul.f32 %v5671_v19, %v3008_v21  ;;  %v5941_v22 = vadd.f32 %v4213_v56, %v5664_v3  ;;  %v3006_v10 = vmul.f32 %v5666_v55, %v5935_v27 }
 0x651   : > { %v4751_v49 = vpop.eup %4750  ;;  %4774 = vpow2.f32 %v3148_v58  ;;  %v2925_v28 = vpop.f32.mrf.mxu1 }
 0x652   : > { %6440 = vst [vmem:[#allocation45_spill] sm:$0xff] %v5941_v22  ;;  %v4753_v53 = vpop.eup %4752  ;;  %4776 = vpow2.f32 %v3142_v60  ;;  %v5944_v26 = vmul.f32 %v4751_v49, %v5720_v8  ;;  %v3009_v7 = vmul.f32 %v5666_v55, %v5941_v22  ;;  %v5951_v58 = vadd.f32 %v5664_v3, %v2925_v28 }
 0x653   : > { %v4755_v16 = vpop.eup %4754  ;;  %4778 = vtanh.f32 %v3038_v59  ;;  %3224 = vrot.lane.b32.xlu0 %v4749_v51, %s4875_s28  ;;  %v3041_v49 = vmul.f32 %v5671_v19, %v3006_v10 }
 0x654   : > { %6441 = vst [vmem:[#allocation46_spill] sm:$0xff] %v5951_v58  ;;  %v4757_v21 = vpop.eup %4756  ;;  %v3154_v56 = vmul.f32 1.442695, %v5944_v26  ;;  %4780 = vtanh.f32 %v3043_v32  ;;  %3234 = vrot.lane.b32.xlu1 %v4753_v53, %s4875_s28  ;;  %v3044_v22 = vmul.f32 %v5671_v19, %v3009_v7  ;;  %v3007_v3 = vmul.f32 %v5666_v55, %v5951_v58 }
 0x655   : > { %v4759_v60 = vpop.eup %4758  ;;  %4782 = vpow2.f32 %v3144_v45  ;;  %v5958_v59 = vmul.f32 %v4757_v21, %v5720_v8 }
 0x656   : > { %v4761_v28 = vpop.eup %4760  ;;  %4784 = vpow2.f32 %v3154_v56  ;;  %v5964_v51 = vmul.f32 %v4759_v60, %v5720_v8  ;;  %v3042_v53 = vmul.f32 %v5671_v19, %v3007_v3 }
 0x657   : > { %v4763_v32 = vpop.eup %4762  ;;  %v3150_v10 = vmul.f32 1.442695, %v5958_v59  ;;  %4786 = vtanh.f32 %v3041_v49  ;;  %3236 = vrot.lane.b32.xlu0 %v4761_v28, %s4875_s28 }
 0x658   : > { %v3156_v45 = vmul.f32 1.442695, %v5964_v51  ;;  %v5971_v7 = vmul.f32 %v4763_v32, %v5720_v8  ;;  %4788 = vtanh.f32 %v3044_v22  ;;  %3230 = vrot.lane.b32.xlu1 %v4755_v16, %s4875_s28  ;;  %v4765_v55 = vpop.eup %4764 }
 0x659   : > { %4790 = vpow2.f32 %v3150_v10  ;;  %v4767_v21 = vpop.eup %4766  ;;  %v5976_v49 = vmul.f32 %v4765_v55, %v5720_v8 }
 0x65a   : > { %4792 = vpow2.f32 %v3156_v45  ;;  %v3152_v56 = vmul.f32 1.442695, %v5971_v7  ;;  %v4769_v19 = vpop.eup %4768 }
 0x65b   : > { %4794 = vtanh.f32 %v3042_v53  ;;  %3232 = vrot.lane.b32.xlu0 %v4767_v21, %s4875_s28  ;;  %v4771_v60 = vpop.eup %4770  ;;  %v3162_v3 = vmul.f32 1.442695, %v5976_v49 }
 0x65c   : > { %3242 = vrot.lane.b32.xlu1 %v4769_v19, %s4875_s28  ;;  %v4773_v22 = vpop.eup %4772  ;;  %4796 = vpow2.f32 %v3152_v56  ;;  %v5982_v16 = vmul.f32 %v4771_v60, %v5720_v8 }
 0x65d   : > { %4798 = vpow2.f32 %v3162_v3  ;;  %v5985_v32 = vmul.f32 %v4773_v22, %v5720_v8 }
 0x65e   : > { %6442 = vst [vmem:[#allocation47_spill] sm:$0xff] %v5982_v16  ;;  %v4775_v28 = vpop.eup %4774  ;;  %v3158_v53 = vmul.f32 1.442695, %v5982_v16 }
 0x65f   : > { %6443 = vst [vmem:[#allocation48_spill] sm:$0xff] %v5985_v32  ;;  %v4777_v10 = vpop.eup %4776  ;;  %3244 = vrot.lane.b32.xlu0 %v4775_v28, %s4875_s28  ;;  %v3164_v55 = vmul.f32 1.442695, %v5985_v32 }
 0x660   : > { %v4779_v45 = vpop.eup %4778  ;;  %3238 = vrot.lane.b32.xlu1 %v4777_v10, %s4875_s28  ;;  %4800 = vpow2.f32 %v3158_v53 }
 0x661   : > { %v4781_v21 = vpop.eup %4780  ;;  %v5992_v56 = vmul.f32 %v4779_v45, %v5720_v8  ;;  %4802 = vpow2.f32 %v3164_v55 }
 0x662   : > { %v4783_v19 = vpop.eup %4782  ;;  %v5995_v60 = vmul.f32 %v4781_v21, %v5720_v8 }
 0x663   : > { %6444 = vst [vmem:[#allocation49_spill] sm:$0xff] %v5992_v56  ;;  %v4785_v3 = vpop.eup %4784  ;;  %v3160_v22 = vmul.f32 1.442695, %v5992_v56  ;;  %3240 = vrot.lane.b32.xlu0 %v4783_v19, %s4875_s28 }
 0x664   : > { %6445 = vst [vmem:[#allocation50_spill] sm:$0xff] %v5995_v60  ;;  %v4787_v28 = vpop.eup %4786  ;;  %3250 = vrot.lane.b32.xlu1 %v4785_v3, %s4875_s28  ;;  %v3170_v56 = vmul.f32 1.442695, %v5995_v60 }
 0x665   : > { %v4789_v58 = vpop.eup %4788  ;;  %v6001_v10 = vmul.f32 %v4787_v28, %v5720_v8  ;;  %4804 = vpow2.f32 %v3160_v22 }
 0x666   : > { %v4791_v53 = vpop.eup %4790  ;;  %v6004_v45 = vmul.f32 %v4789_v58, %v5720_v8 }
 0x667   : > { %6446 = vst [vmem:[#allocation51_spill] sm:$0xff] %v6001_v10  ;;  %v4793_v55 = vpop.eup %4792  ;;  %v3166_v21 = vmul.f32 1.442695, %v6001_v10 }
 0x668   : > { %6447 = vst [vmem:[#allocation52_spill] sm:$0xff] %v6004_v45  ;;  %v4795_v16 = vpop.eup %4794  ;;  %3252 = vrot.lane.b32.xlu0 %v4793_v55, %s4875_s28  ;;  %3246 = vrot.lane.b32.xlu1 %v4791_v53, %s4875_s28  ;;  %v3172_v58 = vmul.f32 1.442695, %v6004_v45 }
 0x669   : > { %4806 = vpow2.f32 %v3166_v21  ;;  %v6011_v19 = vmul.f32 %v4795_v16, %v5720_v8  ;;  %v4797_v3 = vpop.eup %4796 }
 0x66a   : > { %v4799_v28 = vpop.eup %4798  ;;  %4808 = vpow2.f32 %v3170_v56 }
 0x66b   : > { %6448 = vst [vmem:[#allocation53_spill] sm:$0xff] %v6011_v19  ;;  %v3168_v22 = vmul.f32 1.442695, %v6011_v19 }
 0x66c   : > { %3248 = vrot.lane.b32.xlu0 %v4797_v3, %s4875_s28  ;;  %3258 = vrot.lane.b32.xlu1 %v4799_v28, %s4875_s28  ;;  %v4814_v28 = vld [vmem:[%s5271_s21 + $0x10] sm:$0xff] }
 0x66d   : > { %4810 = vpow2.f32 %v3168_v22  ;;  %v4801_v60 = vpop.eup %4800 }
 0x66e   : > { %v4803_v55 = vpop.eup %4802  ;;  %4812 = vpow2.f32 %v3172_v58 }
 0x670   : > { %3260 = vrot.lane.b32.xlu0 %v4803_v55, %s4875_s28  ;;  %3254 = vrot.lane.b32.xlu1 %v4801_v60, %s4875_s28  ;;  %v2945_v60 = vmul.f32 %v5249_v50, %v5669_v48  ;;  %v2943_v55 = vmul.f32 %v5249_v50, %v5674_v5  ;;  %v2944_v48 = vmul.f32 %v5249_v50, %v5688_v39  ;;  %v4817_v5 = vld [vmem:[%s5271_s21 + $0x18] sm:$0xff] }
 0x672   : > { %v4805_v8 = vpop.eup %4804 }
 0x674   : > { %3256 = vrot.lane.b32.xlu0 %v4805_v8, %s4875_s28  ;;  %v4815_v8 = vld [vmem:[%s5271_s21] sm:$0xff] }
 0x676   : > { %v4807_v16 = vpop.eup %4806 }
 0x677   : > { %3262 = vrot.lane.b32.xlu1 %v4807_v16, %s4875_s28  ;;  %v4809_v56 = vpop.eup %4808 }
 0x67a   : > { %v4811_v53 = vpop.eup %4810 }
 0x67b   : > { %3266 = vrot.lane.b32.xlu1 %v4809_v56, %s4875_s28  ;;  %3264 = vrot.lane.b32.xlu0 %v4811_v53, %s4875_s28  ;;  %v4813_v21 = vpop.eup %4812 }
 0x67f   : > { %3268 = vrot.lane.b32.xlu0 %v4813_v21, %s4875_s28  ;;  %v2946_v21 = vmul.f32 %v5249_v50, %v5681_v47 }
 0x6ac   : > { %v3211_v3 = vpop.permute.xlu1 %3210 }
 0x6ad   : > { %v3304_v22 = vmul.f32 %v4814_v28, %v3211_v3  ;;  %v3207_v58 = vpop.permute.xlu0 %3206  ;;  %v4816_v28 = vld [vmem:[%s5271_s21 + $0x8] sm:$0xff] }
 0x6ae   : > { %v3302_v16 = vmul.f32 %v4815_v8, %v3207_v58 }
 0x6af   : > { %v3336_v56 = vadd.f32 %v3304_v22, %v2945_v60 }
 0x6b0   : > { %v3334_v53 = vadd.f32 %v3302_v16, %v2943_v55  ;;  %v4819_v16 = vld [vmem:[%s5271_s21 + $0x38] sm:$0xff] }
 0x6b1   : > { %v3368_v45 = vmul.f32 %v3336_v56, %v5249_v50  ;;  %v3209_v19 = vpop.permute.xlu1 %3208  ;;  %v3213_v10 = vpop.permute.xlu0 %3212 }
 0x6b2   : > { %v3366_v3 = vmul.f32 %v3334_v53, %v5249_v50  ;;  %v3303_v32 = vmul.f32 %v4816_v28, %v3209_v19  ;;  %v3305_v27 = vmul.f32 %v4817_v5, %v3213_v10  ;;  %v2949_v19 = vmul.f32 %v5249_v50, %v5694_v9 }
 0x6b3   : > { %v3400_v47 = vadd.f32 %v3368_v45, %v5297_v33  ;;  %v2950_v9 = vmul.f32 %v5249_v50, %v5705_v46  ;;  %v2947_v28 = vmul.f32 %v5249_v50, %v5698_v31  ;;  %v2953_v31 = vmul.f32 %v5249_v50, %v5718_v11 }
 0x6b4   : > { %v3398_v60 = vadd.f32 %v3366_v3, %v5282_v13  ;;  %v3335_v39 = vadd.f32 %v3303_v32, %v2944_v48  ;;  %v3337_v22 = vadd.f32 %v3305_v27, %v2946_v21  ;;  %v4818_v13 = vld [vmem:[%s5271_s21 + $0x30] sm:$0xff] }
 0x6b5   : > { %v3432_v10 = vsel %vm1847_vm2, %v3400_v47, %v5735_v20  ;;  %v3219_v58 = vpop.permute.xlu1 %3218 }
 0x6b6   : > { %3465 = vst.msk [vmem:[%s6042_s30 + $0x10] sm:$0xff] %vm3462_vm3, %v3432_v10  ;;  %v3430_v55 = vsel %vm1847_vm2, %v3398_v60, %v5738_v63  ;;  %v3367_v8 = vmul.f32 %v3335_v39, %v5249_v50  ;;  %v3369_v33 = vmul.f32 %v3337_v22, %v5249_v50  ;;  %v3308_v27 = vmul.f32 %v4818_v13, %v3219_v58  ;;  %v4821_v60 = vld [vmem:[%s5271_s21 + $0x28] sm:$0xff] }
 0x6b7   : > { %3463 = vst.msk [vmem:[%s6042_s30] sm:$0xff] %vm3462_vm3, %v3430_v55 }
 0x6b8   : > { %v3221_v20 = vpop.permute.xlu0 %3220  ;;  %v3399_v32 = vadd.f32 %v3367_v8, %v5285_v14  ;;  %v3401_v45 = vadd.f32 %v3369_v33, %v5300_v34  ;;  %v3340_v63 = vadd.f32 %v3308_v27, %v2949_v19  ;;  %v4820_v14 = vld [vmem:[%s5271_s21 + $0x20] sm:$0xff] }
 0x6b9   : > { %v3309_v56 = vmul.f32 %v4819_v16, %v3221_v20  ;;  %v3215_v53 = vpop.permute.xlu1 %3214  ;;  %v4824_v16 = vld [vmem:[%s5271_s21 + $0x40] sm:$0xff] }
 0x6ba   : > { %v3431_v21 = vsel %vm1847_vm2, %v3399_v32, %v5759_v41  ;;  %v3433_v48 = vsel %vm1847_vm2, %v3401_v45, %v5749_v38  ;;  %v3372_v46 = vmul.f32 %v3340_v63, %v5249_v50  ;;  %v3306_v34 = vmul.f32 %v4820_v14, %v3215_v53 }
 0x6bb   : > { %v3341_v3 = vadd.f32 %v3309_v56, %v2950_v9  ;;  %3464 = vst.msk [vmem:[%s6042_s30 + $0x8] sm:$0xff] %vm3462_vm3, %v3431_v21  ;;  %3466 = vst.msk [vmem:[%s6042_s30 + $0x18] sm:$0xff] %vm3462_vm3, %v3433_v48  ;;  %v2948_v41 = vmul.f32 %v5249_v50, %v5712_v43  ;;  %v4822_v43 = vld [vmem:[%s5271_s21 + $0x50] sm:$0xff]  ;;  %v4823_v9 = vld [vmem:[%s5271_s21 + $0x58] sm:$0xff]  ;;  %v2957_v14 = vmul.f32 %v5249_v50, %v5755_v44 }
 0x6bc   : > { %v3217_v5 = vpop.permute.xlu0 %3216  ;;  %v3404_v38 = vadd.f32 %v3372_v46, %v5327_v61  ;;  %v3338_v22 = vadd.f32 %v3306_v34, %v2947_v28  ;;  %v4826_v34 = vld [vmem:[%s5271_s21 + $0x70] sm:$0xff]  ;;  %v2958_v44 = vmul.f32 %v5249_v50, %v5775_v40  ;;  %v4828_v40 = vld [vmem:[%s5271_s21 + $0x60] sm:$0xff] }
 0x6bd   : > { %v3373_v47 = vmul.f32 %v3341_v3, %v5249_v50  ;;  %v3307_v39 = vmul.f32 %v4821_v60, %v3217_v5  ;;  %v3227_v19 = vpop.permute.xlu1 %3226 }
 0x6be   : > { %v3436_v10 = vsel %vm1847_vm2, %v3404_v38, %v5771_v0  ;;  %v3312_v8 = vmul.f32 %v4822_v43, %v3227_v19  ;;  %v3370_v61 = vmul.f32 %v3338_v22, %v5249_v50  ;;  %v2954_v0 = vmul.f32 %v5249_v50, %v5731_v4 }
 0x6bf   : > { %v3405_v58 = vadd.f32 %v3373_v47, %v5330_v62  ;;  %v3339_v55 = vadd.f32 %v3307_v39, %v2948_v41  ;;  %3469 = vst.msk [vmem:[%s6042_s30 + $0x30] sm:$0xff] %vm3462_vm3, %v3436_v10 }
 0x6c0   : > { %v3344_v13 = vadd.f32 %v3312_v8, %v2953_v31  ;;  %v3402_v62 = vadd.f32 %v3370_v61, %v5306_v36  ;;  %v4827_v31 = vld [vmem:[%s5271_s21 + $0x78] sm:$0xff]  ;;  %v2956_v61 = vmul.f32 %v5249_v50, %v5782_v54  ;;  %v4830_v54 = vld [vmem:[%s5271_s21 + $0x90] sm:$0xff] }
 0x6c1   : > { %v3437_v33 = vsel %vm1847_vm2, %v3405_v58, %v5789_v42  ;;  %v3371_v11 = vmul.f32 %v3339_v55, %v5249_v50  ;;  %v3229_v27 = vpop.permute.xlu0 %3228  ;;  %v2951_v42 = vmul.f32 %v5249_v50, %v5724_v23 }
 0x6c2   : > { %3470 = vst.msk [vmem:[%s6042_s30 + $0x38] sm:$0xff] %vm3462_vm3, %v3437_v33  ;;  %v3313_v20 = vmul.f32 %v4823_v9, %v3229_v27  ;;  %v3223_v32 = vpop.permute.xlu1 %3222  ;;  %v3376_v63 = vmul.f32 %v3344_v13, %v5249_v50  ;;  %v3434_v4 = vsel %vm1847_vm2, %v3402_v62, %v5778_v17  ;;  %v4825_v17 = vld [vmem:[%s5271_s21 + $0x48] sm:$0xff] }
 0x6c3   : > { %v3403_v45 = vadd.f32 %v3371_v11, %v5309_v37  ;;  %v3310_v56 = vmul.f32 %v4824_v16, %v3223_v32  ;;  %3467 = vst.msk [vmem:[%s6042_s30 + $0x20] sm:$0xff] %vm3462_vm3, %v3434_v4  ;;  %v2952_v37 = vmul.f32 %v5249_v50, %v5744_v6  ;;  %v4829_v11 = vld [vmem:[%s5271_s21 + $0x68] sm:$0xff] }
 0x6c4   : > { %v3345_v53 = vadd.f32 %v3313_v20, %v2954_v0  ;;  %v3408_v21 = vadd.f32 %v3376_v63, %v5357_v24  ;;  %v6449_v0 = vld [vmem:[#allocation24_spill] sm:$0xff]  ;;  %v6453_v4 = vld [vmem:[#allocation26_spill] sm:$0xff] }
 0x6c5   : > { %v3435_v36 = vsel %vm1847_vm2, %v3403_v45, %v5799_v29  ;;  %v3342_v23 = vadd.f32 %v3310_v56, %v2951_v42  ;;  %v3225_v48 = vpop.permute.xlu0 %3224  ;;  %v6452_v45 = vld [vmem:[#allocation5_spill] sm:$0xff] }
 0x6c6   : > { %3468 = vst.msk [vmem:[%s6042_s30 + $0x28] sm:$0xff] %vm3462_vm3, %v3435_v36  ;;  %v3377_v46 = vmul.f32 %v3345_v53, %v5249_v50  ;;  %v3311_v3 = vmul.f32 %v4825_v17, %v3225_v48  ;;  %v3235_v28 = vpop.permute.xlu1 %3234  ;;  %v3440_v29 = vsel %vm1847_vm2, %v3408_v21, %v5811_v57  ;;  %v2962_v53 = vmul.f32 %v5249_v50, %v6453_v4  ;;  %v6454_v36 = vld [vmem:[#allocation34_spill] sm:$0xff]  ;;  %v4831_v48 = vld [vmem:[%s5271_s21 + $0x98] sm:$0xff]  ;;  %v6455_v17 = vld [vmem:[#allocation25_spill] sm:$0xff] }
 0x6c7   : > { %v3374_v24 = vmul.f32 %v3342_v23, %v5249_v50  ;;  %v3316_v5 = vmul.f32 %v4826_v34, %v3235_v28  ;;  %3473 = vst.msk [vmem:[%s6042_s30 + $0x50] sm:$0xff] %vm3462_vm3, %v3440_v29  ;;  %v6456_v28 = vld [vmem:[#allocation32_spill] sm:$0xff]  ;;  %v4836_v4 = vld [vmem:[%s5271_s21 + $0xa0] sm:$0xff] }
 0x6c8   : > { %v3409_v6 = vadd.f32 %v3377_v46, %v5360_v25  ;;  %v3343_v41 = vadd.f32 %v3311_v3, %v2952_v37  ;;  %v2955_v25 = vmul.f32 %v5249_v50, %v5762_v35  ;;  %v2959_v3 = vmul.f32 %v5249_v50, %v6455_v17  ;;  %v6471_v17 = vld [vmem:[#allocation33_spill] sm:$0xff] }
 0x6c9   : > { %v3406_v38 = vadd.f32 %v3374_v24, %v5335_v1  ;;  %v3348_v47 = vadd.f32 %v3316_v5, %v2957_v14  ;;  %v3237_v60 = vpop.permute.xlu0 %3236  ;;  %v4832_v24 = vld [vmem:[%s5271_s21 + $0x80] sm:$0xff]  ;;  %v6457_v5 = vld [vmem:[#allocation6_spill] sm:$0xff] }
 0x6ca   : > { %v3441_v57 = vsel %vm1847_vm2, %v3409_v6, %v5832_v18  ;;  %v3375_v39 = vmul.f32 %v3343_v41, %v5249_v50  ;;  %v3317_v22 = vmul.f32 %v4827_v31, %v3237_v60  ;;  %v3231_v19 = vpop.permute.xlu1 %3230  ;;  %v6460_v31 = vld [vmem:[#allocation37_spill] sm:$0xff] }
 0x6cb   : > { %3474 = vst.msk [vmem:[%s6042_s30 + $0x58] sm:$0xff] %vm3462_vm3, %v3441_v57  ;;  %v3438_v1 = vsel %vm1847_vm2, %v3406_v38, %v5818_v15  ;;  %v3380_v10 = vmul.f32 %v3348_v47, %v5249_v50  ;;  %v3314_v58 = vmul.f32 %v4828_v40, %v3231_v19  ;;  %v6458_v38 = vld [vmem:[#allocation10_spill] sm:$0xff]  ;;  %v6459_v57 = vld [vmem:[#allocation27_spill] sm:$0xff]  ;;  %v6461_v40 = vld [vmem:[#allocation28_spill] sm:$0xff] }
 0x6cc   : > { %3471 = vst.msk [vmem:[%s6042_s30 + $0x40] sm:$0xff] %vm3462_vm3, %v3438_v1  ;;  %v3407_v18 = vadd.f32 %v3375_v39, %v5338_v2  ;;  %v3349_v55 = vadd.f32 %v3317_v22, %v2958_v44  ;;  %v2961_v2 = vmul.f32 %v5249_v50, %v6449_v0  ;;  %v2960_v39 = vmul.f32 %v5249_v50, %v6459_v57  ;;  %v6465_v0 = vld [vmem:[#allocation29_spill] sm:$0xff] }
 0x6cd   : > { %v3412_v43 = vadd.f32 %v3380_v10, %v5383_v52  ;;  %v3346_v35 = vadd.f32 %v3314_v58, %v2955_v25  ;;  %v3233_v8 = vpop.permute.xlu0 %3232  ;;  %v6450_v52 = vld [vmem:[#allocation30_spill] sm:$0xff]  ;;  %v2965_v58 = vmul.f32 %v5249_v50, %v6461_v40 }
 0x6ce   : > { %v3439_v15 = vsel %vm1847_vm2, %v3407_v18, %v5845_v12  ;;  %v3381_v33 = vmul.f32 %v3349_v55, %v5249_v50  ;;  %v3315_v13 = vmul.f32 %v4829_v11, %v3233_v8  ;;  %v3243_v27 = vpop.permute.xlu1 %3242  ;;  %v6451_v12 = vld [vmem:[#allocation7_spill] sm:$0xff]  ;;  %v4833_v25 = vld [vmem:[%s5271_s21 + $0x88] sm:$0xff]  ;;  %v6464_v11 = vld [vmem:[#allocation8_spill] sm:$0xff] }
 0x6cf   : > { %3472 = vst.msk [vmem:[%s6042_s30 + $0x48] sm:$0xff] %vm3462_vm3, %v3439_v15  ;;  %v3444_v62 = vsel %vm1847_vm2, %v3412_v43, %v6450_v52  ;;  %v3378_v9 = vmul.f32 %v3346_v35, %v5249_v50  ;;  %v3320_v20 = vmul.f32 %v4830_v54, %v3243_v27  ;;  %v6462_v18 = vld [vmem:[#allocation38_spill] sm:$0xff]  ;;  %v4834_v35 = vld [vmem:[%s5271_s21 + $0xb0] sm:$0xff] }
 0x6d0   : > { %3477 = vst.msk [vmem:[%s6042_s30 + $0x70] sm:$0xff] %vm3462_vm3, %v3444_v62  ;;  %v3413_v32 = vadd.f32 %v3381_v33, %v6451_v12  ;;  %v3347_v42 = vadd.f32 %v3315_v13, %v2956_v61  ;;  %v6463_v61 = vld [vmem:[#allocation11_spill] sm:$0xff] }
 0x6d1   : > { %v3410_v63 = vadd.f32 %v3378_v9, %v6452_v45  ;;  %v3352_v16 = vadd.f32 %v3320_v20, %v2961_v2  ;;  %v3245_v56 = vpop.permute.xlu0 %3244  ;;  %v2963_v2 = vmul.f32 %v5249_v50, %v6465_v0  ;;  %v6466_v52 = vld [vmem:[#allocation31_spill] sm:$0xff] }
 0x6d2   : > { %v3445_v21 = vsel %vm1847_vm2, %v3413_v32, %v6454_v36  ;;  %v3379_v23 = vmul.f32 %v3347_v42, %v5249_v50  ;;  %v3321_v37 = vmul.f32 %v4831_v48, %v3245_v56  ;;  %v3239_v46 = vpop.permute.xlu1 %3238  ;;  %v2966_v62 = vmul.f32 %v5249_v50, %v6466_v52  ;;  %v6467_v9 = vld [vmem:[#allocation43_spill] sm:$0xff]  ;;  %v6468_v42 = vld [vmem:[#allocation40_spill] sm:$0xff]  ;;  %v6469_v36 = vld [vmem:[#allocation9_spill] sm:$0xff] }
 0x6d3   : > { %3478 = vst.msk [vmem:[%s6042_s30 + $0x78] sm:$0xff] %vm3462_vm3, %v3445_v21  ;;  %v3442_v14 = vsel %vm1847_vm2, %v3410_v63, %v6456_v28  ;;  %v3384_v29 = vmul.f32 %v3352_v16, %v5249_v50  ;;  %v3318_v34 = vmul.f32 %v4832_v24, %v3239_v46  ;;  %v4835_v16 = vld [vmem:[%s5271_s21 + $0xb8] sm:$0xff]  ;;  %v6479_v52 = vld [vmem:[#allocation41_spill] sm:$0xff] }
 0x6d4   : > { %3475 = vst.msk [vmem:[%s6042_s30 + $0x60] sm:$0xff] %vm3462_vm3, %v3442_v14  ;;  %v3411_v6 = vadd.f32 %v3379_v23, %v6457_v5  ;;  %v3353_v41 = vadd.f32 %v3321_v37, %v2962_v53  ;;  %v6470_v23 = vld [vmem:[#allocation14_spill] sm:$0xff] }
 0x6d5   : > { %v3416_v47 = vadd.f32 %v3384_v29, %v6458_v38  ;;  %v3350_v60 = vadd.f32 %v3318_v34, %v2959_v3  ;;  %v3241_v44 = vpop.permute.xlu0 %3240  ;;  %v2964_v3 = vmul.f32 %v5249_v50, %v6471_v17  ;;  %v6472_v38 = vld [vmem:[#allocation35_spill] sm:$0xff] }
 0x6d6   : > { %v3443_v22 = vsel %vm1847_vm2, %v3411_v6, %v6460_v31  ;;  %v3385_v19 = vmul.f32 %v3353_v41, %v5249_v50  ;;  %v3319_v1 = vmul.f32 %v4833_v25, %v3241_v44  ;;  %v3251_v10 = vpop.permute.xlu1 %3250  ;;  %v4837_v6 = vld [vmem:[%s5271_s21 + $0xa8] sm:$0xff]  ;;  %v6473_v44 = vld [vmem:[#allocation15_spill] sm:$0xff] }
 0x6d7   : > { %3476 = vst.msk [vmem:[%s6042_s30 + $0x68] sm:$0xff] %vm3462_vm3, %v3443_v22  ;;  %v3448_v55 = vsel %vm1847_vm2, %v3416_v47, %v6462_v18  ;;  %v3382_v43 = vmul.f32 %v3350_v60, %v5249_v50  ;;  %v3324_v8 = vmul.f32 %v4834_v35, %v3251_v10  ;;  %v2969_v47 = vmul.f32 %v5249_v50, %v6472_v38  ;;  %v6475_v22 = vld [vmem:[#allocation39_spill] sm:$0xff]  ;;  %v6476_v35 = vld [vmem:[#allocation36_spill] sm:$0xff] }
 0x6d8   : > { %3481 = vst.msk [vmem:[%s6042_s30 + $0x90] sm:$0xff] %vm3462_vm3, %v3448_v55  ;;  %v3417_v15 = vadd.f32 %v3385_v19, %v6463_v61  ;;  %v3351_v33 = vadd.f32 %v3319_v1, %v2960_v39  ;;  %v6474_v39 = vld [vmem:[#allocation12_spill] sm:$0xff]  ;;  %v2970_v19 = vmul.f32 %v5249_v50, %v6475_v22 }
 0x6d9   : > { %v3414_v13 = vadd.f32 %v3382_v43, %v6464_v11  ;;  %v3356_v27 = vadd.f32 %v3324_v8, %v2965_v58  ;;  %v4839_v55 = vld [vmem:[%s5271_s21 + $0xd8] sm:$0xff]  ;;  %v2967_v8 = vmul.f32 %v5249_v50, %v6476_v35 }
 0x6da   : > { %v3449_v54 = vsel %vm1847_vm2, %v3417_v15, %v6467_v9  ;;  %v3383_v20 = vmul.f32 %v3351_v33, %v5249_v50  ;;  %v3253_v12 = vpop.permute.xlu0 %3252  ;;  %v3247_v32 = vpop.permute.xlu1 %3246  ;;  %v6477_v33 = vld [vmem:[#allocation13_spill] sm:$0xff] }
 0x6db   : > { %3482 = vst.msk [vmem:[%s6042_s30 + $0x98] sm:$0xff] %vm3462_vm3, %v3449_v54  ;;  %v3446_v45 = vsel %vm1847_vm2, %v3414_v13, %v6468_v42  ;;  %v3388_v63 = vmul.f32 %v3356_v27, %v5249_v50  ;;  %v3325_v56 = vmul.f32 %v4835_v16, %v3253_v12  ;;  %v3322_v53 = vmul.f32 %v4836_v4, %v3247_v32  ;;  %v6478_v13 = vld [vmem:[#allocation18_spill] sm:$0xff] }
 0x6dc   : > { %3479 = vst.msk [vmem:[%s6042_s30 + $0x80] sm:$0xff] %vm3462_vm3, %v3446_v45  ;;  %v3415_v21 = vadd.f32 %v3383_v20, %v6469_v36  ;;  %v4841_v20 = vld [vmem:[%s5271_s21 + $0xc8] sm:$0xff]  ;;  %v6480_v45 = vld [vmem:[#allocation19_spill] sm:$0xff] }
 0x6dd   : > { %v3420_v48 = vadd.f32 %v3388_v63, %v6470_v23  ;;  %v3357_v37 = vadd.f32 %v3325_v56, %v2966_v62  ;;  %v3354_v46 = vadd.f32 %v3322_v53, %v2963_v2  ;;  %v2968_v62 = vmul.f32 %v5249_v50, %v6479_v52  ;;  %v6482_v53 = vld [vmem:[#allocation16_spill] sm:$0xff] }
 0x6de   : > { %v3447_v28 = vsel %vm1847_vm2, %v3415_v21, %v5925_v30  ;;  %v3249_v14 = vpop.permute.xlu0 %3248  ;;  %v3259_v29 = vpop.permute.xlu1 %3258  ;;  %v4838_v30 = vld [vmem:[%s5271_s21 + $0xd0] sm:$0xff]  ;;  %v4842_v21 = vld [vmem:[%s5271_s21 + $0xe0] sm:$0xff] }
 0x6df   : > { %3480 = vst.msk [vmem:[%s6042_s30 + $0x88] sm:$0xff] %vm3462_vm3, %v3447_v28  ;;  %v3452_v24 = vsel %vm1847_vm2, %v3420_v48, %v5944_v26  ;;  %v3389_v34 = vmul.f32 %v3357_v37, %v5249_v50  ;;  %v3386_v5 = vmul.f32 %v3354_v46, %v5249_v50  ;;  %v3323_v41 = vmul.f32 %v4837_v6, %v3249_v14  ;;  %v6483_v48 = vld [vmem:[#allocation48_spill] sm:$0xff]  ;;  %v6484_v46 = vld [vmem:[#allocation47_spill] sm:$0xff]  ;;  %v6485_v28 = vld [vmem:[#allocation42_spill] sm:$0xff] }
 0x6e0   : > { %3485 = vst.msk [vmem:[%s6042_s30 + $0xb0] sm:$0xff] %vm3462_vm3, %v3452_v24  ;;  %v3328_v60 = vmul.f32 %v4838_v30, %v3259_v29  ;;  %v2973_v14 = vmul.f32 %v5249_v50, %v6485_v28  ;;  %v6486_v29 = vld [vmem:[#allocation17_spill] sm:$0xff]  ;;  %v6487_v6 = vld [vmem:[#allocation46_spill] sm:$0xff] }
 0x6e1   : > { %v3421_v57 = vadd.f32 %v3389_v34, %v6473_v44  ;;  %v3418_v26 = vadd.f32 %v3386_v5, %v6474_v39  ;;  %v3355_v31 = vadd.f32 %v3323_v41, %v2964_v3  ;;  %v2972_v41 = vmul.f32 %v5249_v50, %v6487_v6 }
 0x6e2   : > { %v3360_v25 = vadd.f32 %v3328_v60, %v2969_v47  ;;  %v3261_v1 = vpop.permute.xlu0 %3260  ;;  %v3255_v10 = vpop.permute.xlu1 %3254  ;;  %v4843_v47 = vld [vmem:[%s5271_s21 + $0xf0] sm:$0xff]  ;;  %v4844_v60 = vld [vmem:[%s5271_s21 + $0xe8] sm:$0xff] }
 0x6e3   : > { %v3453_v40 = vsel %vm1847_vm2, %v3421_v57, %v5964_v51  ;;  %v3450_v58 = vsel %vm1847_vm2, %v3418_v26, %v5958_v59  ;;  %v3387_v18 = vmul.f32 %v3355_v31, %v5249_v50  ;;  %v3329_v43 = vmul.f32 %v4839_v55, %v3261_v1  ;;  %v4840_v51 = vld [vmem:[%s5271_s21 + $0xc0] sm:$0xff]  ;;  %v6489_v26 = vld [vmem:[#allocation20_spill] sm:$0xff] }
 0x6e4   : > { %3486 = vst.msk [vmem:[%s6042_s30 + $0xb8] sm:$0xff] %vm3462_vm3, %v3453_v40  ;;  %3483 = vst.msk [vmem:[%s6042_s30 + $0xa0] sm:$0xff] %vm3462_vm3, %v3450_v58  ;;  %v3392_v61 = vmul.f32 %v3360_v25, %v5249_v50  ;;  %v3326_v15 = vmul.f32 %v4840_v51, %v3255_v10  ;;  %v6488_v57 = vld [vmem:[#allocation49_spill] sm:$0xff]  ;;  %v6491_v40 = vld [vmem:[#allocation51_spill] sm:$0xff] }
 0x6e5   : > { %v3419_v59 = vadd.f32 %v3387_v18, %v6477_v33  ;;  %v3361_v11 = vadd.f32 %v3329_v43, %v2970_v19  ;;  %v6490_v25 = vld [vmem:[#allocation45_spill] sm:$0xff]  ;;  %v4845_v43 = vld [vmem:[%s5271_s21 + $0xf8] sm:$0xff] }
 0x6e6   : > { %v3424_v27 = vadd.f32 %v3392_v61, %v6478_v13  ;;  %v3358_v0 = vadd.f32 %v3326_v15, %v2967_v8  ;;  %v3257_v2 = vpop.permute.xlu0 %3256  ;;  %v2974_v1 = vmul.f32 %v5249_v50, %v6490_v25  ;;  %v6492_v8 = vld [vmem:[#allocation22_spill] sm:$0xff]  ;;  %v6493_v51 = vld [vmem:[#allocation21_spill] sm:$0xff] }
 0x6e7   : > { %v3451_v9 = vsel %vm1847_vm2, %v3419_v59, %v5971_v7  ;;  %v3393_v54 = vmul.f32 %v3361_v11, %v5249_v50  ;;  %v3327_v12 = vmul.f32 %v4841_v20, %v3257_v2  ;;  %v6481_v7 = vld [vmem:[#allocation44_spill] sm:$0xff]  ;;  %v6494_v59 = vld [vmem:[#allocation50_spill] sm:$0xff]  ;;  %v6495_v13 = vld [vmem:[#allocation53_spill] sm:$0xff] }
 0x6e8   : > { %3484 = vst.msk [vmem:[%s6042_s30 + $0xa8] sm:$0xff] %vm3462_vm3, %v3451_v9  ;;  %v3456_v32 = vsel %vm1847_vm2, %v3424_v27, %v5976_v49  ;;  %v3390_v42 = vmul.f32 %v3358_v0, %v5249_v50  ;;  %v2971_v4 = vmul.f32 %v5249_v50, %v6481_v7  ;;  %v6496_v2 = vld [vmem:[#allocation23_spill] sm:$0xff] }
 0x6e9   : > { %3489 = vst.msk [vmem:[%s6042_s30 + $0xd0] sm:$0xff] %vm3462_vm3, %v3456_v32  ;;  %v3425_v63 = vadd.f32 %v3393_v54, %v6480_v45  ;;  %v3359_v16 = vadd.f32 %v3327_v12, %v2968_v62  ;;  %v3263_v56 = vpop.permute.xlu1 %3262  ;;  %v6497_v62 = vld [vmem:[#allocation52_spill] sm:$0xff] }
 0x6ea   : > { %v3422_v36 = vadd.f32 %v3390_v42, %v6482_v53  ;;  %v3330_v23 = vmul.f32 %v4842_v21, %v3263_v56 }
 0x6eb   : > { %v3457_v49 = vsel %vm1847_vm2, %v3425_v63, %v6483_v48  ;;  %v3391_v37 = vmul.f32 %v3359_v16, %v5249_v50 }
 0x6ec   : > { %3490 = vst.msk [vmem:[%s6042_s30 + $0xd8] sm:$0xff] %vm3462_vm3, %v3457_v49  ;;  %v3454_v17 = vsel %vm1847_vm2, %v3422_v36, %v6484_v46  ;;  %v3362_v3 = vadd.f32 %v3330_v23, %v2971_v4 }
 0x6ed   : > { %3487 = vst.msk [vmem:[%s6042_s30 + $0xc0] sm:$0xff] %vm3462_vm3, %v3454_v17  ;;  %v3423_v24 = vadd.f32 %v3391_v37, %v6486_v29  ;;  %v3267_v34 = vpop.permute.xlu1 %3266  ;;  %v3265_v5 = vpop.permute.xlu0 %3264 }
 0x6ee   : > { %v3394_v38 = vmul.f32 %v3362_v3, %v5249_v50  ;;  %v3332_v30 = vmul.f32 %v4843_v47, %v3267_v34  ;;  %v3331_v44 = vmul.f32 %v4844_v60, %v3265_v5 }
 0x6ef   : > { %v3455_v39 = vsel %vm1847_vm2, %v3423_v24, %v6488_v57 }
 0x6f0   : > { %3488 = vst.msk [vmem:[%s6042_s30 + $0xc8] sm:$0xff] %vm3462_vm3, %v3455_v39  ;;  %v3426_v31 = vadd.f32 %v3394_v38, %v6489_v26  ;;  %v3364_v22 = vadd.f32 %v3332_v30, %v2973_v14  ;;  %v3363_v19 = vadd.f32 %v3331_v44, %v2972_v41 }
 0x6f1   : > { %v3269_v10 = vpop.permute.xlu0 %3268 }
 0x6f2   : > { %v3458_v58 = vsel %vm1847_vm2, %v3426_v31, %v6491_v40  ;;  %v3396_v18 = vmul.f32 %v3364_v22, %v5249_v50  ;;  %v3395_v55 = vmul.f32 %v3363_v19, %v5249_v50  ;;  %v3333_v35 = vmul.f32 %v4845_v43, %v3269_v10 }
 0x6f3   : > { %3491 = vst.msk [vmem:[%s6042_s30 + $0xe0] sm:$0xff] %vm3462_vm3, %v3458_v58 }
 0x6f4   : > { %v3428_v61 = vadd.f32 %v3396_v18, %v6492_v8  ;;  %v3427_v15 = vadd.f32 %v3395_v55, %v6493_v51  ;;  %v3365_v33 = vadd.f32 %v3333_v35, %v2974_v1 }
 0x6f6   : > { %v3460_v11 = vsel %vm1847_vm2, %v3428_v61, %v6494_v59  ;;  %v3459_v27 = vsel %vm1847_vm2, %v3427_v15, %v6495_v13  ;;  %v3397_v0 = vmul.f32 %v3365_v33, %v5249_v50 }
 0x6f7   : > { %3493 = vst.msk [vmem:[%s6042_s30 + $0xf0] sm:$0xff] %vm3462_vm3, %v3460_v11  ;;  %3492 = vst.msk [vmem:[%s6042_s30 + $0xe8] sm:$0xff] %vm3462_vm3, %v3459_v27 }
 0x6f8   : > { %v3429_v52 = vadd.f32 %v3397_v0, %v6496_v2 }
 0x6fa   : > { %v3461_v9 = vsel %vm1847_vm2, %v3429_v52, %v6497_v62 }
 0x6fb   : > { %3494 = vst.msk [vmem:[%s6042_s30 + $0xf8] sm:$0xff] %vm3462_vm3, %v3461_v9 }
 0x6fc PF: > { %s30_s0 = sadd.s32 1, %s4871_s0  }
 0x6fd   : > { %p27_p1 = scmp.ge.s32.totalorder %s30_s0, 4  }
 0x6ff   :  { %29 = sbr.rel (!%p27_p1) target bundleno = 6 (0x6), region = 134 }
 0x704   :  { %3517 = vsyncpa [#allocation3], 1 }
 0x705   :  { %3519 = vsyncpa [#allocation3 + $0x1], 1 }

</bundles_post_ra>
